<compile_context>
chip_gen: v7x
topology: tpu7x:2x2x1
jax: 0.10.0
libtpu: 0.0.40
codegen_flags: <defaults>
</compile_context>

<pallas_src>
import jax
import jax.numpy as jnp
from jax.experimental import pallas as pl
from jax.experimental.pallas import tpu as pltpu


# ---------------------------------------------------------------------------
# Kernel A: fused conv feature extractor (one image per grid step)
# ---------------------------------------------------------------------------

def _conv_feature_kernel(x_ref, keep2_ref, w1_ref, b1_ref, w2_ref, b2_ref,
                         feat_ref, a1_s):
    # x_ref    : (24, 24) f32   zero-padded input image (22x22 + pad 1)
    # keep2_ref: (32, 1)  f32   dropout2d scale per conv2 output channel
    # w1_ref   : (16, 25) bf16  conv1 weights, cols ordered (kw, kh)
    # b1_ref   : (16, 1)  f32
    # w2_ref   : (32, 400) bf16 conv2 weights, cols ordered (kh, kw, ci)
    # b2_ref   : (32, 1)  f32
    # feat_ref : (32, 16) f32   features, NCHW flatten order [co, h2*4 + w2]
    # a1_s     : VMEM (12, 16, 12) f32 scratch: pooled conv1 act, (H, C, W),
    #            zero ring = padding for conv2.
    f32 = jnp.float32

    # Even/odd lane selection matrices for the 2x2 max-pool along the W axis.
    def _sel(n_in, n_out, offset):
        w = jax.lax.broadcasted_iota(jnp.int32, (n_in, n_out), 0)
        j = jax.lax.broadcasted_iota(jnp.int32, (n_in, n_out), 1)
        return (w == 2 * j + offset).astype(f32)

    sel1_e, sel1_o = _sel(20, 10, 0), _sel(20, 10, 1)
    sel2_e, sel2_o = _sel(8, 4, 0), _sel(8, 4, 1)

    a1_s[...] = jnp.zeros_like(a1_s)          # zero ring = conv2 padding

    w1 = w1_ref[...]
    b1 = b1_ref[...]

    # ---- conv1 (1->16, 5x5) on the 24x24 padded image ----
    def conv1_row(r):
        # patch matrix (25, 20): row = kw*5 + kh, col = ow
        pats = jnp.concatenate(
            [x_ref[r:r + 5, kw:kw + 20] for kw in range(5)], axis=0)
        return jnp.dot(w1, pats.astype(jnp.bfloat16),
                       preferred_element_type=f32)          # (16, 20) [co, ow]

    for i in range(10):                                     # pooled output row
        m = jnp.maximum(conv1_row(2 * i), conv1_row(2 * i + 1))      # pool oh
        p = jnp.maximum(jnp.dot(m, sel1_e, preferred_element_type=f32),
                        jnp.dot(m, sel1_o, preferred_element_type=f32))  # pool ow
        # relu(maxpool(conv)+b) == relu(maxpool(conv+b)); store at pad offset 1
        a1_s[1 + i, :, 1:11] = jnp.maximum(p + b1, 0.0)     # (16, 10)

    w2 = w2_ref[...]
    b2 = b2_ref[...]
    keep2 = keep2_ref[...]

    # ---- conv2 (16->32, 5x5) on the 12x12x16 padded activation ----
    def conv2_row(r):
        planes = [a1_s[r + kh] for kh in range(5)]          # each (16, 12)
        pats = jnp.concatenate(
            [planes[kh][:, kw:kw + 8] for kh in range(5) for kw in range(5)],
            axis=0)                                         # (400, 8)
        return jnp.dot(w2, pats.astype(jnp.bfloat16),
                       preferred_element_type=f32)          # (32, 8) [co, ow]

    rows = []
    for j in range(4):                                      # pooled output row
        m = jnp.maximum(conv2_row(2 * j), conv2_row(2 * j + 1))
        p = jnp.maximum(jnp.dot(m, sel2_e, preferred_element_type=f32),
                        jnp.dot(m, sel2_o, preferred_element_type=f32))
        # dropout2d scale >= 0 commutes with max/relu; bias before dropout as in torch
        rows.append(jnp.maximum((p + b2) * keep2, 0.0))     # (32, 4)
    feat_ref[...] = jnp.concatenate(rows, axis=1)           # (32, 16), one store


def conv_features(xpad, keep2, kp):
    B = xpad.shape[0]
    grid_spec = pltpu.PrefetchScalarGridSpec(
        num_scalar_prefetch=0,
        grid=(B,),
        in_specs=[
            pl.BlockSpec((None, 24, 24), lambda b: (b, 0, 0)),   # padded image
            pl.BlockSpec((None, 32, 1), lambda b: (b, 0, 0)),    # dropout2d scale
            pl.BlockSpec((16, 25), lambda b: (0, 0)),            # conv1 w (VMEM resident)
            pl.BlockSpec((16, 1), lambda b: (0, 0)),             # conv1 b
            pl.BlockSpec((32, 400), lambda b: (0, 0)),           # conv2 w
            pl.BlockSpec((32, 1), lambda b: (0, 0)),             # conv2 b
        ],
        out_specs=pl.BlockSpec((None, 32, 16), lambda b: (b, 0, 0)),
        scratch_shapes=[pltpu.VMEM((12, 16, 12), jnp.float32)],
    )
    return pl.pallas_call(
        _conv_feature_kernel,
        out_shape=jax.ShapeDtypeStruct((B, 32, 16), jnp.float32),
        grid_spec=grid_spec,
        compiler_params=pltpu.CompilerParams(
            dimension_semantics=("parallel",)),
    )(xpad, keep2, kp["w1"], kp["b1"], kp["w2"], kp["b2"])


# ---------------------------------------------------------------------------
# Kernel B: fused linear1 -> relu -> dropout -> linear2 -> masked log-softmax
# ---------------------------------------------------------------------------

def _mlp_head_kernel(x_ref, m1_ref, wl1_ref, bl1_ref, wl2_ref, bl2_ref, o_ref):
    f32 = jnp.float32
    h = jnp.dot(x_ref[...].astype(jnp.bfloat16), wl1_ref[...],
                preferred_element_type=f32) + bl1_ref[...]
    h = jnp.maximum(h, 0.0) * m1_ref[...]                   # relu + dropout
    logits = jnp.dot(h.astype(jnp.bfloat16), wl2_ref[...],
                     preferred_element_type=f32) + bl2_ref[...]   # (TM, 128)
    # log-softmax over the 10 real classes only (cols >= 10 are lane padding)
    col = jax.lax.broadcasted_iota(jnp.int32, logits.shape, 1)
    valid = col < 10
    z = jnp.where(valid, logits, -1e30)
    z = z - jnp.max(z, axis=-1, keepdims=True)
    p = jnp.where(valid, jnp.exp(z), 0.0)
    o_ref[...] = z - jnp.log(jnp.sum(p, axis=-1, keepdims=True))


def mlp_head(feat, m1, kp, tm):
    b_pad = feat.shape[0]
    grid_spec = pltpu.PrefetchScalarGridSpec(
        num_scalar_prefetch=0,
        grid=(b_pad // tm,),
        in_specs=[
            pl.BlockSpec((tm, 512), lambda i: (i, 0)),       # features
            pl.BlockSpec((tm, 128), lambda i: (i, 0)),       # dropout mask
            pl.BlockSpec((512, 128), lambda i: (0, 0)),      # linear1 w
            pl.BlockSpec((1, 128), lambda i: (0, 0)),        # linear1 b
            pl.BlockSpec((128, 128), lambda i: (0, 0)),      # linear2 w (padded)
            pl.BlockSpec((1, 128), lambda i: (0, 0)),        # linear2 b (padded)
        ],
        out_specs=pl.BlockSpec((tm, 128), lambda i: (i, 0)),
    )
    return pl.pallas_call(
        _mlp_head_kernel,
        out_shape=jax.ShapeDtypeStruct((b_pad, 128), jnp.float32),
        grid_spec=grid_spec,
        compiler_params=pltpu.CompilerParams(
            dimension_semantics=("parallel",)),
    )(feat, m1, kp["wl1"], kp["bl1"], kp["wl2"], kp["bl2"])


# ---------------------------------------------------------------------------
# JAX glue: parameter sampling (mean-field Gaussian reparam) + forward
# ---------------------------------------------------------------------------

def _sample_layer(key, w_shape, b_shape, w_prior_sigma, b_prior_sigma,
                  init_prior_sigma_scale, stochastic=True):
    k1, k2, k3, k4 = jax.random.split(key, 4)
    w_mean = jax.random.uniform(k1, w_shape, jnp.float32) - 0.5
    log_w_sigma = jnp.full(w_shape, jnp.log(init_prior_sigma_scale * w_prior_sigma),
                           jnp.float32)
    b_mean = jax.random.uniform(k3, b_shape, jnp.float32) - 0.5
    log_b_sigma = jnp.full(b_shape, jnp.log(init_prior_sigma_scale * b_prior_sigma),
                           jnp.float32)
    if stochastic:
        w = w_mean + jnp.exp(log_w_sigma) * jax.random.normal(k2, w_shape, jnp.float32)
        b = b_mean + jnp.exp(log_b_sigma) * jax.random.normal(k4, b_shape, jnp.float32)
    else:
        w, b = w_mean, b_mean
    return w, b


def init_params(key, stochastic=True):
    kc1, kc2, kl1, kl2 = jax.random.split(key, 4)
    w1, b1 = _sample_layer(kc1, (16, 1, 5, 5), (16,), 1.0, 5.0, 1e-7, stochastic)
    w2, b2 = _sample_layer(kc2, (32, 16, 5, 5), (32,), 1.0, 5.0, 1e-7, stochastic)
    wl1, bl1 = _sample_layer(kl1, (128, 512), (128,), 1.0, 5.0, 1e-7, stochastic)
    wl2, bl2 = _sample_layer(kl2, (10, 128), (10,), 1.0, 5.0, 1e-7, stochastic)
    return (w1, b1, w2, b2, wl1, bl1, wl2, bl2)


def prepare_kernel_params(params):
    """One-time re-layout of the sampled parameters for the kernels."""
    w1, b1, w2, b2, wl1, bl1, wl2, bl2 = params
    # conv1: (co, 1, kh, kw) -> (co, kw*5 + kh)
    w1m = jnp.transpose(w1[:, 0], (0, 2, 1)).reshape(16, 25).astype(jnp.bfloat16)
    # conv2: (co, ci, kh, kw) -> (co, (kh*5 + kw)*16 + ci)
    w2m = jnp.transpose(w2, (0, 2, 3, 1)).reshape(32, 400).astype(jnp.bfloat16)
    wl1t = jnp.transpose(wl1).astype(jnp.bfloat16)                 # (512, 128)
    wl2t = jnp.zeros((128, 128), jnp.float32).at[:, :10].set(jnp.transpose(wl2))
    bl2p = jnp.zeros((1, 128), jnp.float32).at[0, :10].set(bl2)
    return {
        "w1": w1m, "b1": b1.reshape(16, 1).astype(jnp.float32),
        "w2": w2m, "b2": b2.reshape(32, 1).astype(jnp.float32),
        "wl1": wl1t, "bl1": bl1.reshape(1, 128).astype(jnp.float32),
        "wl2": wl2t.astype(jnp.bfloat16), "bl2": bl2p,
    }


def bayesian_mnist_forward(x_nchw, kparams, dropout_key, p_mc_dropout=0.5,
                           stochastic=True):
    B = x_nchw.shape[0]
    x = x_nchw[:, 0].astype(jnp.float32)                  # (B, 22, 22), Cin = 1
    xpad = jnp.pad(x, ((0, 0), (1, 1), (1, 1)))           # (B, 24, 24)

    k2, k1 = jax.random.split(dropout_key)
    if stochastic and p_mc_dropout is not None:
        scale = 1.0 / (1.0 - p_mc_dropout)
        keep2 = (jax.random.bernoulli(k2, 1.0 - p_mc_dropout, (B, 32))
                 .astype(jnp.float32) * scale)            # dropout2d: per (n, channel)
        m1 = (jax.random.bernoulli(k1, 1.0 - p_mc_dropout, (B, 128))
              .astype(jnp.float32) * scale)
    else:
        keep2 = jnp.ones((B, 32), jnp.float32)
        m1 = jnp.ones((B, 128), jnp.float32)

    feat = conv_features(xpad, keep2.reshape(B, 32, 1), kparams)   # (B, 32, 16)
    feat = feat.reshape(B, 512)                                    # == NCHW view(-1, 512)

    # Tile the MLP head over batch rows (MC samples / larger batches scale here).
    tm = 128 if B >= 128 else ((B + 7) // 8) * 8
    b_pad = ((B + tm - 1) // tm) * tm
    if b_pad != B:
        feat = jnp.pad(feat, ((0, b_pad - B), (0, 0)))
        m1 = jnp.pad(m1, ((0, b_pad - B), (0, 0)))
    logp = mlp_head(feat, m1, kparams, tm)                         # (b_pad, 128)
    return logp[:B, :10]


# ---------------------------------------------------------------------------

if __name__ == "__main__":
    key = jax.random.PRNGKey(0)
    k_params, k_x, k_drop = jax.random.split(key, 3)

    # Spatial size 22 so that the flatten matches the module's hard-coded 512:
    # 22 -(conv5,pad1)-> 20 -(pool2)-> 10 -(conv5,pad1)-> 8 -(pool2)-> 4 ; 32*4*4 = 512
    x = jax.random.normal(k_x, (2, 1, 22, 22), jnp.float32)

    params = init_params(k_params, stochastic=True)
    kparams = prepare_kernel_params(params)      # one-time weight re-layout

    logp = bayesian_mnist_forward(x, kparams, k_drop, p_mc_dropout=0.5,
                                  stochastic=True)
    logp = jax.block_until_ready(logp)

    assert logp.shape == (2, 10)
    assert bool(jnp.all(jnp.isfinite(logp)))
    # log_softmax rows must sum (in prob space) to ~1
    assert bool(jnp.allclose(jnp.sum(jnp.exp(logp), axis=1), 1.0, atol=1e-4))
    print("KERNEL_OK")
</pallas_src>

<mosaic_0001>
module attributes {stable_mosaic.version = 11 : i64} {
  func.func @_conv_feature_kernel(%arg0: i32, %arg1: memref<1x24x24xf32, #tpu.memory_space<vmem>>, %arg2: memref<1x32x1xf32, #tpu.memory_space<vmem>>, %arg3: memref<16x25xbf16, #tpu.memory_space<vmem>>, %arg4: memref<16x1xf32, #tpu.memory_space<vmem>>, %arg5: memref<32x400xbf16, #tpu.memory_space<vmem>>, %arg6: memref<32x1xf32, #tpu.memory_space<vmem>>, %arg7: memref<1x32x16xf32, #tpu.memory_space<vmem>>, %arg8: memref<12x16x12xf32, #tpu.memory_space<vmem>>) attributes {dimension_semantics = [#tpu.dimension_semantics<parallel>], iteration_bounds = array<i64: 2>, scalar_prefetch = 0 : i64, scratch_operands = 1 : i64, tpu.core_type = #tpu.core_type<tc>, window_params = [{transform_indices = @transform_0, window_bounds = array<i64: 1, 24, 24>}, {transform_indices = @transform_1, window_bounds = array<i64: 1, 32, 1>}, {pipeline_mode = #tpu.pipeline_mode<synchronous>, transform_indices = @transform_2, window_bounds = array<i64: 16, 25>}, {pipeline_mode = #tpu.pipeline_mode<synchronous>, transform_indices = @transform_3, window_bounds = array<i64: 16, 1>}, {pipeline_mode = #tpu.pipeline_mode<synchronous>, transform_indices = @transform_4, window_bounds = array<i64: 32, 400>}, {pipeline_mode = #tpu.pipeline_mode<synchronous>, transform_indices = @transform_5, window_bounds = array<i64: 32, 1>}, {transform_indices = @transform_6, window_bounds = array<i64: 1, 32, 16>}]} {
    %0 = tpu.iota {dimensions = array<i32: 0>} : vector<20x10xi32>
    %1 = tpu.iota {dimensions = array<i32: 1>} : vector<20x10xi32>
    %c2_i32 = arith.constant 2 : i32
    %2 = vector.broadcast %c2_i32 : i32 to vector<20x10xi32>
    %3 = arith.muli %2, %1 : vector<20x10xi32>
    %c0_i32 = arith.constant 0 : i32
    %4 = vector.broadcast %c0_i32 : i32 to vector<20x10xi32>
    %5 = arith.addi %3, %4 : vector<20x10xi32>
    %6 = arith.cmpi eq, %0, %5 : vector<20x10xi32>
    %7 = arith.extui %6 : vector<20x10xi1> to vector<20x10xi32>
    %8 = arith.sitofp %7 : vector<20x10xi32> to vector<20x10xf32>
    %9 = tpu.iota {dimensions = array<i32: 0>} : vector<20x10xi32>
    %10 = tpu.iota {dimensions = array<i32: 1>} : vector<20x10xi32>
    %c2_i32_0 = arith.constant 2 : i32
    %11 = vector.broadcast %c2_i32_0 : i32 to vector<20x10xi32>
    %12 = arith.muli %11, %10 : vector<20x10xi32>
    %c1_i32 = arith.constant 1 : i32
    %13 = vector.broadcast %c1_i32 : i32 to vector<20x10xi32>
    %14 = arith.addi %12, %13 : vector<20x10xi32>
    %15 = arith.cmpi eq, %9, %14 : vector<20x10xi32>
    %16 = arith.extui %15 : vector<20x10xi1> to vector<20x10xi32>
    %17 = arith.sitofp %16 : vector<20x10xi32> to vector<20x10xf32>
    %18 = tpu.iota {dimensions = array<i32: 0>} : vector<8x4xi32>
    %19 = tpu.iota {dimensions = array<i32: 1>} : vector<8x4xi32>
    %c2_i32_1 = arith.constant 2 : i32
    %20 = vector.broadcast %c2_i32_1 : i32 to vector<8x4xi32>
    %21 = arith.muli %20, %19 : vector<8x4xi32>
    %c0_i32_2 = arith.constant 0 : i32
    %22 = vector.broadcast %c0_i32_2 : i32 to vector<8x4xi32>
    %23 = arith.addi %21, %22 : vector<8x4xi32>
    %24 = arith.cmpi eq, %18, %23 : vector<8x4xi32>
    %25 = arith.extui %24 : vector<8x4xi1> to vector<8x4xi32>
    %26 = arith.sitofp %25 : vector<8x4xi32> to vector<8x4xf32>
    %27 = tpu.iota {dimensions = array<i32: 0>} : vector<8x4xi32>
    %28 = tpu.iota {dimensions = array<i32: 1>} : vector<8x4xi32>
    %c2_i32_3 = arith.constant 2 : i32
    %29 = vector.broadcast %c2_i32_3 : i32 to vector<8x4xi32>
    %30 = arith.muli %29, %28 : vector<8x4xi32>
    %c1_i32_4 = arith.constant 1 : i32
    %31 = vector.broadcast %c1_i32_4 : i32 to vector<8x4xi32>
    %32 = arith.addi %30, %31 : vector<8x4xi32>
    %33 = arith.cmpi eq, %27, %32 : vector<8x4xi32>
    %34 = arith.extui %33 : vector<8x4xi1> to vector<8x4xi32>
    %35 = arith.sitofp %34 : vector<8x4xi32> to vector<8x4xf32>
    %cst = arith.constant 0.000000e+00 : f32
    %36 = vector.broadcast %cst : f32 to vector<12x16x12xf32>
    %c0 = arith.constant 0 : index
    %c0_5 = arith.constant 0 : index
    %c0_6 = arith.constant 0 : index
    %37 = vector.load %arg8[%c0, %c0_5, %c0_6] : memref<12x16x12xf32, #tpu.memory_space<vmem>>, vector<12x16x12xf32>
    tpu.vector_store %arg8[%c0, %c0_5, %c0_6], %36 {strides = array<i32>} : memref<12x16x12xf32, #tpu.memory_space<vmem>>, vector<12x16x12xf32>,
    %c0_7 = arith.constant 0 : index
    %c0_8 = arith.constant 0 : index
    %38 = vector.load %arg3[%c0_7, %c0_8] : memref<16x25xbf16, #tpu.memory_space<vmem>>, vector<16x25xbf16>
    %c0_9 = arith.constant 0 : index
    %c0_10 = arith.constant 0 : index
    %39 = vector.load %arg4[%c0_9, %c0_10] : memref<16x1xf32, #tpu.memory_space<vmem>>, vector<16x1xf32>
    %c0_11 = arith.constant 0 : index
    %c0_12 = arith.constant 0 : index
    %c0_13 = arith.constant 0 : index
    %40 = vector.load %arg1[%c0_11, %c0_12, %c0_13] : memref<1x24x24xf32, #tpu.memory_space<vmem>>, vector<1x5x20xf32>
    %41 = vector.shape_cast %40 : vector<1x5x20xf32> to vector<5x20xf32>
    %c0_14 = arith.constant 0 : index
    %c0_15 = arith.constant 0 : index
    %c1 = arith.constant 1 : index
    %42 = vector.load %arg1[%c0_14, %c0_15, %c1] : memref<1x24x24xf32, #tpu.memory_space<vmem>>, vector<1x5x20xf32>
    %43 = vector.shape_cast %42 : vector<1x5x20xf32> to vector<5x20xf32>
    %c0_16 = arith.constant 0 : index
    %c0_17 = arith.constant 0 : index
    %c2 = arith.constant 2 : index
    %44 = vector.load %arg1[%c0_16, %c0_17, %c2] : memref<1x24x24xf32, #tpu.memory_space<vmem>>, vector<1x5x20xf32>
    %45 = vector.shape_cast %44 : vector<1x5x20xf32> to vector<5x20xf32>
    %c0_18 = arith.constant 0 : index
    %c0_19 = arith.constant 0 : index
    %c3 = arith.constant 3 : index
    %46 = vector.load %arg1[%c0_18, %c0_19, %c3] : memref<1x24x24xf32, #tpu.memory_space<vmem>>, vector<1x5x20xf32>
    %47 = vector.shape_cast %46 : vector<1x5x20xf32> to vector<5x20xf32>
    %c0_20 = arith.constant 0 : index
    %c0_21 = arith.constant 0 : index
    %c4 = arith.constant 4 : index
    %48 = vector.load %arg1[%c0_20, %c0_21, %c4] : memref<1x24x24xf32, #tpu.memory_space<vmem>>, vector<1x5x20xf32>
    %49 = vector.shape_cast %48 : vector<1x5x20xf32> to vector<5x20xf32>
    %50 = tpu.concatenate %41, %43, %45, %47, %49 in 0 : vector<5x20xf32>, vector<5x20xf32>, vector<5x20xf32>, vector<5x20xf32>, vector<5x20xf32> -> vector<25x20xf32>
    %51 = arith.truncf %50 : vector<25x20xf32> to vector<25x20xbf16>
    %cst_22 = arith.constant dense<0.000000e+00> : vector<16x20xf32>
    %52 = tpu.matmul %38, %51, %cst_22 {dimension_numbers = #tpu.dot_dimension_numbers<[1], [0], [0], [1], [0, 0, 1, 1], [], []>} : vector<16x25xbf16>, vector<25x20xbf16>, vector<16x20xf32> -> vector<16x20xf32>
    %c0_23 = arith.constant 0 : index
    %c1_24 = arith.constant 1 : index
    %c0_25 = arith.constant 0 : index
    %53 = vector.load %arg1[%c0_23, %c1_24, %c0_25] : memref<1x24x24xf32, #tpu.memory_space<vmem>>, vector<1x5x20xf32>
    %54 = vector.shape_cast %53 : vector<1x5x20xf32> to vector<5x20xf32>
    %c0_26 = arith.constant 0 : index
    %c1_27 = arith.constant 1 : index
    %c1_28 = arith.constant 1 : index
    %55 = vector.load %arg1[%c0_26, %c1_27, %c1_28] : memref<1x24x24xf32, #tpu.memory_space<vmem>>, vector<1x5x20xf32>
    %56 = vector.shape_cast %55 : vector<1x5x20xf32> to vector<5x20xf32>
    %c0_29 = arith.constant 0 : index
    %c1_30 = arith.constant 1 : index
    %c2_31 = arith.constant 2 : index
    %57 = vector.load %arg1[%c0_29, %c1_30, %c2_31] : memref<1x24x24xf32, #tpu.memory_space<vmem>>, vector<1x5x20xf32>
    %58 = vector.shape_cast %57 : vector<1x5x20xf32> to vector<5x20xf32>
    %c0_32 = arith.constant 0 : index
    %c1_33 = arith.constant 1 : index
    %c3_34 = arith.constant 3 : index
    %59 = vector.load %arg1[%c0_32, %c1_33, %c3_34] : memref<1x24x24xf32, #tpu.memory_space<vmem>>, vector<1x5x20xf32>
    %60 = vector.shape_cast %59 : vector<1x5x20xf32> to vector<5x20xf32>
    %c0_35 = arith.constant 0 : index
    %c1_36 = arith.constant 1 : index
    %c4_37 = arith.constant 4 : index
    %61 = vector.load %arg1[%c0_35, %c1_36, %c4_37] : memref<1x24x24xf32, #tpu.memory_space<vmem>>, vector<1x5x20xf32>
    %62 = vector.shape_cast %61 : vector<1x5x20xf32> to vector<5x20xf32>
    %63 = tpu.concatenate %54, %56, %58, %60, %62 in 0 : vector<5x20xf32>, vector<5x20xf32>, vector<5x20xf32>, vector<5x20xf32>, vector<5x20xf32> -> vector<25x20xf32>
    %64 = arith.truncf %63 : vector<25x20xf32> to vector<25x20xbf16>
    %cst_38 = arith.constant dense<0.000000e+00> : vector<16x20xf32>
    %65 = tpu.matmul %38, %64, %cst_38 {dimension_numbers = #tpu.dot_dimension_numbers<[1], [0], [0], [1], [0, 0, 1, 1], [], []>} : vector<16x25xbf16>, vector<25x20xbf16>, vector<16x20xf32> -> vector<16x20xf32>
    %66 = arith.maximumf %52, %65 : vector<16x20xf32>
    %cst_39 = arith.constant dense<0.000000e+00> : vector<16x10xf32>
    %67 = tpu.matmul %66, %8, %cst_39 {dimension_numbers = #tpu.dot_dimension_numbers<[1], [0], [0], [1], [0, 0, 1, 1], [], []>} : vector<16x20xf32>, vector<20x10xf32>, vector<16x10xf32> -> vector<16x10xf32>
    %cst_40 = arith.constant dense<0.000000e+00> : vector<16x10xf32>
    %68 = tpu.matmul %66, %17, %cst_40 {dimension_numbers = #tpu.dot_dimension_numbers<[1], [0], [0], [1], [0, 0, 1, 1], [], []>} : vector<16x20xf32>, vector<20x10xf32>, vector<16x10xf32> -> vector<16x10xf32>
    %69 = arith.maximumf %67, %68 : vector<16x10xf32>
    %70 = vector.broadcast %39 : vector<16x1xf32> to vector<16x10xf32>
    %71 = arith.addf %69, %70 : vector<16x10xf32>
    %cst_41 = arith.constant 0.000000e+00 : f32
    %72 = vector.broadcast %cst_41 : f32 to vector<16x10xf32>
    %73 = arith.maximumf %71, %72 : vector<16x10xf32>
    %c1_42 = arith.constant 1 : index
    %c0_43 = arith.constant 0 : index
    %c1_44 = arith.constant 1 : index
    %74 = vector.load %arg8[%c1_42, %c0_43, %c1_44] : memref<12x16x12xf32, #tpu.memory_space<vmem>>, vector<1x16x10xf32>
    %75 = vector.shape_cast %74 : vector<1x16x10xf32> to vector<16x10xf32>
    %76 = vector.shape_cast %73 : vector<16x10xf32> to vector<1x16x10xf32>
    tpu.vector_store %arg8[%c1_42, %c0_43, %c1_44], %76 {strides = array<i32>} : memref<12x16x12xf32, #tpu.memory_space<vmem>>, vector<1x16x10xf32>,
    %c0_45 = arith.constant 0 : index
    %c2_46 = arith.constant 2 : index
    %c0_47 = arith.constant 0 : index
    %77 = vector.load %arg1[%c0_45, %c2_46, %c0_47] : memref<1x24x24xf32, #tpu.memory_space<vmem>>, vector<1x5x20xf32>
    %78 = vector.shape_cast %77 : vector<1x5x20xf32> to vector<5x20xf32>
    %c0_48 = arith.constant 0 : index
    %c2_49 = arith.constant 2 : index
    %c1_50 = arith.constant 1 : index
    %79 = vector.load %arg1[%c0_48, %c2_49, %c1_50] : memref<1x24x24xf32, #tpu.memory_space<vmem>>, vector<1x5x20xf32>
    %80 = vector.shape_cast %79 : vector<1x5x20xf32> to vector<5x20xf32>
    %c0_51 = arith.constant 0 : index
    %c2_52 = arith.constant 2 : index
    %c2_53 = arith.constant 2 : index
    %81 = vector.load %arg1[%c0_51, %c2_52, %c2_53] : memref<1x24x24xf32, #tpu.memory_space<vmem>>, vector<1x5x20xf32>
    %82 = vector.shape_cast %81 : vector<1x5x20xf32> to vector<5x20xf32>
    %c0_54 = arith.constant 0 : index
    %c2_55 = arith.constant 2 : index
    %c3_56 = arith.constant 3 : index
    %83 = vector.load %arg1[%c0_54, %c2_55, %c3_56] : memref<1x24x24xf32, #tpu.memory_space<vmem>>, vector<1x5x20xf32>
    %84 = vector.shape_cast %83 : vector<1x5x20xf32> to vector<5x20xf32>
    %c0_57 = arith.constant 0 : index
    %c2_58 = arith.constant 2 : index
    %c4_59 = arith.constant 4 : index
    %85 = vector.load %arg1[%c0_57, %c2_58, %c4_59] : memref<1x24x24xf32, #tpu.memory_space<vmem>>, vector<1x5x20xf32>
    %86 = vector.shape_cast %85 : vector<1x5x20xf32> to vector<5x20xf32>
    %87 = tpu.concatenate %78, %80, %82, %84, %86 in 0 : vector<5x20xf32>, vector<5x20xf32>, vector<5x20xf32>, vector<5x20xf32>, vector<5x20xf32> -> vector<25x20xf32>
    %88 = arith.truncf %87 : vector<25x20xf32> to vector<25x20xbf16>
    %cst_60 = arith.constant dense<0.000000e+00> : vector<16x20xf32>
    %89 = tpu.matmul %38, %88, %cst_60 {dimension_numbers = #tpu.dot_dimension_numbers<[1], [0], [0], [1], [0, 0, 1, 1], [], []>} : vector<16x25xbf16>, vector<25x20xbf16>, vector<16x20xf32> -> vector<16x20xf32>
    %c0_61 = arith.constant 0 : index
    %c3_62 = arith.constant 3 : index
    %c0_63 = arith.constant 0 : index
    %90 = vector.load %arg1[%c0_61, %c3_62, %c0_63] : memref<1x24x24xf32, #tpu.memory_space<vmem>>, vector<1x5x20xf32>
    %91 = vector.shape_cast %90 : vector<1x5x20xf32> to vector<5x20xf32>
    %c0_64 = arith.constant 0 : index
    %c3_65 = arith.constant 3 : index
    %c1_66 = arith.constant 1 : index
    %92 = vector.load %arg1[%c0_64, %c3_65, %c1_66] : memref<1x24x24xf32, #tpu.memory_space<vmem>>, vector<1x5x20xf32>
    %93 = vector.shape_cast %92 : vector<1x5x20xf32> to vector<5x20xf32>
    %c0_67 = arith.constant 0 : index
    %c3_68 = arith.constant 3 : index
    %c2_69 = arith.constant 2 : index
    %94 = vector.load %arg1[%c0_67, %c3_68, %c2_69] : memref<1x24x24xf32, #tpu.memory_space<vmem>>, vector<1x5x20xf32>
    %95 = vector.shape_cast %94 : vector<1x5x20xf32> to vector<5x20xf32>
    %c0_70 = arith.constant 0 : index
    %c3_71 = arith.constant 3 : index
    %c3_72 = arith.constant 3 : index
    %96 = vector.load %arg1[%c0_70, %c3_71, %c3_72] : memref<1x24x24xf32, #tpu.memory_space<vmem>>, vector<1x5x20xf32>
    %97 = vector.shape_cast %96 : vector<1x5x20xf32> to vector<5x20xf32>
    %c0_73 = arith.constant 0 : index
    %c3_74 = arith.constant 3 : index
    %c4_75 = arith.constant 4 : index
    %98 = vector.load %arg1[%c0_73, %c3_74, %c4_75] : memref<1x24x24xf32, #tpu.memory_space<vmem>>, vector<1x5x20xf32>
    %99 = vector.shape_cast %98 : vector<1x5x20xf32> to vector<5x20xf32>
    %100 = tpu.concatenate %91, %93, %95, %97, %99 in 0 : vector<5x20xf32>, vector<5x20xf32>, vector<5x20xf32>, vector<5x20xf32>, vector<5x20xf32> -> vector<25x20xf32>
    %101 = arith.truncf %100 : vector<25x20xf32> to vector<25x20xbf16>
    %cst_76 = arith.constant dense<0.000000e+00> : vector<16x20xf32>
    %102 = tpu.matmul %38, %101, %cst_76 {dimension_numbers = #tpu.dot_dimension_numbers<[1], [0], [0], [1], [0, 0, 1, 1], [], []>} : vector<16x25xbf16>, vector<25x20xbf16>, vector<16x20xf32> -> vector<16x20xf32>
    %103 = arith.maximumf %89, %102 : vector<16x20xf32>
    %cst_77 = arith.constant dense<0.000000e+00> : vector<16x10xf32>
    %104 = tpu.matmul %103, %8, %cst_77 {dimension_numbers = #tpu.dot_dimension_numbers<[1], [0], [0], [1], [0, 0, 1, 1], [], []>} : vector<16x20xf32>, vector<20x10xf32>, vector<16x10xf32> -> vector<16x10xf32>
    %cst_78 = arith.constant dense<0.000000e+00> : vector<16x10xf32>
    %105 = tpu.matmul %103, %17, %cst_78 {dimension_numbers = #tpu.dot_dimension_numbers<[1], [0], [0], [1], [0, 0, 1, 1], [], []>} : vector<16x20xf32>, vector<20x10xf32>, vector<16x10xf32> -> vector<16x10xf32>
    %106 = arith.maximumf %104, %105 : vector<16x10xf32>
    %107 = vector.broadcast %39 : vector<16x1xf32> to vector<16x10xf32>
    %108 = arith.addf %106, %107 : vector<16x10xf32>
    %cst_79 = arith.constant 0.000000e+00 : f32
    %109 = vector.broadcast %cst_79 : f32 to vector<16x10xf32>
    %110 = arith.maximumf %108, %109 : vector<16x10xf32>
    %c2_80 = arith.constant 2 : index
    %c0_81 = arith.constant 0 : index
    %c1_82 = arith.constant 1 : index
    %111 = vector.load %arg8[%c2_80, %c0_81, %c1_82] : memref<12x16x12xf32, #tpu.memory_space<vmem>>, vector<1x16x10xf32>
    %112 = vector.shape_cast %111 : vector<1x16x10xf32> to vector<16x10xf32>
    %113 = vector.shape_cast %110 : vector<16x10xf32> to vector<1x16x10xf32>
    tpu.vector_store %arg8[%c2_80, %c0_81, %c1_82], %113 {strides = array<i32>} : memref<12x16x12xf32, #tpu.memory_space<vmem>>, vector<1x16x10xf32>,
    %c0_83 = arith.constant 0 : index
    %c4_84 = arith.constant 4 : index
    %c0_85 = arith.constant 0 : index
    %114 = vector.load %arg1[%c0_83, %c4_84, %c0_85] : memref<1x24x24xf32, #tpu.memory_space<vmem>>, vector<1x5x20xf32>
    %115 = vector.shape_cast %114 : vector<1x5x20xf32> to vector<5x20xf32>
    %c0_86 = arith.constant 0 : index
    %c4_87 = arith.constant 4 : index
    %c1_88 = arith.constant 1 : index
    %116 = vector.load %arg1[%c0_86, %c4_87, %c1_88] : memref<1x24x24xf32, #tpu.memory_space<vmem>>, vector<1x5x20xf32>
    %117 = vector.shape_cast %116 : vector<1x5x20xf32> to vector<5x20xf32>
    %c0_89 = arith.constant 0 : index
    %c4_90 = arith.constant 4 : index
    %c2_91 = arith.constant 2 : index
    %118 = vector.load %arg1[%c0_89, %c4_90, %c2_91] : memref<1x24x24xf32, #tpu.memory_space<vmem>>, vector<1x5x20xf32>
    %119 = vector.shape_cast %118 : vector<1x5x20xf32> to vector<5x20xf32>
    %c0_92 = arith.constant 0 : index
    %c4_93 = arith.constant 4 : index
    %c3_94 = arith.constant 3 : index
    %120 = vector.load %arg1[%c0_92, %c4_93, %c3_94] : memref<1x24x24xf32, #tpu.memory_space<vmem>>, vector<1x5x20xf32>
    %121 = vector.shape_cast %120 : vector<1x5x20xf32> to vector<5x20xf32>
    %c0_95 = arith.constant 0 : index
    %c4_96 = arith.constant 4 : index
    %c4_97 = arith.constant 4 : index
    %122 = vector.load %arg1[%c0_95, %c4_96, %c4_97] : memref<1x24x24xf32, #tpu.memory_space<vmem>>, vector<1x5x20xf32>
    %123 = vector.shape_cast %122 : vector<1x5x20xf32> to vector<5x20xf32>
    %124 = tpu.concatenate %115, %117, %119, %121, %123 in 0 : vector<5x20xf32>, vector<5x20xf32>, vector<5x20xf32>, vector<5x20xf32>, vector<5x20xf32> -> vector<25x20xf32>
    %125 = arith.truncf %124 : vector<25x20xf32> to vector<25x20xbf16>
    %cst_98 = arith.constant dense<0.000000e+00> : vector<16x20xf32>
    %126 = tpu.matmul %38, %125, %cst_98 {dimension_numbers = #tpu.dot_dimension_numbers<[1], [0], [0], [1], [0, 0, 1, 1], [], []>} : vector<16x25xbf16>, vector<25x20xbf16>, vector<16x20xf32> -> vector<16x20xf32>
    %c0_99 = arith.constant 0 : index
    %c5 = arith.constant 5 : index
    %c0_100 = arith.constant 0 : index
    %127 = vector.load %arg1[%c0_99, %c5, %c0_100] : memref<1x24x24xf32, #tpu.memory_space<vmem>>, vector<1x5x20xf32>
    %128 = vector.shape_cast %127 : vector<1x5x20xf32> to vector<5x20xf32>
    %c0_101 = arith.constant 0 : index
    %c5_102 = arith.constant 5 : index
    %c1_103 = arith.constant 1 : index
    %129 = vector.load %arg1[%c0_101, %c5_102, %c1_103] : memref<1x24x24xf32, #tpu.memory_space<vmem>>, vector<1x5x20xf32>
    %130 = vector.shape_cast %129 : vector<1x5x20xf32> to vector<5x20xf32>
    %c0_104 = arith.constant 0 : index
    %c5_105 = arith.constant 5 : index
    %c2_106 = arith.constant 2 : index
    %131 = vector.load %arg1[%c0_104, %c5_105, %c2_106] : memref<1x24x24xf32, #tpu.memory_space<vmem>>, vector<1x5x20xf32>
    %132 = vector.shape_cast %131 : vector<1x5x20xf32> to vector<5x20xf32>
    %c0_107 = arith.constant 0 : index
    %c5_108 = arith.constant 5 : index
    %c3_109 = arith.constant 3 : index
    %133 = vector.load %arg1[%c0_107, %c5_108, %c3_109] : memref<1x24x24xf32, #tpu.memory_space<vmem>>, vector<1x5x20xf32>
    %134 = vector.shape_cast %133 : vector<1x5x20xf32> to vector<5x20xf32>
    %c0_110 = arith.constant 0 : index
    %c5_111 = arith.constant 5 : index
    %c4_112 = arith.constant 4 : index
    %135 = vector.load %arg1[%c0_110, %c5_111, %c4_112] : memref<1x24x24xf32, #tpu.memory_space<vmem>>, vector<1x5x20xf32>
    %136 = vector.shape_cast %135 : vector<1x5x20xf32> to vector<5x20xf32>
    %137 = tpu.concatenate %128, %130, %132, %134, %136 in 0 : vector<5x20xf32>, vector<5x20xf32>, vector<5x20xf32>, vector<5x20xf32>, vector<5x20xf32> -> vector<25x20xf32>
    %138 = arith.truncf %137 : vector<25x20xf32> to vector<25x20xbf16>
    %cst_113 = arith.constant dense<0.000000e+00> : vector<16x20xf32>
    %139 = tpu.matmul %38, %138, %cst_113 {dimension_numbers = #tpu.dot_dimension_numbers<[1], [0], [0], [1], [0, 0, 1, 1], [], []>} : vector<16x25xbf16>, vector<25x20xbf16>, vector<16x20xf32> -> vector<16x20xf32>
    %140 = arith.maximumf %126, %139 : vector<16x20xf32>
    %cst_114 = arith.constant dense<0.000000e+00> : vector<16x10xf32>
    %141 = tpu.matmul %140, %8, %cst_114 {dimension_numbers = #tpu.dot_dimension_numbers<[1], [0], [0], [1], [0, 0, 1, 1], [], []>} : vector<16x20xf32>, vector<20x10xf32>, vector<16x10xf32> -> vector<16x10xf32>
    %cst_115 = arith.constant dense<0.000000e+00> : vector<16x10xf32>
    %142 = tpu.matmul %140, %17, %cst_115 {dimension_numbers = #tpu.dot_dimension_numbers<[1], [0], [0], [1], [0, 0, 1, 1], [], []>} : vector<16x20xf32>, vector<20x10xf32>, vector<16x10xf32> -> vector<16x10xf32>
    %143 = arith.maximumf %141, %142 : vector<16x10xf32>
    %144 = vector.broadcast %39 : vector<16x1xf32> to vector<16x10xf32>
    %145 = arith.addf %143, %144 : vector<16x10xf32>
    %cst_116 = arith.constant 0.000000e+00 : f32
    %146 = vector.broadcast %cst_116 : f32 to vector<16x10xf32>
    %147 = arith.maximumf %145, %146 : vector<16x10xf32>
    %c3_117 = arith.constant 3 : index
    %c0_118 = arith.constant 0 : index
    %c1_119 = arith.constant 1 : index
    %148 = vector.load %arg8[%c3_117, %c0_118, %c1_119] : memref<12x16x12xf32, #tpu.memory_space<vmem>>, vector<1x16x10xf32>
    %149 = vector.shape_cast %148 : vector<1x16x10xf32> to vector<16x10xf32>
    %150 = vector.shape_cast %147 : vector<16x10xf32> to vector<1x16x10xf32>
    tpu.vector_store %arg8[%c3_117, %c0_118, %c1_119], %150 {strides = array<i32>} : memref<12x16x12xf32, #tpu.memory_space<vmem>>, vector<1x16x10xf32>,
    %c0_120 = arith.constant 0 : index
    %c6 = arith.constant 6 : index
    %c0_121 = arith.constant 0 : index
    %151 = vector.load %arg1[%c0_120, %c6, %c0_121] : memref<1x24x24xf32, #tpu.memory_space<vmem>>, vector<1x5x20xf32>
    %152 = vector.shape_cast %151 : vector<1x5x20xf32> to vector<5x20xf32>
    %c0_122 = arith.constant 0 : index
    %c6_123 = arith.constant 6 : index
    %c1_124 = arith.constant 1 : index
    %153 = vector.load %arg1[%c0_122, %c6_123, %c1_124] : memref<1x24x24xf32, #tpu.memory_space<vmem>>, vector<1x5x20xf32>
    %154 = vector.shape_cast %153 : vector<1x5x20xf32> to vector<5x20xf32>
    %c0_125 = arith.constant 0 : index
    %c6_126 = arith.constant 6 : index
    %c2_127 = arith.constant 2 : index
    %155 = vector.load %arg1[%c0_125, %c6_126, %c2_127] : memref<1x24x24xf32, #tpu.memory_space<vmem>>, vector<1x5x20xf32>
    %156 = vector.shape_cast %155 : vector<1x5x20xf32> to vector<5x20xf32>
    %c0_128 = arith.constant 0 : index
    %c6_129 = arith.constant 6 : index
    %c3_130 = arith.constant 3 : index
    %157 = vector.load %arg1[%c0_128, %c6_129, %c3_130] : memref<1x24x24xf32, #tpu.memory_space<vmem>>, vector<1x5x20xf32>
    %158 = vector.shape_cast %157 : vector<1x5x20xf32> to vector<5x20xf32>
    %c0_131 = arith.constant 0 : index
    %c6_132 = arith.constant 6 : index
    %c4_133 = arith.constant 4 : index
    %159 = vector.load %arg1[%c0_131, %c6_132, %c4_133] : memref<1x24x24xf32, #tpu.memory_space<vmem>>, vector<1x5x20xf32>
    %160 = vector.shape_cast %159 : vector<1x5x20xf32> to vector<5x20xf32>
    %161 = tpu.concatenate %152, %154, %156, %158, %160 in 0 : vector<5x20xf32>, vector<5x20xf32>, vector<5x20xf32>, vector<5x20xf32>, vector<5x20xf32> -> vector<25x20xf32>
    %162 = arith.truncf %161 : vector<25x20xf32> to vector<25x20xbf16>
    %cst_134 = arith.constant dense<0.000000e+00> : vector<16x20xf32>
    %163 = tpu.matmul %38, %162, %cst_134 {dimension_numbers = #tpu.dot_dimension_numbers<[1], [0], [0], [1], [0, 0, 1, 1], [], []>} : vector<16x25xbf16>, vector<25x20xbf16>, vector<16x20xf32> -> vector<16x20xf32>
    %c0_135 = arith.constant 0 : index
    %c7 = arith.constant 7 : index
    %c0_136 = arith.constant 0 : index
    %164 = vector.load %arg1[%c0_135, %c7, %c0_136] : memref<1x24x24xf32, #tpu.memory_space<vmem>>, vector<1x5x20xf32>
    %165 = vector.shape_cast %164 : vector<1x5x20xf32> to vector<5x20xf32>
    %c0_137 = arith.constant 0 : index
    %c7_138 = arith.constant 7 : index
    %c1_139 = arith.constant 1 : index
    %166 = vector.load %arg1[%c0_137, %c7_138, %c1_139] : memref<1x24x24xf32, #tpu.memory_space<vmem>>, vector<1x5x20xf32>
    %167 = vector.shape_cast %166 : vector<1x5x20xf32> to vector<5x20xf32>
    %c0_140 = arith.constant 0 : index
    %c7_141 = arith.constant 7 : index
    %c2_142 = arith.constant 2 : index
    %168 = vector.load %arg1[%c0_140, %c7_141, %c2_142] : memref<1x24x24xf32, #tpu.memory_space<vmem>>, vector<1x5x20xf32>
    %169 = vector.shape_cast %168 : vector<1x5x20xf32> to vector<5x20xf32>
    %c0_143 = arith.constant 0 : index
    %c7_144 = arith.constant 7 : index
    %c3_145 = arith.constant 3 : index
    %170 = vector.load %arg1[%c0_143, %c7_144, %c3_145] : memref<1x24x24xf32, #tpu.memory_space<vmem>>, vector<1x5x20xf32>
    %171 = vector.shape_cast %170 : vector<1x5x20xf32> to vector<5x20xf32>
    %c0_146 = arith.constant 0 : index
    %c7_147 = arith.constant 7 : index
    %c4_148 = arith.constant 4 : index
    %172 = vector.load %arg1[%c0_146, %c7_147, %c4_148] : memref<1x24x24xf32, #tpu.memory_space<vmem>>, vector<1x5x20xf32>
    %173 = vector.shape_cast %172 : vector<1x5x20xf32> to vector<5x20xf32>
    %174 = tpu.concatenate %165, %167, %169, %171, %173 in 0 : vector<5x20xf32>, vector<5x20xf32>, vector<5x20xf32>, vector<5x20xf32>, vector<5x20xf32> -> vector<25x20xf32>
    %175 = arith.truncf %174 : vector<25x20xf32> to vector<25x20xbf16>
    %cst_149 = arith.constant dense<0.000000e+00> : vector<16x20xf32>
    %176 = tpu.matmul %38, %175, %cst_149 {dimension_numbers = #tpu.dot_dimension_numbers<[1], [0], [0], [1], [0, 0, 1, 1], [], []>} : vector<16x25xbf16>, vector<25x20xbf16>, vector<16x20xf32> -> vector<16x20xf32>
    %177 = arith.maximumf %163, %176 : vector<16x20xf32>
    %cst_150 = arith.constant dense<0.000000e+00> : vector<16x10xf32>
    %178 = tpu.matmul %177, %8, %cst_150 {dimension_numbers = #tpu.dot_dimension_numbers<[1], [0], [0], [1], [0, 0, 1, 1], [], []>} : vector<16x20xf32>, vector<20x10xf32>, vector<16x10xf32> -> vector<16x10xf32>
    %cst_151 = arith.constant dense<0.000000e+00> : vector<16x10xf32>
    %179 = tpu.matmul %177, %17, %cst_151 {dimension_numbers = #tpu.dot_dimension_numbers<[1], [0], [0], [1], [0, 0, 1, 1], [], []>} : vector<16x20xf32>, vector<20x10xf32>, vector<16x10xf32> -> vector<16x10xf32>
    %180 = arith.maximumf %178, %179 : vector<16x10xf32>
    %181 = vector.broadcast %39 : vector<16x1xf32> to vector<16x10xf32>
    %182 = arith.addf %180, %181 : vector<16x10xf32>
    %cst_152 = arith.constant 0.000000e+00 : f32
    %183 = vector.broadcast %cst_152 : f32 to vector<16x10xf32>
    %184 = arith.maximumf %182, %183 : vector<16x10xf32>
    %c4_153 = arith.constant 4 : index
    %c0_154 = arith.constant 0 : index
    %c1_155 = arith.constant 1 : index
    %185 = vector.load %arg8[%c4_153, %c0_154, %c1_155] : memref<12x16x12xf32, #tpu.memory_space<vmem>>, vector<1x16x10xf32>
    %186 = vector.shape_cast %185 : vector<1x16x10xf32> to vector<16x10xf32>
    %187 = vector.shape_cast %184 : vector<16x10xf32> to vector<1x16x10xf32>
    tpu.vector_store %arg8[%c4_153, %c0_154, %c1_155], %187 {strides = array<i32>} : memref<12x16x12xf32, #tpu.memory_space<vmem>>, vector<1x16x10xf32>,
    %c0_156 = arith.constant 0 : index
    %c8 = arith.constant 8 : index
    %c0_157 = arith.constant 0 : index
    %188 = vector.load %arg1[%c0_156, %c8, %c0_157] : memref<1x24x24xf32, #tpu.memory_space<vmem>>, vector<1x5x20xf32>
    %189 = vector.shape_cast %188 : vector<1x5x20xf32> to vector<5x20xf32>
    %c0_158 = arith.constant 0 : index
    %c8_159 = arith.constant 8 : index
    %c1_160 = arith.constant 1 : index
    %190 = vector.load %arg1[%c0_158, %c8_159, %c1_160] : memref<1x24x24xf32, #tpu.memory_space<vmem>>, vector<1x5x20xf32>
    %191 = vector.shape_cast %190 : vector<1x5x20xf32> to vector<5x20xf32>
    %c0_161 = arith.constant 0 : index
    %c8_162 = arith.constant 8 : index
    %c2_163 = arith.constant 2 : index
    %192 = vector.load %arg1[%c0_161, %c8_162, %c2_163] : memref<1x24x24xf32, #tpu.memory_space<vmem>>, vector<1x5x20xf32>
    %193 = vector.shape_cast %192 : vector<1x5x20xf32> to vector<5x20xf32>
    %c0_164 = arith.constant 0 : index
    %c8_165 = arith.constant 8 : index
    %c3_166 = arith.constant 3 : index
    %194 = vector.load %arg1[%c0_164, %c8_165, %c3_166] : memref<1x24x24xf32, #tpu.memory_space<vmem>>, vector<1x5x20xf32>
    %195 = vector.shape_cast %194 : vector<1x5x20xf32> to vector<5x20xf32>
    %c0_167 = arith.constant 0 : index
    %c8_168 = arith.constant 8 : index
    %c4_169 = arith.constant 4 : index
    %196 = vector.load %arg1[%c0_167, %c8_168, %c4_169] : memref<1x24x24xf32, #tpu.memory_space<vmem>>, vector<1x5x20xf32>
    %197 = vector.shape_cast %196 : vector<1x5x20xf32> to vector<5x20xf32>
    %198 = tpu.concatenate %189, %191, %193, %195, %197 in 0 : vector<5x20xf32>, vector<5x20xf32>, vector<5x20xf32>, vector<5x20xf32>, vector<5x20xf32> -> vector<25x20xf32>
    %199 = arith.truncf %198 : vector<25x20xf32> to vector<25x20xbf16>
    %cst_170 = arith.constant dense<0.000000e+00> : vector<16x20xf32>
    %200 = tpu.matmul %38, %199, %cst_170 {dimension_numbers = #tpu.dot_dimension_numbers<[1], [0], [0], [1], [0, 0, 1, 1], [], []>} : vector<16x25xbf16>, vector<25x20xbf16>, vector<16x20xf32> -> vector<16x20xf32>
    %c0_171 = arith.constant 0 : index
    %c9 = arith.constant 9 : index
    %c0_172 = arith.constant 0 : index
    %201 = vector.load %arg1[%c0_171, %c9, %c0_172] : memref<1x24x24xf32, #tpu.memory_space<vmem>>, vector<1x5x20xf32>
    %202 = vector.shape_cast %201 : vector<1x5x20xf32> to vector<5x20xf32>
    %c0_173 = arith.constant 0 : index
    %c9_174 = arith.constant 9 : index
    %c1_175 = arith.constant 1 : index
    %203 = vector.load %arg1[%c0_173, %c9_174, %c1_175] : memref<1x24x24xf32, #tpu.memory_space<vmem>>, vector<1x5x20xf32>
    %204 = vector.shape_cast %203 : vector<1x5x20xf32> to vector<5x20xf32>
    %c0_176 = arith.constant 0 : index
    %c9_177 = arith.constant 9 : index
    %c2_178 = arith.constant 2 : index
    %205 = vector.load %arg1[%c0_176, %c9_177, %c2_178] : memref<1x24x24xf32, #tpu.memory_space<vmem>>, vector<1x5x20xf32>
    %206 = vector.shape_cast %205 : vector<1x5x20xf32> to vector<5x20xf32>
    %c0_179 = arith.constant 0 : index
    %c9_180 = arith.constant 9 : index
    %c3_181 = arith.constant 3 : index
    %207 = vector.load %arg1[%c0_179, %c9_180, %c3_181] : memref<1x24x24xf32, #tpu.memory_space<vmem>>, vector<1x5x20xf32>
    %208 = vector.shape_cast %207 : vector<1x5x20xf32> to vector<5x20xf32>
    %c0_182 = arith.constant 0 : index
    %c9_183 = arith.constant 9 : index
    %c4_184 = arith.constant 4 : index
    %209 = vector.load %arg1[%c0_182, %c9_183, %c4_184] : memref<1x24x24xf32, #tpu.memory_space<vmem>>, vector<1x5x20xf32>
    %210 = vector.shape_cast %209 : vector<1x5x20xf32> to vector<5x20xf32>
    %211 = tpu.concatenate %202, %204, %206, %208, %210 in 0 : vector<5x20xf32>, vector<5x20xf32>, vector<5x20xf32>, vector<5x20xf32>, vector<5x20xf32> -> vector<25x20xf32>
    %212 = arith.truncf %211 : vector<25x20xf32> to vector<25x20xbf16>
    %cst_185 = arith.constant dense<0.000000e+00> : vector<16x20xf32>
    %213 = tpu.matmul %38, %212, %cst_185 {dimension_numbers = #tpu.dot_dimension_numbers<[1], [0], [0], [1], [0, 0, 1, 1], [], []>} : vector<16x25xbf16>, vector<25x20xbf16>, vector<16x20xf32> -> vector<16x20xf32>
    %214 = arith.maximumf %200, %213 : vector<16x20xf32>
    %cst_186 = arith.constant dense<0.000000e+00> : vector<16x10xf32>
    %215 = tpu.matmul %214, %8, %cst_186 {dimension_numbers = #tpu.dot_dimension_numbers<[1], [0], [0], [1], [0, 0, 1, 1], [], []>} : vector<16x20xf32>, vector<20x10xf32>, vector<16x10xf32> -> vector<16x10xf32>
    %cst_187 = arith.constant dense<0.000000e+00> : vector<16x10xf32>
    %216 = tpu.matmul %214, %17, %cst_187 {dimension_numbers = #tpu.dot_dimension_numbers<[1], [0], [0], [1], [0, 0, 1, 1], [], []>} : vector<16x20xf32>, vector<20x10xf32>, vector<16x10xf32> -> vector<16x10xf32>
    %217 = arith.maximumf %215, %216 : vector<16x10xf32>
    %218 = vector.broadcast %39 : vector<16x1xf32> to vector<16x10xf32>
    %219 = arith.addf %217, %218 : vector<16x10xf32>
    %cst_188 = arith.constant 0.000000e+00 : f32
    %220 = vector.broadcast %cst_188 : f32 to vector<16x10xf32>
    %221 = arith.maximumf %219, %220 : vector<16x10xf32>
    %c5_189 = arith.constant 5 : index
    %c0_190 = arith.constant 0 : index
    %c1_191 = arith.constant 1 : index
    %222 = vector.load %arg8[%c5_189, %c0_190, %c1_191] : memref<12x16x12xf32, #tpu.memory_space<vmem>>, vector<1x16x10xf32>
    %223 = vector.shape_cast %222 : vector<1x16x10xf32> to vector<16x10xf32>
    %224 = vector.shape_cast %221 : vector<16x10xf32> to vector<1x16x10xf32>
    tpu.vector_store %arg8[%c5_189, %c0_190, %c1_191], %224 {strides = array<i32>} : memref<12x16x12xf32, #tpu.memory_space<vmem>>, vector<1x16x10xf32>,
    %c0_192 = arith.constant 0 : index
    %c10 = arith.constant 10 : index
    %c0_193 = arith.constant 0 : index
    %225 = vector.load %arg1[%c0_192, %c10, %c0_193] : memref<1x24x24xf32, #tpu.memory_space<vmem>>, vector<1x5x20xf32>
    %226 = vector.shape_cast %225 : vector<1x5x20xf32> to vector<5x20xf32>
    %c0_194 = arith.constant 0 : index
    %c10_195 = arith.constant 10 : index
    %c1_196 = arith.constant 1 : index
    %227 = vector.load %arg1[%c0_194, %c10_195, %c1_196] : memref<1x24x24xf32, #tpu.memory_space<vmem>>, vector<1x5x20xf32>
    %228 = vector.shape_cast %227 : vector<1x5x20xf32> to vector<5x20xf32>
    %c0_197 = arith.constant 0 : index
    %c10_198 = arith.constant 10 : index
    %c2_199 = arith.constant 2 : index
    %229 = vector.load %arg1[%c0_197, %c10_198, %c2_199] : memref<1x24x24xf32, #tpu.memory_space<vmem>>, vector<1x5x20xf32>
    %230 = vector.shape_cast %229 : vector<1x5x20xf32> to vector<5x20xf32>
    %c0_200 = arith.constant 0 : index
    %c10_201 = arith.constant 10 : index
    %c3_202 = arith.constant 3 : index
    %231 = vector.load %arg1[%c0_200, %c10_201, %c3_202] : memref<1x24x24xf32, #tpu.memory_space<vmem>>, vector<1x5x20xf32>
    %232 = vector.shape_cast %231 : vector<1x5x20xf32> to vector<5x20xf32>
    %c0_203 = arith.constant 0 : index
    %c10_204 = arith.constant 10 : index
    %c4_205 = arith.constant 4 : index
    %233 = vector.load %arg1[%c0_203, %c10_204, %c4_205] : memref<1x24x24xf32, #tpu.memory_space<vmem>>, vector<1x5x20xf32>
    %234 = vector.shape_cast %233 : vector<1x5x20xf32> to vector<5x20xf32>
    %235 = tpu.concatenate %226, %228, %230, %232, %234 in 0 : vector<5x20xf32>, vector<5x20xf32>, vector<5x20xf32>, vector<5x20xf32>, vector<5x20xf32> -> vector<25x20xf32>
    %236 = arith.truncf %235 : vector<25x20xf32> to vector<25x20xbf16>
    %cst_206 = arith.constant dense<0.000000e+00> : vector<16x20xf32>
    %237 = tpu.matmul %38, %236, %cst_206 {dimension_numbers = #tpu.dot_dimension_numbers<[1], [0], [0], [1], [0, 0, 1, 1], [], []>} : vector<16x25xbf16>, vector<25x20xbf16>, vector<16x20xf32> -> vector<16x20xf32>
    %c0_207 = arith.constant 0 : index
    %c11 = arith.constant 11 : index
    %c0_208 = arith.constant 0 : index
    %238 = vector.load %arg1[%c0_207, %c11, %c0_208] : memref<1x24x24xf32, #tpu.memory_space<vmem>>, vector<1x5x20xf32>
    %239 = vector.shape_cast %238 : vector<1x5x20xf32> to vector<5x20xf32>
    %c0_209 = arith.constant 0 : index
    %c11_210 = arith.constant 11 : index
    %c1_211 = arith.constant 1 : index
    %240 = vector.load %arg1[%c0_209, %c11_210, %c1_211] : memref<1x24x24xf32, #tpu.memory_space<vmem>>, vector<1x5x20xf32>
    %241 = vector.shape_cast %240 : vector<1x5x20xf32> to vector<5x20xf32>
    %c0_212 = arith.constant 0 : index
    %c11_213 = arith.constant 11 : index
    %c2_214 = arith.constant 2 : index
    %242 = vector.load %arg1[%c0_212, %c11_213, %c2_214] : memref<1x24x24xf32, #tpu.memory_space<vmem>>, vector<1x5x20xf32>
    %243 = vector.shape_cast %242 : vector<1x5x20xf32> to vector<5x20xf32>
    %c0_215 = arith.constant 0 : index
    %c11_216 = arith.constant 11 : index
    %c3_217 = arith.constant 3 : index
    %244 = vector.load %arg1[%c0_215, %c11_216, %c3_217] : memref<1x24x24xf32, #tpu.memory_space<vmem>>, vector<1x5x20xf32>
    %245 = vector.shape_cast %244 : vector<1x5x20xf32> to vector<5x20xf32>
    %c0_218 = arith.constant 0 : index
    %c11_219 = arith.constant 11 : index
    %c4_220 = arith.constant 4 : index
    %246 = vector.load %arg1[%c0_218, %c11_219, %c4_220] : memref<1x24x24xf32, #tpu.memory_space<vmem>>, vector<1x5x20xf32>
    %247 = vector.shape_cast %246 : vector<1x5x20xf32> to vector<5x20xf32>
    %248 = tpu.concatenate %239, %241, %243, %245, %247 in 0 : vector<5x20xf32>, vector<5x20xf32>, vector<5x20xf32>, vector<5x20xf32>, vector<5x20xf32> -> vector<25x20xf32>
    %249 = arith.truncf %248 : vector<25x20xf32> to vector<25x20xbf16>
    %cst_221 = arith.constant dense<0.000000e+00> : vector<16x20xf32>
    %250 = tpu.matmul %38, %249, %cst_221 {dimension_numbers = #tpu.dot_dimension_numbers<[1], [0], [0], [1], [0, 0, 1, 1], [], []>} : vector<16x25xbf16>, vector<25x20xbf16>, vector<16x20xf32> -> vector<16x20xf32>
    %251 = arith.maximumf %237, %250 : vector<16x20xf32>
    %cst_222 = arith.constant dense<0.000000e+00> : vector<16x10xf32>
    %252 = tpu.matmul %251, %8, %cst_222 {dimension_numbers = #tpu.dot_dimension_numbers<[1], [0], [0], [1], [0, 0, 1, 1], [], []>} : vector<16x20xf32>, vector<20x10xf32>, vector<16x10xf32> -> vector<16x10xf32>
    %cst_223 = arith.constant dense<0.000000e+00> : vector<16x10xf32>
    %253 = tpu.matmul %251, %17, %cst_223 {dimension_numbers = #tpu.dot_dimension_numbers<[1], [0], [0], [1], [0, 0, 1, 1], [], []>} : vector<16x20xf32>, vector<20x10xf32>, vector<16x10xf32> -> vector<16x10xf32>
    %254 = arith.maximumf %252, %253 : vector<16x10xf32>
    %255 = vector.broadcast %39 : vector<16x1xf32> to vector<16x10xf32>
    %256 = arith.addf %254, %255 : vector<16x10xf32>
    %cst_224 = arith.constant 0.000000e+00 : f32
    %257 = vector.broadcast %cst_224 : f32 to vector<16x10xf32>
    %258 = arith.maximumf %256, %257 : vector<16x10xf32>
    %c6_225 = arith.constant 6 : index
    %c0_226 = arith.constant 0 : index
    %c1_227 = arith.constant 1 : index
    %259 = vector.load %arg8[%c6_225, %c0_226, %c1_227] : memref<12x16x12xf32, #tpu.memory_space<vmem>>, vector<1x16x10xf32>
    %260 = vector.shape_cast %259 : vector<1x16x10xf32> to vector<16x10xf32>
    %261 = vector.shape_cast %258 : vector<16x10xf32> to vector<1x16x10xf32>
    tpu.vector_store %arg8[%c6_225, %c0_226, %c1_227], %261 {strides = array<i32>} : memref<12x16x12xf32, #tpu.memory_space<vmem>>, vector<1x16x10xf32>,
    %c0_228 = arith.constant 0 : index
    %c12 = arith.constant 12 : index
    %c0_229 = arith.constant 0 : index
    %262 = vector.load %arg1[%c0_228, %c12, %c0_229] : memref<1x24x24xf32, #tpu.memory_space<vmem>>, vector<1x5x20xf32>
    %263 = vector.shape_cast %262 : vector<1x5x20xf32> to vector<5x20xf32>
    %c0_230 = arith.constant 0 : index
    %c12_231 = arith.constant 12 : index
    %c1_232 = arith.constant 1 : index
    %264 = vector.load %arg1[%c0_230, %c12_231, %c1_232] : memref<1x24x24xf32, #tpu.memory_space<vmem>>, vector<1x5x20xf32>
    %265 = vector.shape_cast %264 : vector<1x5x20xf32> to vector<5x20xf32>
    %c0_233 = arith.constant 0 : index
    %c12_234 = arith.constant 12 : index
    %c2_235 = arith.constant 2 : index
    %266 = vector.load %arg1[%c0_233, %c12_234, %c2_235] : memref<1x24x24xf32, #tpu.memory_space<vmem>>, vector<1x5x20xf32>
    %267 = vector.shape_cast %266 : vector<1x5x20xf32> to vector<5x20xf32>
    %c0_236 = arith.constant 0 : index
    %c12_237 = arith.constant 12 : index
    %c3_238 = arith.constant 3 : index
    %268 = vector.load %arg1[%c0_236, %c12_237, %c3_238] : memref<1x24x24xf32, #tpu.memory_space<vmem>>, vector<1x5x20xf32>
    %269 = vector.shape_cast %268 : vector<1x5x20xf32> to vector<5x20xf32>
    %c0_239 = arith.constant 0 : index
    %c12_240 = arith.constant 12 : index
    %c4_241 = arith.constant 4 : index
    %270 = vector.load %arg1[%c0_239, %c12_240, %c4_241] : memref<1x24x24xf32, #tpu.memory_space<vmem>>, vector<1x5x20xf32>
    %271 = vector.shape_cast %270 : vector<1x5x20xf32> to vector<5x20xf32>
    %272 = tpu.concatenate %263, %265, %267, %269, %271 in 0 : vector<5x20xf32>, vector<5x20xf32>, vector<5x20xf32>, vector<5x20xf32>, vector<5x20xf32> -> vector<25x20xf32>
    %273 = arith.truncf %272 : vector<25x20xf32> to vector<25x20xbf16>
    %cst_242 = arith.constant dense<0.000000e+00> : vector<16x20xf32>
    %274 = tpu.matmul %38, %273, %cst_242 {dimension_numbers = #tpu.dot_dimension_numbers<[1], [0], [0], [1], [0, 0, 1, 1], [], []>} : vector<16x25xbf16>, vector<25x20xbf16>, vector<16x20xf32> -> vector<16x20xf32>
    %c0_243 = arith.constant 0 : index
    %c13 = arith.constant 13 : index
    %c0_244 = arith.constant 0 : index
    %275 = vector.load %arg1[%c0_243, %c13, %c0_244] : memref<1x24x24xf32, #tpu.memory_space<vmem>>, vector<1x5x20xf32>
    %276 = vector.shape_cast %275 : vector<1x5x20xf32> to vector<5x20xf32>
    %c0_245 = arith.constant 0 : index
    %c13_246 = arith.constant 13 : index
    %c1_247 = arith.constant 1 : index
    %277 = vector.load %arg1[%c0_245, %c13_246, %c1_247] : memref<1x24x24xf32, #tpu.memory_space<vmem>>, vector<1x5x20xf32>
    %278 = vector.shape_cast %277 : vector<1x5x20xf32> to vector<5x20xf32>
    %c0_248 = arith.constant 0 : index
    %c13_249 = arith.constant 13 : index
    %c2_250 = arith.constant 2 : index
    %279 = vector.load %arg1[%c0_248, %c13_249, %c2_250] : memref<1x24x24xf32, #tpu.memory_space<vmem>>, vector<1x5x20xf32>
    %280 = vector.shape_cast %279 : vector<1x5x20xf32> to vector<5x20xf32>
    %c0_251 = arith.constant 0 : index
    %c13_252 = arith.constant 13 : index
    %c3_253 = arith.constant 3 : index
    %281 = vector.load %arg1[%c0_251, %c13_252, %c3_253] : memref<1x24x24xf32, #tpu.memory_space<vmem>>, vector<1x5x20xf32>
    %282 = vector.shape_cast %281 : vector<1x5x20xf32> to vector<5x20xf32>
    %c0_254 = arith.constant 0 : index
    %c13_255 = arith.constant 13 : index
    %c4_256 = arith.constant 4 : index
    %283 = vector.load %arg1[%c0_254, %c13_255, %c4_256] : memref<1x24x24xf32, #tpu.memory_space<vmem>>, vector<1x5x20xf32>
    %284 = vector.shape_cast %283 : vector<1x5x20xf32> to vector<5x20xf32>
    %285 = tpu.concatenate %276, %278, %280, %282, %284 in 0 : vector<5x20xf32>, vector<5x20xf32>, vector<5x20xf32>, vector<5x20xf32>, vector<5x20xf32> -> vector<25x20xf32>
    %286 = arith.truncf %285 : vector<25x20xf32> to vector<25x20xbf16>
    %cst_257 = arith.constant dense<0.000000e+00> : vector<16x20xf32>
    %287 = tpu.matmul %38, %286, %cst_257 {dimension_numbers = #tpu.dot_dimension_numbers<[1], [0], [0], [1], [0, 0, 1, 1], [], []>} : vector<16x25xbf16>, vector<25x20xbf16>, vector<16x20xf32> -> vector<16x20xf32>
    %288 = arith.maximumf %274, %287 : vector<16x20xf32>
    %cst_258 = arith.constant dense<0.000000e+00> : vector<16x10xf32>
    %289 = tpu.matmul %288, %8, %cst_258 {dimension_numbers = #tpu.dot_dimension_numbers<[1], [0], [0], [1], [0, 0, 1, 1], [], []>} : vector<16x20xf32>, vector<20x10xf32>, vector<16x10xf32> -> vector<16x10xf32>
    %cst_259 = arith.constant dense<0.000000e+00> : vector<16x10xf32>
    %290 = tpu.matmul %288, %17, %cst_259 {dimension_numbers = #tpu.dot_dimension_numbers<[1], [0], [0], [1], [0, 0, 1, 1], [], []>} : vector<16x20xf32>, vector<20x10xf32>, vector<16x10xf32> -> vector<16x10xf32>
    %291 = arith.maximumf %289, %290 : vector<16x10xf32>
    %292 = vector.broadcast %39 : vector<16x1xf32> to vector<16x10xf32>
    %293 = arith.addf %291, %292 : vector<16x10xf32>
    %cst_260 = arith.constant 0.000000e+00 : f32
    %294 = vector.broadcast %cst_260 : f32 to vector<16x10xf32>
    %295 = arith.maximumf %293, %294 : vector<16x10xf32>
    %c7_261 = arith.constant 7 : index
    %c0_262 = arith.constant 0 : index
    %c1_263 = arith.constant 1 : index
    %296 = vector.load %arg8[%c7_261, %c0_262, %c1_263] : memref<12x16x12xf32, #tpu.memory_space<vmem>>, vector<1x16x10xf32>
    %297 = vector.shape_cast %296 : vector<1x16x10xf32> to vector<16x10xf32>
    %298 = vector.shape_cast %295 : vector<16x10xf32> to vector<1x16x10xf32>
    tpu.vector_store %arg8[%c7_261, %c0_262, %c1_263], %298 {strides = array<i32>} : memref<12x16x12xf32, #tpu.memory_space<vmem>>, vector<1x16x10xf32>,
    %c0_264 = arith.constant 0 : index
    %c14 = arith.constant 14 : index
    %c0_265 = arith.constant 0 : index
    %299 = vector.load %arg1[%c0_264, %c14, %c0_265] : memref<1x24x24xf32, #tpu.memory_space<vmem>>, vector<1x5x20xf32>
    %300 = vector.shape_cast %299 : vector<1x5x20xf32> to vector<5x20xf32>
    %c0_266 = arith.constant 0 : index
    %c14_267 = arith.constant 14 : index
    %c1_268 = arith.constant 1 : index
    %301 = vector.load %arg1[%c0_266, %c14_267, %c1_268] : memref<1x24x24xf32, #tpu.memory_space<vmem>>, vector<1x5x20xf32>
    %302 = vector.shape_cast %301 : vector<1x5x20xf32> to vector<5x20xf32>
    %c0_269 = arith.constant 0 : index
    %c14_270 = arith.constant 14 : index
    %c2_271 = arith.constant 2 : index
    %303 = vector.load %arg1[%c0_269, %c14_270, %c2_271] : memref<1x24x24xf32, #tpu.memory_space<vmem>>, vector<1x5x20xf32>
    %304 = vector.shape_cast %303 : vector<1x5x20xf32> to vector<5x20xf32>
    %c0_272 = arith.constant 0 : index
    %c14_273 = arith.constant 14 : index
    %c3_274 = arith.constant 3 : index
    %305 = vector.load %arg1[%c0_272, %c14_273, %c3_274] : memref<1x24x24xf32, #tpu.memory_space<vmem>>, vector<1x5x20xf32>
    %306 = vector.shape_cast %305 : vector<1x5x20xf32> to vector<5x20xf32>
    %c0_275 = arith.constant 0 : index
    %c14_276 = arith.constant 14 : index
    %c4_277 = arith.constant 4 : index
    %307 = vector.load %arg1[%c0_275, %c14_276, %c4_277] : memref<1x24x24xf32, #tpu.memory_space<vmem>>, vector<1x5x20xf32>
    %308 = vector.shape_cast %307 : vector<1x5x20xf32> to vector<5x20xf32>
    %309 = tpu.concatenate %300, %302, %304, %306, %308 in 0 : vector<5x20xf32>, vector<5x20xf32>, vector<5x20xf32>, vector<5x20xf32>, vector<5x20xf32> -> vector<25x20xf32>
    %310 = arith.truncf %309 : vector<25x20xf32> to vector<25x20xbf16>
    %cst_278 = arith.constant dense<0.000000e+00> : vector<16x20xf32>
    %311 = tpu.matmul %38, %310, %cst_278 {dimension_numbers = #tpu.dot_dimension_numbers<[1], [0], [0], [1], [0, 0, 1, 1], [], []>} : vector<16x25xbf16>, vector<25x20xbf16>, vector<16x20xf32> -> vector<16x20xf32>
    %c0_279 = arith.constant 0 : index
    %c15 = arith.constant 15 : index
    %c0_280 = arith.constant 0 : index
    %312 = vector.load %arg1[%c0_279, %c15, %c0_280] : memref<1x24x24xf32, #tpu.memory_space<vmem>>, vector<1x5x20xf32>
    %313 = vector.shape_cast %312 : vector<1x5x20xf32> to vector<5x20xf32>
    %c0_281 = arith.constant 0 : index
    %c15_282 = arith.constant 15 : index
    %c1_283 = arith.constant 1 : index
    %314 = vector.load %arg1[%c0_281, %c15_282, %c1_283] : memref<1x24x24xf32, #tpu.memory_space<vmem>>, vector<1x5x20xf32>
    %315 = vector.shape_cast %314 : vector<1x5x20xf32> to vector<5x20xf32>
    %c0_284 = arith.constant 0 : index
    %c15_285 = arith.constant 15 : index
    %c2_286 = arith.constant 2 : index
    %316 = vector.load %arg1[%c0_284, %c15_285, %c2_286] : memref<1x24x24xf32, #tpu.memory_space<vmem>>, vector<1x5x20xf32>
    %317 = vector.shape_cast %316 : vector<1x5x20xf32> to vector<5x20xf32>
    %c0_287 = arith.constant 0 : index
    %c15_288 = arith.constant 15 : index
    %c3_289 = arith.constant 3 : index
    %318 = vector.load %arg1[%c0_287, %c15_288, %c3_289] : memref<1x24x24xf32, #tpu.memory_space<vmem>>, vector<1x5x20xf32>
    %319 = vector.shape_cast %318 : vector<1x5x20xf32> to vector<5x20xf32>
    %c0_290 = arith.constant 0 : index
    %c15_291 = arith.constant 15 : index
    %c4_292 = arith.constant 4 : index
    %320 = vector.load %arg1[%c0_290, %c15_291, %c4_292] : memref<1x24x24xf32, #tpu.memory_space<vmem>>, vector<1x5x20xf32>
    %321 = vector.shape_cast %320 : vector<1x5x20xf32> to vector<5x20xf32>
    %322 = tpu.concatenate %313, %315, %317, %319, %321 in 0 : vector<5x20xf32>, vector<5x20xf32>, vector<5x20xf32>, vector<5x20xf32>, vector<5x20xf32> -> vector<25x20xf32>
    %323 = arith.truncf %322 : vector<25x20xf32> to vector<25x20xbf16>
    %cst_293 = arith.constant dense<0.000000e+00> : vector<16x20xf32>
    %324 = tpu.matmul %38, %323, %cst_293 {dimension_numbers = #tpu.dot_dimension_numbers<[1], [0], [0], [1], [0, 0, 1, 1], [], []>} : vector<16x25xbf16>, vector<25x20xbf16>, vector<16x20xf32> -> vector<16x20xf32>
    %325 = arith.maximumf %311, %324 : vector<16x20xf32>
    %cst_294 = arith.constant dense<0.000000e+00> : vector<16x10xf32>
    %326 = tpu.matmul %325, %8, %cst_294 {dimension_numbers = #tpu.dot_dimension_numbers<[1], [0], [0], [1], [0, 0, 1, 1], [], []>} : vector<16x20xf32>, vector<20x10xf32>, vector<16x10xf32> -> vector<16x10xf32>
    %cst_295 = arith.constant dense<0.000000e+00> : vector<16x10xf32>
    %327 = tpu.matmul %325, %17, %cst_295 {dimension_numbers = #tpu.dot_dimension_numbers<[1], [0], [0], [1], [0, 0, 1, 1], [], []>} : vector<16x20xf32>, vector<20x10xf32>, vector<16x10xf32> -> vector<16x10xf32>
    %328 = arith.maximumf %326, %327 : vector<16x10xf32>
    %329 = vector.broadcast %39 : vector<16x1xf32> to vector<16x10xf32>
    %330 = arith.addf %328, %329 : vector<16x10xf32>
    %cst_296 = arith.constant 0.000000e+00 : f32
    %331 = vector.broadcast %cst_296 : f32 to vector<16x10xf32>
    %332 = arith.maximumf %330, %331 : vector<16x10xf32>
    %c8_297 = arith.constant 8 : index
    %c0_298 = arith.constant 0 : index
    %c1_299 = arith.constant 1 : index
    %333 = vector.load %arg8[%c8_297, %c0_298, %c1_299] : memref<12x16x12xf32, #tpu.memory_space<vmem>>, vector<1x16x10xf32>
    %334 = vector.shape_cast %333 : vector<1x16x10xf32> to vector<16x10xf32>
    %335 = vector.shape_cast %332 : vector<16x10xf32> to vector<1x16x10xf32>
    tpu.vector_store %arg8[%c8_297, %c0_298, %c1_299], %335 {strides = array<i32>} : memref<12x16x12xf32, #tpu.memory_space<vmem>>, vector<1x16x10xf32>,
    %c0_300 = arith.constant 0 : index
    %c16 = arith.constant 16 : index
    %c0_301 = arith.constant 0 : index
    %336 = vector.load %arg1[%c0_300, %c16, %c0_301] : memref<1x24x24xf32, #tpu.memory_space<vmem>>, vector<1x5x20xf32>
    %337 = vector.shape_cast %336 : vector<1x5x20xf32> to vector<5x20xf32>
    %c0_302 = arith.constant 0 : index
    %c16_303 = arith.constant 16 : index
    %c1_304 = arith.constant 1 : index
    %338 = vector.load %arg1[%c0_302, %c16_303, %c1_304] : memref<1x24x24xf32, #tpu.memory_space<vmem>>, vector<1x5x20xf32>
    %339 = vector.shape_cast %338 : vector<1x5x20xf32> to vector<5x20xf32>
    %c0_305 = arith.constant 0 : index
    %c16_306 = arith.constant 16 : index
    %c2_307 = arith.constant 2 : index
    %340 = vector.load %arg1[%c0_305, %c16_306, %c2_307] : memref<1x24x24xf32, #tpu.memory_space<vmem>>, vector<1x5x20xf32>
    %341 = vector.shape_cast %340 : vector<1x5x20xf32> to vector<5x20xf32>
    %c0_308 = arith.constant 0 : index
    %c16_309 = arith.constant 16 : index
    %c3_310 = arith.constant 3 : index
    %342 = vector.load %arg1[%c0_308, %c16_309, %c3_310] : memref<1x24x24xf32, #tpu.memory_space<vmem>>, vector<1x5x20xf32>
    %343 = vector.shape_cast %342 : vector<1x5x20xf32> to vector<5x20xf32>
    %c0_311 = arith.constant 0 : index
    %c16_312 = arith.constant 16 : index
    %c4_313 = arith.constant 4 : index
    %344 = vector.load %arg1[%c0_311, %c16_312, %c4_313] : memref<1x24x24xf32, #tpu.memory_space<vmem>>, vector<1x5x20xf32>
    %345 = vector.shape_cast %344 : vector<1x5x20xf32> to vector<5x20xf32>
    %346 = tpu.concatenate %337, %339, %341, %343, %345 in 0 : vector<5x20xf32>, vector<5x20xf32>, vector<5x20xf32>, vector<5x20xf32>, vector<5x20xf32> -> vector<25x20xf32>
    %347 = arith.truncf %346 : vector<25x20xf32> to vector<25x20xbf16>
    %cst_314 = arith.constant dense<0.000000e+00> : vector<16x20xf32>
    %348 = tpu.matmul %38, %347, %cst_314 {dimension_numbers = #tpu.dot_dimension_numbers<[1], [0], [0], [1], [0, 0, 1, 1], [], []>} : vector<16x25xbf16>, vector<25x20xbf16>, vector<16x20xf32> -> vector<16x20xf32>
    %c0_315 = arith.constant 0 : index
    %c17 = arith.constant 17 : index
    %c0_316 = arith.constant 0 : index
    %349 = vector.load %arg1[%c0_315, %c17, %c0_316] : memref<1x24x24xf32, #tpu.memory_space<vmem>>, vector<1x5x20xf32>
    %350 = vector.shape_cast %349 : vector<1x5x20xf32> to vector<5x20xf32>
    %c0_317 = arith.constant 0 : index
    %c17_318 = arith.constant 17 : index
    %c1_319 = arith.constant 1 : index
    %351 = vector.load %arg1[%c0_317, %c17_318, %c1_319] : memref<1x24x24xf32, #tpu.memory_space<vmem>>, vector<1x5x20xf32>
    %352 = vector.shape_cast %351 : vector<1x5x20xf32> to vector<5x20xf32>
    %c0_320 = arith.constant 0 : index
    %c17_321 = arith.constant 17 : index
    %c2_322 = arith.constant 2 : index
    %353 = vector.load %arg1[%c0_320, %c17_321, %c2_322] : memref<1x24x24xf32, #tpu.memory_space<vmem>>, vector<1x5x20xf32>
    %354 = vector.shape_cast %353 : vector<1x5x20xf32> to vector<5x20xf32>
    %c0_323 = arith.constant 0 : index
    %c17_324 = arith.constant 17 : index
    %c3_325 = arith.constant 3 : index
    %355 = vector.load %arg1[%c0_323, %c17_324, %c3_325] : memref<1x24x24xf32, #tpu.memory_space<vmem>>, vector<1x5x20xf32>
    %356 = vector.shape_cast %355 : vector<1x5x20xf32> to vector<5x20xf32>
    %c0_326 = arith.constant 0 : index
    %c17_327 = arith.constant 17 : index
    %c4_328 = arith.constant 4 : index
    %357 = vector.load %arg1[%c0_326, %c17_327, %c4_328] : memref<1x24x24xf32, #tpu.memory_space<vmem>>, vector<1x5x20xf32>
    %358 = vector.shape_cast %357 : vector<1x5x20xf32> to vector<5x20xf32>
    %359 = tpu.concatenate %350, %352, %354, %356, %358 in 0 : vector<5x20xf32>, vector<5x20xf32>, vector<5x20xf32>, vector<5x20xf32>, vector<5x20xf32> -> vector<25x20xf32>
    %360 = arith.truncf %359 : vector<25x20xf32> to vector<25x20xbf16>
    %cst_329 = arith.constant dense<0.000000e+00> : vector<16x20xf32>
    %361 = tpu.matmul %38, %360, %cst_329 {dimension_numbers = #tpu.dot_dimension_numbers<[1], [0], [0], [1], [0, 0, 1, 1], [], []>} : vector<16x25xbf16>, vector<25x20xbf16>, vector<16x20xf32> -> vector<16x20xf32>
    %362 = arith.maximumf %348, %361 : vector<16x20xf32>
    %cst_330 = arith.constant dense<0.000000e+00> : vector<16x10xf32>
    %363 = tpu.matmul %362, %8, %cst_330 {dimension_numbers = #tpu.dot_dimension_numbers<[1], [0], [0], [1], [0, 0, 1, 1], [], []>} : vector<16x20xf32>, vector<20x10xf32>, vector<16x10xf32> -> vector<16x10xf32>
    %cst_331 = arith.constant dense<0.000000e+00> : vector<16x10xf32>
    %364 = tpu.matmul %362, %17, %cst_331 {dimension_numbers = #tpu.dot_dimension_numbers<[1], [0], [0], [1], [0, 0, 1, 1], [], []>} : vector<16x20xf32>, vector<20x10xf32>, vector<16x10xf32> -> vector<16x10xf32>
    %365 = arith.maximumf %363, %364 : vector<16x10xf32>
    %366 = vector.broadcast %39 : vector<16x1xf32> to vector<16x10xf32>
    %367 = arith.addf %365, %366 : vector<16x10xf32>
    %cst_332 = arith.constant 0.000000e+00 : f32
    %368 = vector.broadcast %cst_332 : f32 to vector<16x10xf32>
    %369 = arith.maximumf %367, %368 : vector<16x10xf32>
    %c9_333 = arith.constant 9 : index
    %c0_334 = arith.constant 0 : index
    %c1_335 = arith.constant 1 : index
    %370 = vector.load %arg8[%c9_333, %c0_334, %c1_335] : memref<12x16x12xf32, #tpu.memory_space<vmem>>, vector<1x16x10xf32>
    %371 = vector.shape_cast %370 : vector<1x16x10xf32> to vector<16x10xf32>
    %372 = vector.shape_cast %369 : vector<16x10xf32> to vector<1x16x10xf32>
    tpu.vector_store %arg8[%c9_333, %c0_334, %c1_335], %372 {strides = array<i32>} : memref<12x16x12xf32, #tpu.memory_space<vmem>>, vector<1x16x10xf32>,
    %c0_336 = arith.constant 0 : index
    %c18 = arith.constant 18 : index
    %c0_337 = arith.constant 0 : index
    %373 = vector.load %arg1[%c0_336, %c18, %c0_337] : memref<1x24x24xf32, #tpu.memory_space<vmem>>, vector<1x5x20xf32>
    %374 = vector.shape_cast %373 : vector<1x5x20xf32> to vector<5x20xf32>
    %c0_338 = arith.constant 0 : index
    %c18_339 = arith.constant 18 : index
    %c1_340 = arith.constant 1 : index
    %375 = vector.load %arg1[%c0_338, %c18_339, %c1_340] : memref<1x24x24xf32, #tpu.memory_space<vmem>>, vector<1x5x20xf32>
    %376 = vector.shape_cast %375 : vector<1x5x20xf32> to vector<5x20xf32>
    %c0_341 = arith.constant 0 : index
    %c18_342 = arith.constant 18 : index
    %c2_343 = arith.constant 2 : index
    %377 = vector.load %arg1[%c0_341, %c18_342, %c2_343] : memref<1x24x24xf32, #tpu.memory_space<vmem>>, vector<1x5x20xf32>
    %378 = vector.shape_cast %377 : vector<1x5x20xf32> to vector<5x20xf32>
    %c0_344 = arith.constant 0 : index
    %c18_345 = arith.constant 18 : index
    %c3_346 = arith.constant 3 : index
    %379 = vector.load %arg1[%c0_344, %c18_345, %c3_346] : memref<1x24x24xf32, #tpu.memory_space<vmem>>, vector<1x5x20xf32>
    %380 = vector.shape_cast %379 : vector<1x5x20xf32> to vector<5x20xf32>
    %c0_347 = arith.constant 0 : index
    %c18_348 = arith.constant 18 : index
    %c4_349 = arith.constant 4 : index
    %381 = vector.load %arg1[%c0_347, %c18_348, %c4_349] : memref<1x24x24xf32, #tpu.memory_space<vmem>>, vector<1x5x20xf32>
    %382 = vector.shape_cast %381 : vector<1x5x20xf32> to vector<5x20xf32>
    %383 = tpu.concatenate %374, %376, %378, %380, %382 in 0 : vector<5x20xf32>, vector<5x20xf32>, vector<5x20xf32>, vector<5x20xf32>, vector<5x20xf32> -> vector<25x20xf32>
    %384 = arith.truncf %383 : vector<25x20xf32> to vector<25x20xbf16>
    %cst_350 = arith.constant dense<0.000000e+00> : vector<16x20xf32>
    %385 = tpu.matmul %38, %384, %cst_350 {dimension_numbers = #tpu.dot_dimension_numbers<[1], [0], [0], [1], [0, 0, 1, 1], [], []>} : vector<16x25xbf16>, vector<25x20xbf16>, vector<16x20xf32> -> vector<16x20xf32>
    %c0_351 = arith.constant 0 : index
    %c19 = arith.constant 19 : index
    %c0_352 = arith.constant 0 : index
    %386 = vector.load %arg1[%c0_351, %c19, %c0_352] : memref<1x24x24xf32, #tpu.memory_space<vmem>>, vector<1x5x20xf32>
    %387 = vector.shape_cast %386 : vector<1x5x20xf32> to vector<5x20xf32>
    %c0_353 = arith.constant 0 : index
    %c19_354 = arith.constant 19 : index
    %c1_355 = arith.constant 1 : index
    %388 = vector.load %arg1[%c0_353, %c19_354, %c1_355] : memref<1x24x24xf32, #tpu.memory_space<vmem>>, vector<1x5x20xf32>
    %389 = vector.shape_cast %388 : vector<1x5x20xf32> to vector<5x20xf32>
    %c0_356 = arith.constant 0 : index
    %c19_357 = arith.constant 19 : index
    %c2_358 = arith.constant 2 : index
    %390 = vector.load %arg1[%c0_356, %c19_357, %c2_358] : memref<1x24x24xf32, #tpu.memory_space<vmem>>, vector<1x5x20xf32>
    %391 = vector.shape_cast %390 : vector<1x5x20xf32> to vector<5x20xf32>
    %c0_359 = arith.constant 0 : index
    %c19_360 = arith.constant 19 : index
    %c3_361 = arith.constant 3 : index
    %392 = vector.load %arg1[%c0_359, %c19_360, %c3_361] : memref<1x24x24xf32, #tpu.memory_space<vmem>>, vector<1x5x20xf32>
    %393 = vector.shape_cast %392 : vector<1x5x20xf32> to vector<5x20xf32>
    %c0_362 = arith.constant 0 : index
    %c19_363 = arith.constant 19 : index
    %c4_364 = arith.constant 4 : index
    %394 = vector.load %arg1[%c0_362, %c19_363, %c4_364] : memref<1x24x24xf32, #tpu.memory_space<vmem>>, vector<1x5x20xf32>
    %395 = vector.shape_cast %394 : vector<1x5x20xf32> to vector<5x20xf32>
    %396 = tpu.concatenate %387, %389, %391, %393, %395 in 0 : vector<5x20xf32>, vector<5x20xf32>, vector<5x20xf32>, vector<5x20xf32>, vector<5x20xf32> -> vector<25x20xf32>
    %397 = arith.truncf %396 : vector<25x20xf32> to vector<25x20xbf16>
    %cst_365 = arith.constant dense<0.000000e+00> : vector<16x20xf32>
    %398 = tpu.matmul %38, %397, %cst_365 {dimension_numbers = #tpu.dot_dimension_numbers<[1], [0], [0], [1], [0, 0, 1, 1], [], []>} : vector<16x25xbf16>, vector<25x20xbf16>, vector<16x20xf32> -> vector<16x20xf32>
    %399 = arith.maximumf %385, %398 : vector<16x20xf32>
    %cst_366 = arith.constant dense<0.000000e+00> : vector<16x10xf32>
    %400 = tpu.matmul %399, %8, %cst_366 {dimension_numbers = #tpu.dot_dimension_numbers<[1], [0], [0], [1], [0, 0, 1, 1], [], []>} : vector<16x20xf32>, vector<20x10xf32>, vector<16x10xf32> -> vector<16x10xf32>
    %cst_367 = arith.constant dense<0.000000e+00> : vector<16x10xf32>
    %401 = tpu.matmul %399, %17, %cst_367 {dimension_numbers = #tpu.dot_dimension_numbers<[1], [0], [0], [1], [0, 0, 1, 1], [], []>} : vector<16x20xf32>, vector<20x10xf32>, vector<16x10xf32> -> vector<16x10xf32>
    %402 = arith.maximumf %400, %401 : vector<16x10xf32>
    %403 = vector.broadcast %39 : vector<16x1xf32> to vector<16x10xf32>
    %404 = arith.addf %402, %403 : vector<16x10xf32>
    %cst_368 = arith.constant 0.000000e+00 : f32
    %405 = vector.broadcast %cst_368 : f32 to vector<16x10xf32>
    %406 = arith.maximumf %404, %405 : vector<16x10xf32>
    %c10_369 = arith.constant 10 : index
    %c0_370 = arith.constant 0 : index
    %c1_371 = arith.constant 1 : index
    %407 = vector.load %arg8[%c10_369, %c0_370, %c1_371] : memref<12x16x12xf32, #tpu.memory_space<vmem>>, vector<1x16x10xf32>
    %408 = vector.shape_cast %407 : vector<1x16x10xf32> to vector<16x10xf32>
    %409 = vector.shape_cast %406 : vector<16x10xf32> to vector<1x16x10xf32>
    tpu.vector_store %arg8[%c10_369, %c0_370, %c1_371], %409 {strides = array<i32>} : memref<12x16x12xf32, #tpu.memory_space<vmem>>, vector<1x16x10xf32>,
    %c0_372 = arith.constant 0 : index
    %c0_373 = arith.constant 0 : index
    %410 = vector.load %arg5[%c0_372, %c0_373] : memref<32x400xbf16, #tpu.memory_space<vmem>>, vector<32x400xbf16>
    %c0_374 = arith.constant 0 : index
    %c0_375 = arith.constant 0 : index
    %411 = vector.load %arg6[%c0_374, %c0_375] : memref<32x1xf32, #tpu.memory_space<vmem>>, vector<32x1xf32>
    %c0_376 = arith.constant 0 : index
    %c0_377 = arith.constant 0 : index
    %c0_378 = arith.constant 0 : index
    %412 = vector.load %arg2[%c0_376, %c0_377, %c0_378] : memref<1x32x1xf32, #tpu.memory_space<vmem>>, vector<1x32x1xf32>
    %413 = vector.shape_cast %412 : vector<1x32x1xf32> to vector<32x1xf32>
    %c0_379 = arith.constant 0 : index
    %c0_380 = arith.constant 0 : index
    %c0_381 = arith.constant 0 : index
    %414 = vector.load %arg8[%c0_379, %c0_380, %c0_381] : memref<12x16x12xf32, #tpu.memory_space<vmem>>, vector<1x16x12xf32>
    %415 = vector.shape_cast %414 : vector<1x16x12xf32> to vector<16x12xf32>
    %c1_382 = arith.constant 1 : index
    %c0_383 = arith.constant 0 : index
    %c0_384 = arith.constant 0 : index
    %416 = vector.load %arg8[%c1_382, %c0_383, %c0_384] : memref<12x16x12xf32, #tpu.memory_space<vmem>>, vector<1x16x12xf32>
    %417 = vector.shape_cast %416 : vector<1x16x12xf32> to vector<16x12xf32>
    %c2_385 = arith.constant 2 : index
    %c0_386 = arith.constant 0 : index
    %c0_387 = arith.constant 0 : index
    %418 = vector.load %arg8[%c2_385, %c0_386, %c0_387] : memref<12x16x12xf32, #tpu.memory_space<vmem>>, vector<1x16x12xf32>
    %419 = vector.shape_cast %418 : vector<1x16x12xf32> to vector<16x12xf32>
    %c3_388 = arith.constant 3 : index
    %c0_389 = arith.constant 0 : index
    %c0_390 = arith.constant 0 : index
    %420 = vector.load %arg8[%c3_388, %c0_389, %c0_390] : memref<12x16x12xf32, #tpu.memory_space<vmem>>, vector<1x16x12xf32>
    %421 = vector.shape_cast %420 : vector<1x16x12xf32> to vector<16x12xf32>
    %c4_391 = arith.constant 4 : index
    %c0_392 = arith.constant 0 : index
    %c0_393 = arith.constant 0 : index
    %422 = vector.load %arg8[%c4_391, %c0_392, %c0_393] : memref<12x16x12xf32, #tpu.memory_space<vmem>>, vector<1x16x12xf32>
    %423 = vector.shape_cast %422 : vector<1x16x12xf32> to vector<16x12xf32>
    %424 = vector.extract_strided_slice %415 {offsets = [0, 0], sizes = [16, 8], strides = [1, 1]} : vector<16x12xf32> to vector<16x8xf32>
    %425 = vector.extract_strided_slice %415 {offsets = [0, 1], sizes = [16, 8], strides = [1, 1]} : vector<16x12xf32> to vector<16x8xf32>
    %426 = vector.extract_strided_slice %415 {offsets = [0, 2], sizes = [16, 8], strides = [1, 1]} : vector<16x12xf32> to vector<16x8xf32>
    %427 = vector.extract_strided_slice %415 {offsets = [0, 3], sizes = [16, 8], strides = [1, 1]} : vector<16x12xf32> to vector<16x8xf32>
    %428 = vector.extract_strided_slice %415 {offsets = [0, 4], sizes = [16, 8], strides = [1, 1]} : vector<16x12xf32> to vector<16x8xf32>
    %429 = vector.extract_strided_slice %417 {offsets = [0, 0], sizes = [16, 8], strides = [1, 1]} : vector<16x12xf32> to vector<16x8xf32>
    %430 = vector.extract_strided_slice %417 {offsets = [0, 1], sizes = [16, 8], strides = [1, 1]} : vector<16x12xf32> to vector<16x8xf32>
    %431 = vector.extract_strided_slice %417 {offsets = [0, 2], sizes = [16, 8], strides = [1, 1]} : vector<16x12xf32> to vector<16x8xf32>
    %432 = vector.extract_strided_slice %417 {offsets = [0, 3], sizes = [16, 8], strides = [1, 1]} : vector<16x12xf32> to vector<16x8xf32>
    %433 = vector.extract_strided_slice %417 {offsets = [0, 4], sizes = [16, 8], strides = [1, 1]} : vector<16x12xf32> to vector<16x8xf32>
    %434 = vector.extract_strided_slice %419 {offsets = [0, 0], sizes = [16, 8], strides = [1, 1]} : vector<16x12xf32> to vector<16x8xf32>
    %435 = vector.extract_strided_slice %419 {offsets = [0, 1], sizes = [16, 8], strides = [1, 1]} : vector<16x12xf32> to vector<16x8xf32>
    %436 = vector.extract_strided_slice %419 {offsets = [0, 2], sizes = [16, 8], strides = [1, 1]} : vector<16x12xf32> to vector<16x8xf32>
    %437 = vector.extract_strided_slice %419 {offsets = [0, 3], sizes = [16, 8], strides = [1, 1]} : vector<16x12xf32> to vector<16x8xf32>
    %438 = vector.extract_strided_slice %419 {offsets = [0, 4], sizes = [16, 8], strides = [1, 1]} : vector<16x12xf32> to vector<16x8xf32>
    %439 = vector.extract_strided_slice %421 {offsets = [0, 0], sizes = [16, 8], strides = [1, 1]} : vector<16x12xf32> to vector<16x8xf32>
    %440 = vector.extract_strided_slice %421 {offsets = [0, 1], sizes = [16, 8], strides = [1, 1]} : vector<16x12xf32> to vector<16x8xf32>
    %441 = vector.extract_strided_slice %421 {offsets = [0, 2], sizes = [16, 8], strides = [1, 1]} : vector<16x12xf32> to vector<16x8xf32>
    %442 = vector.extract_strided_slice %421 {offsets = [0, 3], sizes = [16, 8], strides = [1, 1]} : vector<16x12xf32> to vector<16x8xf32>
    %443 = vector.extract_strided_slice %421 {offsets = [0, 4], sizes = [16, 8], strides = [1, 1]} : vector<16x12xf32> to vector<16x8xf32>
    %444 = vector.extract_strided_slice %423 {offsets = [0, 0], sizes = [16, 8], strides = [1, 1]} : vector<16x12xf32> to vector<16x8xf32>
    %445 = vector.extract_strided_slice %423 {offsets = [0, 1], sizes = [16, 8], strides = [1, 1]} : vector<16x12xf32> to vector<16x8xf32>
    %446 = vector.extract_strided_slice %423 {offsets = [0, 2], sizes = [16, 8], strides = [1, 1]} : vector<16x12xf32> to vector<16x8xf32>
    %447 = vector.extract_strided_slice %423 {offsets = [0, 3], sizes = [16, 8], strides = [1, 1]} : vector<16x12xf32> to vector<16x8xf32>
    %448 = vector.extract_strided_slice %423 {offsets = [0, 4], sizes = [16, 8], strides = [1, 1]} : vector<16x12xf32> to vector<16x8xf32>
    %449 = tpu.concatenate %424, %425, %426, %427, %428, %429, %430, %431, %432, %433, %434, %435, %436, %437, %438, %439 in 0 : vector<16x8xf32>, vector<16x8xf32>, vector<16x8xf32>, vector<16x8xf32>, vector<16x8xf32>, vector<16x8xf32>, vector<16x8xf32>, vector<16x8xf32>, vector<16x8xf32>, vector<16x8xf32>, vector<16x8xf32>, vector<16x8xf32>, vector<16x8xf32>, vector<16x8xf32>, vector<16x8xf32>, vector<16x8xf32> -> vector<256x8xf32>
    %450 = tpu.concatenate %440, %441, %442, %443, %444, %445, %446, %447, %448 in 0 : vector<16x8xf32>, vector<16x8xf32>, vector<16x8xf32>, vector<16x8xf32>, vector<16x8xf32>, vector<16x8xf32>, vector<16x8xf32>, vector<16x8xf32>, vector<16x8xf32> -> vector<144x8xf32>
    %451 = tpu.concatenate %449, %450 in 0 : vector<256x8xf32>, vector<144x8xf32> -> vector<400x8xf32>
    %452 = arith.truncf %451 : vector<400x8xf32> to vector<400x8xbf16>
    %cst_394 = arith.constant dense<0.000000e+00> : vector<32x8xf32>
    %453 = tpu.matmul %410, %452, %cst_394 {dimension_numbers = #tpu.dot_dimension_numbers<[1], [0], [0], [1], [0, 0, 1, 1], [], []>} : vector<32x400xbf16>, vector<400x8xbf16>, vector<32x8xf32> -> vector<32x8xf32>
    %c1_395 = arith.constant 1 : index
    %c0_396 = arith.constant 0 : index
    %c0_397 = arith.constant 0 : index
    %454 = vector.load %arg8[%c1_395, %c0_396, %c0_397] : memref<12x16x12xf32, #tpu.memory_space<vmem>>, vector<1x16x12xf32>
    %455 = vector.shape_cast %454 : vector<1x16x12xf32> to vector<16x12xf32>
    %c2_398 = arith.constant 2 : index
    %c0_399 = arith.constant 0 : index
    %c0_400 = arith.constant 0 : index
    %456 = vector.load %arg8[%c2_398, %c0_399, %c0_400] : memref<12x16x12xf32, #tpu.memory_space<vmem>>, vector<1x16x12xf32>
    %457 = vector.shape_cast %456 : vector<1x16x12xf32> to vector<16x12xf32>
    %c3_401 = arith.constant 3 : index
    %c0_402 = arith.constant 0 : index
    %c0_403 = arith.constant 0 : index
    %458 = vector.load %arg8[%c3_401, %c0_402, %c0_403] : memref<12x16x12xf32, #tpu.memory_space<vmem>>, vector<1x16x12xf32>
    %459 = vector.shape_cast %458 : vector<1x16x12xf32> to vector<16x12xf32>
    %c4_404 = arith.constant 4 : index
    %c0_405 = arith.constant 0 : index
    %c0_406 = arith.constant 0 : index
    %460 = vector.load %arg8[%c4_404, %c0_405, %c0_406] : memref<12x16x12xf32, #tpu.memory_space<vmem>>, vector<1x16x12xf32>
    %461 = vector.shape_cast %460 : vector<1x16x12xf32> to vector<16x12xf32>
    %c5_407 = arith.constant 5 : index
    %c0_408 = arith.constant 0 : index
    %c0_409 = arith.constant 0 : index
    %462 = vector.load %arg8[%c5_407, %c0_408, %c0_409] : memref<12x16x12xf32, #tpu.memory_space<vmem>>, vector<1x16x12xf32>
    %463 = vector.shape_cast %462 : vector<1x16x12xf32> to vector<16x12xf32>
    %464 = vector.extract_strided_slice %455 {offsets = [0, 0], sizes = [16, 8], strides = [1, 1]} : vector<16x12xf32> to vector<16x8xf32>
    %465 = vector.extract_strided_slice %455 {offsets = [0, 1], sizes = [16, 8], strides = [1, 1]} : vector<16x12xf32> to vector<16x8xf32>
    %466 = vector.extract_strided_slice %455 {offsets = [0, 2], sizes = [16, 8], strides = [1, 1]} : vector<16x12xf32> to vector<16x8xf32>
    %467 = vector.extract_strided_slice %455 {offsets = [0, 3], sizes = [16, 8], strides = [1, 1]} : vector<16x12xf32> to vector<16x8xf32>
    %468 = vector.extract_strided_slice %455 {offsets = [0, 4], sizes = [16, 8], strides = [1, 1]} : vector<16x12xf32> to vector<16x8xf32>
    %469 = vector.extract_strided_slice %457 {offsets = [0, 0], sizes = [16, 8], strides = [1, 1]} : vector<16x12xf32> to vector<16x8xf32>
    %470 = vector.extract_strided_slice %457 {offsets = [0, 1], sizes = [16, 8], strides = [1, 1]} : vector<16x12xf32> to vector<16x8xf32>
    %471 = vector.extract_strided_slice %457 {offsets = [0, 2], sizes = [16, 8], strides = [1, 1]} : vector<16x12xf32> to vector<16x8xf32>
    %472 = vector.extract_strided_slice %457 {offsets = [0, 3], sizes = [16, 8], strides = [1, 1]} : vector<16x12xf32> to vector<16x8xf32>
    %473 = vector.extract_strided_slice %457 {offsets = [0, 4], sizes = [16, 8], strides = [1, 1]} : vector<16x12xf32> to vector<16x8xf32>
    %474 = vector.extract_strided_slice %459 {offsets = [0, 0], sizes = [16, 8], strides = [1, 1]} : vector<16x12xf32> to vector<16x8xf32>
    %475 = vector.extract_strided_slice %459 {offsets = [0, 1], sizes = [16, 8], strides = [1, 1]} : vector<16x12xf32> to vector<16x8xf32>
    %476 = vector.extract_strided_slice %459 {offsets = [0, 2], sizes = [16, 8], strides = [1, 1]} : vector<16x12xf32> to vector<16x8xf32>
    %477 = vector.extract_strided_slice %459 {offsets = [0, 3], sizes = [16, 8], strides = [1, 1]} : vector<16x12xf32> to vector<16x8xf32>
    %478 = vector.extract_strided_slice %459 {offsets = [0, 4], sizes = [16, 8], strides = [1, 1]} : vector<16x12xf32> to vector<16x8xf32>
    %479 = vector.extract_strided_slice %461 {offsets = [0, 0], sizes = [16, 8], strides = [1, 1]} : vector<16x12xf32> to vector<16x8xf32>
    %480 = vector.extract_strided_slice %461 {offsets = [0, 1], sizes = [16, 8], strides = [1, 1]} : vector<16x12xf32> to vector<16x8xf32>
    %481 = vector.extract_strided_slice %461 {offsets = [0, 2], sizes = [16, 8], strides = [1, 1]} : vector<16x12xf32> to vector<16x8xf32>
    %482 = vector.extract_strided_slice %461 {offsets = [0, 3], sizes = [16, 8], strides = [1, 1]} : vector<16x12xf32> to vector<16x8xf32>
    %483 = vector.extract_strided_slice %461 {offsets = [0, 4], sizes = [16, 8], strides = [1, 1]} : vector<16x12xf32> to vector<16x8xf32>
    %484 = vector.extract_strided_slice %463 {offsets = [0, 0], sizes = [16, 8], strides = [1, 1]} : vector<16x12xf32> to vector<16x8xf32>
    %485 = vector.extract_strided_slice %463 {offsets = [0, 1], sizes = [16, 8], strides = [1, 1]} : vector<16x12xf32> to vector<16x8xf32>
    %486 = vector.extract_strided_slice %463 {offsets = [0, 2], sizes = [16, 8], strides = [1, 1]} : vector<16x12xf32> to vector<16x8xf32>
    %487 = vector.extract_strided_slice %463 {offsets = [0, 3], sizes = [16, 8], strides = [1, 1]} : vector<16x12xf32> to vector<16x8xf32>
    %488 = vector.extract_strided_slice %463 {offsets = [0, 4], sizes = [16, 8], strides = [1, 1]} : vector<16x12xf32> to vector<16x8xf32>
    %489 = tpu.concatenate %464, %465, %466, %467, %468, %469, %470, %471, %472, %473, %474, %475, %476, %477, %478, %479 in 0 : vector<16x8xf32>, vector<16x8xf32>, vector<16x8xf32>, vector<16x8xf32>, vector<16x8xf32>, vector<16x8xf32>, vector<16x8xf32>, vector<16x8xf32>, vector<16x8xf32>, vector<16x8xf32>, vector<16x8xf32>, vector<16x8xf32>, vector<16x8xf32>, vector<16x8xf32>, vector<16x8xf32>, vector<16x8xf32> -> vector<256x8xf32>
    %490 = tpu.concatenate %480, %481, %482, %483, %484, %485, %486, %487, %488 in 0 : vector<16x8xf32>, vector<16x8xf32>, vector<16x8xf32>, vector<16x8xf32>, vector<16x8xf32>, vector<16x8xf32>, vector<16x8xf32>, vector<16x8xf32>, vector<16x8xf32> -> vector<144x8xf32>
    %491 = tpu.concatenate %489, %490 in 0 : vector<256x8xf32>, vector<144x8xf32> -> vector<400x8xf32>
    %492 = arith.truncf %491 : vector<400x8xf32> to vector<400x8xbf16>
    %cst_410 = arith.constant dense<0.000000e+00> : vector<32x8xf32>
    %493 = tpu.matmul %410, %492, %cst_410 {dimension_numbers = #tpu.dot_dimension_numbers<[1], [0], [0], [1], [0, 0, 1, 1], [], []>} : vector<32x400xbf16>, vector<400x8xbf16>, vector<32x8xf32> -> vector<32x8xf32>
    %494 = arith.maximumf %453, %493 : vector<32x8xf32>
    %cst_411 = arith.constant dense<0.000000e+00> : vector<32x4xf32>
    %495 = tpu.matmul %494, %26, %cst_411 {dimension_numbers = #tpu.dot_dimension_numbers<[1], [0], [0], [1], [0, 0, 1, 1], [], []>} : vector<32x8xf32>, vector<8x4xf32>, vector<32x4xf32> -> vector<32x4xf32>
    %cst_412 = arith.constant dense<0.000000e+00> : vector<32x4xf32>
    %496 = tpu.matmul %494, %35, %cst_412 {dimension_numbers = #tpu.dot_dimension_numbers<[1], [0], [0], [1], [0, 0, 1, 1], [], []>} : vector<32x8xf32>, vector<8x4xf32>, vector<32x4xf32> -> vector<32x4xf32>
    %497 = arith.maximumf %495, %496 : vector<32x4xf32>
    %498 = vector.broadcast %411 : vector<32x1xf32> to vector<32x4xf32>
    %499 = arith.addf %497, %498 : vector<32x4xf32>
    %500 = vector.broadcast %413 : vector<32x1xf32> to vector<32x4xf32>
    %501 = arith.mulf %499, %500 : vector<32x4xf32>
    %cst_413 = arith.constant 0.000000e+00 : f32
    %502 = vector.broadcast %cst_413 : f32 to vector<32x4xf32>
    %503 = arith.maximumf %501, %502 : vector<32x4xf32>
    %c2_414 = arith.constant 2 : index
    %c0_415 = arith.constant 0 : index
    %c0_416 = arith.constant 0 : index
    %504 = vector.load %arg8[%c2_414, %c0_415, %c0_416] : memref<12x16x12xf32, #tpu.memory_space<vmem>>, vector<1x16x12xf32>
    %505 = vector.shape_cast %504 : vector<1x16x12xf32> to vector<16x12xf32>
    %c3_417 = arith.constant 3 : index
    %c0_418 = arith.constant 0 : index
    %c0_419 = arith.constant 0 : index
    %506 = vector.load %arg8[%c3_417, %c0_418, %c0_419] : memref<12x16x12xf32, #tpu.memory_space<vmem>>, vector<1x16x12xf32>
    %507 = vector.shape_cast %506 : vector<1x16x12xf32> to vector<16x12xf32>
    %c4_420 = arith.constant 4 : index
    %c0_421 = arith.constant 0 : index
    %c0_422 = arith.constant 0 : index
    %508 = vector.load %arg8[%c4_420, %c0_421, %c0_422] : memref<12x16x12xf32, #tpu.memory_space<vmem>>, vector<1x16x12xf32>
    %509 = vector.shape_cast %508 : vector<1x16x12xf32> to vector<16x12xf32>
    %c5_423 = arith.constant 5 : index
    %c0_424 = arith.constant 0 : index
    %c0_425 = arith.constant 0 : index
    %510 = vector.load %arg8[%c5_423, %c0_424, %c0_425] : memref<12x16x12xf32, #tpu.memory_space<vmem>>, vector<1x16x12xf32>
    %511 = vector.shape_cast %510 : vector<1x16x12xf32> to vector<16x12xf32>
    %c6_426 = arith.constant 6 : index
    %c0_427 = arith.constant 0 : index
    %c0_428 = arith.constant 0 : index
    %512 = vector.load %arg8[%c6_426, %c0_427, %c0_428] : memref<12x16x12xf32, #tpu.memory_space<vmem>>, vector<1x16x12xf32>
    %513 = vector.shape_cast %512 : vector<1x16x12xf32> to vector<16x12xf32>
    %514 = vector.extract_strided_slice %505 {offsets = [0, 0], sizes = [16, 8], strides = [1, 1]} : vector<16x12xf32> to vector<16x8xf32>
    %515 = vector.extract_strided_slice %505 {offsets = [0, 1], sizes = [16, 8], strides = [1, 1]} : vector<16x12xf32> to vector<16x8xf32>
    %516 = vector.extract_strided_slice %505 {offsets = [0, 2], sizes = [16, 8], strides = [1, 1]} : vector<16x12xf32> to vector<16x8xf32>
    %517 = vector.extract_strided_slice %505 {offsets = [0, 3], sizes = [16, 8], strides = [1, 1]} : vector<16x12xf32> to vector<16x8xf32>
    %518 = vector.extract_strided_slice %505 {offsets = [0, 4], sizes = [16, 8], strides = [1, 1]} : vector<16x12xf32> to vector<16x8xf32>
    %519 = vector.extract_strided_slice %507 {offsets = [0, 0], sizes = [16, 8], strides = [1, 1]} : vector<16x12xf32> to vector<16x8xf32>
    %520 = vector.extract_strided_slice %507 {offsets = [0, 1], sizes = [16, 8], strides = [1, 1]} : vector<16x12xf32> to vector<16x8xf32>
    %521 = vector.extract_strided_slice %507 {offsets = [0, 2], sizes = [16, 8], strides = [1, 1]} : vector<16x12xf32> to vector<16x8xf32>
    %522 = vector.extract_strided_slice %507 {offsets = [0, 3], sizes = [16, 8], strides = [1, 1]} : vector<16x12xf32> to vector<16x8xf32>
    %523 = vector.extract_strided_slice %507 {offsets = [0, 4], sizes = [16, 8], strides = [1, 1]} : vector<16x12xf32> to vector<16x8xf32>
    %524 = vector.extract_strided_slice %509 {offsets = [0, 0], sizes = [16, 8], strides = [1, 1]} : vector<16x12xf32> to vector<16x8xf32>
    %525 = vector.extract_strided_slice %509 {offsets = [0, 1], sizes = [16, 8], strides = [1, 1]} : vector<16x12xf32> to vector<16x8xf32>
    %526 = vector.extract_strided_slice %509 {offsets = [0, 2], sizes = [16, 8], strides = [1, 1]} : vector<16x12xf32> to vector<16x8xf32>
    %527 = vector.extract_strided_slice %509 {offsets = [0, 3], sizes = [16, 8], strides = [1, 1]} : vector<16x12xf32> to vector<16x8xf32>
    %528 = vector.extract_strided_slice %509 {offsets = [0, 4], sizes = [16, 8], strides = [1, 1]} : vector<16x12xf32> to vector<16x8xf32>
    %529 = vector.extract_strided_slice %511 {offsets = [0, 0], sizes = [16, 8], strides = [1, 1]} : vector<16x12xf32> to vector<16x8xf32>
    %530 = vector.extract_strided_slice %511 {offsets = [0, 1], sizes = [16, 8], strides = [1, 1]} : vector<16x12xf32> to vector<16x8xf32>
    %531 = vector.extract_strided_slice %511 {offsets = [0, 2], sizes = [16, 8], strides = [1, 1]} : vector<16x12xf32> to vector<16x8xf32>
    %532 = vector.extract_strided_slice %511 {offsets = [0, 3], sizes = [16, 8], strides = [1, 1]} : vector<16x12xf32> to vector<16x8xf32>
    %533 = vector.extract_strided_slice %511 {offsets = [0, 4], sizes = [16, 8], strides = [1, 1]} : vector<16x12xf32> to vector<16x8xf32>
    %534 = vector.extract_strided_slice %513 {offsets = [0, 0], sizes = [16, 8], strides = [1, 1]} : vector<16x12xf32> to vector<16x8xf32>
    %535 = vector.extract_strided_slice %513 {offsets = [0, 1], sizes = [16, 8], strides = [1, 1]} : vector<16x12xf32> to vector<16x8xf32>
    %536 = vector.extract_strided_slice %513 {offsets = [0, 2], sizes = [16, 8], strides = [1, 1]} : vector<16x12xf32> to vector<16x8xf32>
    %537 = vector.extract_strided_slice %513 {offsets = [0, 3], sizes = [16, 8], strides = [1, 1]} : vector<16x12xf32> to vector<16x8xf32>
    %538 = vector.extract_strided_slice %513 {offsets = [0, 4], sizes = [16, 8], strides = [1, 1]} : vector<16x12xf32> to vector<16x8xf32>
    %539 = tpu.concatenate %514, %515, %516, %517, %518, %519, %520, %521, %522, %523, %524, %525, %526, %527, %528, %529 in 0 : vector<16x8xf32>, vector<16x8xf32>, vector<16x8xf32>, vector<16x8xf32>, vector<16x8xf32>, vector<16x8xf32>, vector<16x8xf32>, vector<16x8xf32>, vector<16x8xf32>, vector<16x8xf32>, vector<16x8xf32>, vector<16x8xf32>, vector<16x8xf32>, vector<16x8xf32>, vector<16x8xf32>, vector<16x8xf32> -> vector<256x8xf32>
    %540 = tpu.concatenate %530, %531, %532, %533, %534, %535, %536, %537, %538 in 0 : vector<16x8xf32>, vector<16x8xf32>, vector<16x8xf32>, vector<16x8xf32>, vector<16x8xf32>, vector<16x8xf32>, vector<16x8xf32>, vector<16x8xf32>, vector<16x8xf32> -> vector<144x8xf32>
    %541 = tpu.concatenate %539, %540 in 0 : vector<256x8xf32>, vector<144x8xf32> -> vector<400x8xf32>
    %542 = arith.truncf %541 : vector<400x8xf32> to vector<400x8xbf16>
    %cst_429 = arith.constant dense<0.000000e+00> : vector<32x8xf32>
    %543 = tpu.matmul %410, %542, %cst_429 {dimension_numbers = #tpu.dot_dimension_numbers<[1], [0], [0], [1], [0, 0, 1, 1], [], []>} : vector<32x400xbf16>, vector<400x8xbf16>, vector<32x8xf32> -> vector<32x8xf32>
    %c3_430 = arith.constant 3 : index
    %c0_431 = arith.constant 0 : index
    %c0_432 = arith.constant 0 : index
    %544 = vector.load %arg8[%c3_430, %c0_431, %c0_432] : memref<12x16x12xf32, #tpu.memory_space<vmem>>, vector<1x16x12xf32>
    %545 = vector.shape_cast %544 : vector<1x16x12xf32> to vector<16x12xf32>
    %c4_433 = arith.constant 4 : index
    %c0_434 = arith.constant 0 : index
    %c0_435 = arith.constant 0 : index
    %546 = vector.load %arg8[%c4_433, %c0_434, %c0_435] : memref<12x16x12xf32, #tpu.memory_space<vmem>>, vector<1x16x12xf32>
    %547 = vector.shape_cast %546 : vector<1x16x12xf32> to vector<16x12xf32>
    %c5_436 = arith.constant 5 : index
    %c0_437 = arith.constant 0 : index
    %c0_438 = arith.constant 0 : index
    %548 = vector.load %arg8[%c5_436, %c0_437, %c0_438] : memref<12x16x12xf32, #tpu.memory_space<vmem>>, vector<1x16x12xf32>
    %549 = vector.shape_cast %548 : vector<1x16x12xf32> to vector<16x12xf32>
    %c6_439 = arith.constant 6 : index
    %c0_440 = arith.constant 0 : index
    %c0_441 = arith.constant 0 : index
    %550 = vector.load %arg8[%c6_439, %c0_440, %c0_441] : memref<12x16x12xf32, #tpu.memory_space<vmem>>, vector<1x16x12xf32>
    %551 = vector.shape_cast %550 : vector<1x16x12xf32> to vector<16x12xf32>
    %c7_442 = arith.constant 7 : index
    %c0_443 = arith.constant 0 : index
    %c0_444 = arith.constant 0 : index
    %552 = vector.load %arg8[%c7_442, %c0_443, %c0_444] : memref<12x16x12xf32, #tpu.memory_space<vmem>>, vector<1x16x12xf32>
    %553 = vector.shape_cast %552 : vector<1x16x12xf32> to vector<16x12xf32>
    %554 = vector.extract_strided_slice %545 {offsets = [0, 0], sizes = [16, 8], strides = [1, 1]} : vector<16x12xf32> to vector<16x8xf32>
    %555 = vector.extract_strided_slice %545 {offsets = [0, 1], sizes = [16, 8], strides = [1, 1]} : vector<16x12xf32> to vector<16x8xf32>
    %556 = vector.extract_strided_slice %545 {offsets = [0, 2], sizes = [16, 8], strides = [1, 1]} : vector<16x12xf32> to vector<16x8xf32>
    %557 = vector.extract_strided_slice %545 {offsets = [0, 3], sizes = [16, 8], strides = [1, 1]} : vector<16x12xf32> to vector<16x8xf32>
    %558 = vector.extract_strided_slice %545 {offsets = [0, 4], sizes = [16, 8], strides = [1, 1]} : vector<16x12xf32> to vector<16x8xf32>
    %559 = vector.extract_strided_slice %547 {offsets = [0, 0], sizes = [16, 8], strides = [1, 1]} : vector<16x12xf32> to vector<16x8xf32>
    %560 = vector.extract_strided_slice %547 {offsets = [0, 1], sizes = [16, 8], strides = [1, 1]} : vector<16x12xf32> to vector<16x8xf32>
    %561 = vector.extract_strided_slice %547 {offsets = [0, 2], sizes = [16, 8], strides = [1, 1]} : vector<16x12xf32> to vector<16x8xf32>
    %562 = vector.extract_strided_slice %547 {offsets = [0, 3], sizes = [16, 8], strides = [1, 1]} : vector<16x12xf32> to vector<16x8xf32>
    %563 = vector.extract_strided_slice %547 {offsets = [0, 4], sizes = [16, 8], strides = [1, 1]} : vector<16x12xf32> to vector<16x8xf32>
    %564 = vector.extract_strided_slice %549 {offsets = [0, 0], sizes = [16, 8], strides = [1, 1]} : vector<16x12xf32> to vector<16x8xf32>
    %565 = vector.extract_strided_slice %549 {offsets = [0, 1], sizes = [16, 8], strides = [1, 1]} : vector<16x12xf32> to vector<16x8xf32>
    %566 = vector.extract_strided_slice %549 {offsets = [0, 2], sizes = [16, 8], strides = [1, 1]} : vector<16x12xf32> to vector<16x8xf32>
    %567 = vector.extract_strided_slice %549 {offsets = [0, 3], sizes = [16, 8], strides = [1, 1]} : vector<16x12xf32> to vector<16x8xf32>
    %568 = vector.extract_strided_slice %549 {offsets = [0, 4], sizes = [16, 8], strides = [1, 1]} : vector<16x12xf32> to vector<16x8xf32>
    %569 = vector.extract_strided_slice %551 {offsets = [0, 0], sizes = [16, 8], strides = [1, 1]} : vector<16x12xf32> to vector<16x8xf32>
    %570 = vector.extract_strided_slice %551 {offsets = [0, 1], sizes = [16, 8], strides = [1, 1]} : vector<16x12xf32> to vector<16x8xf32>
    %571 = vector.extract_strided_slice %551 {offsets = [0, 2], sizes = [16, 8], strides = [1, 1]} : vector<16x12xf32> to vector<16x8xf32>
    %572 = vector.extract_strided_slice %551 {offsets = [0, 3], sizes = [16, 8], strides = [1, 1]} : vector<16x12xf32> to vector<16x8xf32>
    %573 = vector.extract_strided_slice %551 {offsets = [0, 4], sizes = [16, 8], strides = [1, 1]} : vector<16x12xf32> to vector<16x8xf32>
    %574 = vector.extract_strided_slice %553 {offsets = [0, 0], sizes = [16, 8], strides = [1, 1]} : vector<16x12xf32> to vector<16x8xf32>
    %575 = vector.extract_strided_slice %553 {offsets = [0, 1], sizes = [16, 8], strides = [1, 1]} : vector<16x12xf32> to vector<16x8xf32>
    %576 = vector.extract_strided_slice %553 {offsets = [0, 2], sizes = [16, 8], strides = [1, 1]} : vector<16x12xf32> to vector<16x8xf32>
    %577 = vector.extract_strided_slice %553 {offsets = [0, 3], sizes = [16, 8], strides = [1, 1]} : vector<16x12xf32> to vector<16x8xf32>
    %578 = vector.extract_strided_slice %553 {offsets = [0, 4], sizes = [16, 8], strides = [1, 1]} : vector<16x12xf32> to vector<16x8xf32>
    %579 = tpu.concatenate %554, %555, %556, %557, %558, %559, %560, %561, %562, %563, %564, %565, %566, %567, %568, %569 in 0 : vector<16x8xf32>, vector<16x8xf32>, vector<16x8xf32>, vector<16x8xf32>, vector<16x8xf32>, vector<16x8xf32>, vector<16x8xf32>, vector<16x8xf32>, vector<16x8xf32>, vector<16x8xf32>, vector<16x8xf32>, vector<16x8xf32>, vector<16x8xf32>, vector<16x8xf32>, vector<16x8xf32>, vector<16x8xf32> -> vector<256x8xf32>
    %580 = tpu.concatenate %570, %571, %572, %573, %574, %575, %576, %577, %578 in 0 : vector<16x8xf32>, vector<16x8xf32>, vector<16x8xf32>, vector<16x8xf32>, vector<16x8xf32>, vector<16x8xf32>, vector<16x8xf32>, vector<16x8xf32>, vector<16x8xf32> -> vector<144x8xf32>
    %581 = tpu.concatenate %579, %580 in 0 : vector<256x8xf32>, vector<144x8xf32> -> vector<400x8xf32>
    %582 = arith.truncf %581 : vector<400x8xf32> to vector<400x8xbf16>
    %cst_445 = arith.constant dense<0.000000e+00> : vector<32x8xf32>
    %583 = tpu.matmul %410, %582, %cst_445 {dimension_numbers = #tpu.dot_dimension_numbers<[1], [0], [0], [1], [0, 0, 1, 1], [], []>} : vector<32x400xbf16>, vector<400x8xbf16>, vector<32x8xf32> -> vector<32x8xf32>
    %584 = arith.maximumf %543, %583 : vector<32x8xf32>
    %cst_446 = arith.constant dense<0.000000e+00> : vector<32x4xf32>
    %585 = tpu.matmul %584, %26, %cst_446 {dimension_numbers = #tpu.dot_dimension_numbers<[1], [0], [0], [1], [0, 0, 1, 1], [], []>} : vector<32x8xf32>, vector<8x4xf32>, vector<32x4xf32> -> vector<32x4xf32>
    %cst_447 = arith.constant dense<0.000000e+00> : vector<32x4xf32>
    %586 = tpu.matmul %584, %35, %cst_447 {dimension_numbers = #tpu.dot_dimension_numbers<[1], [0], [0], [1], [0, 0, 1, 1], [], []>} : vector<32x8xf32>, vector<8x4xf32>, vector<32x4xf32> -> vector<32x4xf32>
    %587 = arith.maximumf %585, %586 : vector<32x4xf32>
    %588 = vector.broadcast %411 : vector<32x1xf32> to vector<32x4xf32>
    %589 = arith.addf %587, %588 : vector<32x4xf32>
    %590 = vector.broadcast %413 : vector<32x1xf32> to vector<32x4xf32>
    %591 = arith.mulf %589, %590 : vector<32x4xf32>
    %cst_448 = arith.constant 0.000000e+00 : f32
    %592 = vector.broadcast %cst_448 : f32 to vector<32x4xf32>
    %593 = arith.maximumf %591, %592 : vector<32x4xf32>
    %c4_449 = arith.constant 4 : index
    %c0_450 = arith.constant 0 : index
    %c0_451 = arith.constant 0 : index
    %594 = vector.load %arg8[%c4_449, %c0_450, %c0_451] : memref<12x16x12xf32, #tpu.memory_space<vmem>>, vector<1x16x12xf32>
    %595 = vector.shape_cast %594 : vector<1x16x12xf32> to vector<16x12xf32>
    %c5_452 = arith.constant 5 : index
    %c0_453 = arith.constant 0 : index
    %c0_454 = arith.constant 0 : index
    %596 = vector.load %arg8[%c5_452, %c0_453, %c0_454] : memref<12x16x12xf32, #tpu.memory_space<vmem>>, vector<1x16x12xf32>
    %597 = vector.shape_cast %596 : vector<1x16x12xf32> to vector<16x12xf32>
    %c6_455 = arith.constant 6 : index
    %c0_456 = arith.constant 0 : index
    %c0_457 = arith.constant 0 : index
    %598 = vector.load %arg8[%c6_455, %c0_456, %c0_457] : memref<12x16x12xf32, #tpu.memory_space<vmem>>, vector<1x16x12xf32>
    %599 = vector.shape_cast %598 : vector<1x16x12xf32> to vector<16x12xf32>
    %c7_458 = arith.constant 7 : index
    %c0_459 = arith.constant 0 : index
    %c0_460 = arith.constant 0 : index
    %600 = vector.load %arg8[%c7_458, %c0_459, %c0_460] : memref<12x16x12xf32, #tpu.memory_space<vmem>>, vector<1x16x12xf32>
    %601 = vector.shape_cast %600 : vector<1x16x12xf32> to vector<16x12xf32>
    %c8_461 = arith.constant 8 : index
    %c0_462 = arith.constant 0 : index
    %c0_463 = arith.constant 0 : index
    %602 = vector.load %arg8[%c8_461, %c0_462, %c0_463] : memref<12x16x12xf32, #tpu.memory_space<vmem>>, vector<1x16x12xf32>
    %603 = vector.shape_cast %602 : vector<1x16x12xf32> to vector<16x12xf32>
    %604 = vector.extract_strided_slice %595 {offsets = [0, 0], sizes = [16, 8], strides = [1, 1]} : vector<16x12xf32> to vector<16x8xf32>
    %605 = vector.extract_strided_slice %595 {offsets = [0, 1], sizes = [16, 8], strides = [1, 1]} : vector<16x12xf32> to vector<16x8xf32>
    %606 = vector.extract_strided_slice %595 {offsets = [0, 2], sizes = [16, 8], strides = [1, 1]} : vector<16x12xf32> to vector<16x8xf32>
    %607 = vector.extract_strided_slice %595 {offsets = [0, 3], sizes = [16, 8], strides = [1, 1]} : vector<16x12xf32> to vector<16x8xf32>
    %608 = vector.extract_strided_slice %595 {offsets = [0, 4], sizes = [16, 8], strides = [1, 1]} : vector<16x12xf32> to vector<16x8xf32>
    %609 = vector.extract_strided_slice %597 {offsets = [0, 0], sizes = [16, 8], strides = [1, 1]} : vector<16x12xf32> to vector<16x8xf32>
    %610 = vector.extract_strided_slice %597 {offsets = [0, 1], sizes = [16, 8], strides = [1, 1]} : vector<16x12xf32> to vector<16x8xf32>
    %611 = vector.extract_strided_slice %597 {offsets = [0, 2], sizes = [16, 8], strides = [1, 1]} : vector<16x12xf32> to vector<16x8xf32>
    %612 = vector.extract_strided_slice %597 {offsets = [0, 3], sizes = [16, 8], strides = [1, 1]} : vector<16x12xf32> to vector<16x8xf32>
    %613 = vector.extract_strided_slice %597 {offsets = [0, 4], sizes = [16, 8], strides = [1, 1]} : vector<16x12xf32> to vector<16x8xf32>
    %614 = vector.extract_strided_slice %599 {offsets = [0, 0], sizes = [16, 8], strides = [1, 1]} : vector<16x12xf32> to vector<16x8xf32>
    %615 = vector.extract_strided_slice %599 {offsets = [0, 1], sizes = [16, 8], strides = [1, 1]} : vector<16x12xf32> to vector<16x8xf32>
    %616 = vector.extract_strided_slice %599 {offsets = [0, 2], sizes = [16, 8], strides = [1, 1]} : vector<16x12xf32> to vector<16x8xf32>
    %617 = vector.extract_strided_slice %599 {offsets = [0, 3], sizes = [16, 8], strides = [1, 1]} : vector<16x12xf32> to vector<16x8xf32>
    %618 = vector.extract_strided_slice %599 {offsets = [0, 4], sizes = [16, 8], strides = [1, 1]} : vector<16x12xf32> to vector<16x8xf32>
    %619 = vector.extract_strided_slice %601 {offsets = [0, 0], sizes = [16, 8], strides = [1, 1]} : vector<16x12xf32> to vector<16x8xf32>
    %620 = vector.extract_strided_slice %601 {offsets = [0, 1], sizes = [16, 8], strides = [1, 1]} : vector<16x12xf32> to vector<16x8xf32>
    %621 = vector.extract_strided_slice %601 {offsets = [0, 2], sizes = [16, 8], strides = [1, 1]} : vector<16x12xf32> to vector<16x8xf32>
    %622 = vector.extract_strided_slice %601 {offsets = [0, 3], sizes = [16, 8], strides = [1, 1]} : vector<16x12xf32> to vector<16x8xf32>
    %623 = vector.extract_strided_slice %601 {offsets = [0, 4], sizes = [16, 8], strides = [1, 1]} : vector<16x12xf32> to vector<16x8xf32>
    %624 = vector.extract_strided_slice %603 {offsets = [0, 0], sizes = [16, 8], strides = [1, 1]} : vector<16x12xf32> to vector<16x8xf32>
    %625 = vector.extract_strided_slice %603 {offsets = [0, 1], sizes = [16, 8], strides = [1, 1]} : vector<16x12xf32> to vector<16x8xf32>
    %626 = vector.extract_strided_slice %603 {offsets = [0, 2], sizes = [16, 8], strides = [1, 1]} : vector<16x12xf32> to vector<16x8xf32>
    %627 = vector.extract_strided_slice %603 {offsets = [0, 3], sizes = [16, 8], strides = [1, 1]} : vector<16x12xf32> to vector<16x8xf32>
    %628 = vector.extract_strided_slice %603 {offsets = [0, 4], sizes = [16, 8], strides = [1, 1]} : vector<16x12xf32> to vector<16x8xf32>
    %629 = tpu.concatenate %604, %605, %606, %607, %608, %609, %610, %611, %612, %613, %614, %615, %616, %617, %618, %619 in 0 : vector<16x8xf32>, vector<16x8xf32>, vector<16x8xf32>, vector<16x8xf32>, vector<16x8xf32>, vector<16x8xf32>, vector<16x8xf32>, vector<16x8xf32>, vector<16x8xf32>, vector<16x8xf32>, vector<16x8xf32>, vector<16x8xf32>, vector<16x8xf32>, vector<16x8xf32>, vector<16x8xf32>, vector<16x8xf32> -> vector<256x8xf32>
    %630 = tpu.concatenate %620, %621, %622, %623, %624, %625, %626, %627, %628 in 0 : vector<16x8xf32>, vector<16x8xf32>, vector<16x8xf32>, vector<16x8xf32>, vector<16x8xf32>, vector<16x8xf32>, vector<16x8xf32>, vector<16x8xf32>, vector<16x8xf32> -> vector<144x8xf32>
    %631 = tpu.concatenate %629, %630 in 0 : vector<256x8xf32>, vector<144x8xf32> -> vector<400x8xf32>
    %632 = arith.truncf %631 : vector<400x8xf32> to vector<400x8xbf16>
    %cst_464 = arith.constant dense<0.000000e+00> : vector<32x8xf32>
    %633 = tpu.matmul %410, %632, %cst_464 {dimension_numbers = #tpu.dot_dimension_numbers<[1], [0], [0], [1], [0, 0, 1, 1], [], []>} : vector<32x400xbf16>, vector<400x8xbf16>, vector<32x8xf32> -> vector<32x8xf32>
    %c5_465 = arith.constant 5 : index
    %c0_466 = arith.constant 0 : index
    %c0_467 = arith.constant 0 : index
    %634 = vector.load %arg8[%c5_465, %c0_466, %c0_467] : memref<12x16x12xf32, #tpu.memory_space<vmem>>, vector<1x16x12xf32>
    %635 = vector.shape_cast %634 : vector<1x16x12xf32> to vector<16x12xf32>
    %c6_468 = arith.constant 6 : index
    %c0_469 = arith.constant 0 : index
    %c0_470 = arith.constant 0 : index
    %636 = vector.load %arg8[%c6_468, %c0_469, %c0_470] : memref<12x16x12xf32, #tpu.memory_space<vmem>>, vector<1x16x12xf32>
    %637 = vector.shape_cast %636 : vector<1x16x12xf32> to vector<16x12xf32>
    %c7_471 = arith.constant 7 : index
    %c0_472 = arith.constant 0 : index
    %c0_473 = arith.constant 0 : index
    %638 = vector.load %arg8[%c7_471, %c0_472, %c0_473] : memref<12x16x12xf32, #tpu.memory_space<vmem>>, vector<1x16x12xf32>
    %639 = vector.shape_cast %638 : vector<1x16x12xf32> to vector<16x12xf32>
    %c8_474 = arith.constant 8 : index
    %c0_475 = arith.constant 0 : index
    %c0_476 = arith.constant 0 : index
    %640 = vector.load %arg8[%c8_474, %c0_475, %c0_476] : memref<12x16x12xf32, #tpu.memory_space<vmem>>, vector<1x16x12xf32>
    %641 = vector.shape_cast %640 : vector<1x16x12xf32> to vector<16x12xf32>
    %c9_477 = arith.constant 9 : index
    %c0_478 = arith.constant 0 : index
    %c0_479 = arith.constant 0 : index
    %642 = vector.load %arg8[%c9_477, %c0_478, %c0_479] : memref<12x16x12xf32, #tpu.memory_space<vmem>>, vector<1x16x12xf32>
    %643 = vector.shape_cast %642 : vector<1x16x12xf32> to vector<16x12xf32>
    %644 = vector.extract_strided_slice %635 {offsets = [0, 0], sizes = [16, 8], strides = [1, 1]} : vector<16x12xf32> to vector<16x8xf32>
    %645 = vector.extract_strided_slice %635 {offsets = [0, 1], sizes = [16, 8], strides = [1, 1]} : vector<16x12xf32> to vector<16x8xf32>
    %646 = vector.extract_strided_slice %635 {offsets = [0, 2], sizes = [16, 8], strides = [1, 1]} : vector<16x12xf32> to vector<16x8xf32>
    %647 = vector.extract_strided_slice %635 {offsets = [0, 3], sizes = [16, 8], strides = [1, 1]} : vector<16x12xf32> to vector<16x8xf32>
    %648 = vector.extract_strided_slice %635 {offsets = [0, 4], sizes = [16, 8], strides = [1, 1]} : vector<16x12xf32> to vector<16x8xf32>
    %649 = vector.extract_strided_slice %637 {offsets = [0, 0], sizes = [16, 8], strides = [1, 1]} : vector<16x12xf32> to vector<16x8xf32>
    %650 = vector.extract_strided_slice %637 {offsets = [0, 1], sizes = [16, 8], strides = [1, 1]} : vector<16x12xf32> to vector<16x8xf32>
    %651 = vector.extract_strided_slice %637 {offsets = [0, 2], sizes = [16, 8], strides = [1, 1]} : vector<16x12xf32> to vector<16x8xf32>
    %652 = vector.extract_strided_slice %637 {offsets = [0, 3], sizes = [16, 8], strides = [1, 1]} : vector<16x12xf32> to vector<16x8xf32>
    %653 = vector.extract_strided_slice %637 {offsets = [0, 4], sizes = [16, 8], strides = [1, 1]} : vector<16x12xf32> to vector<16x8xf32>
    %654 = vector.extract_strided_slice %639 {offsets = [0, 0], sizes = [16, 8], strides = [1, 1]} : vector<16x12xf32> to vector<16x8xf32>
    %655 = vector.extract_strided_slice %639 {offsets = [0, 1], sizes = [16, 8], strides = [1, 1]} : vector<16x12xf32> to vector<16x8xf32>
    %656 = vector.extract_strided_slice %639 {offsets = [0, 2], sizes = [16, 8], strides = [1, 1]} : vector<16x12xf32> to vector<16x8xf32>
    %657 = vector.extract_strided_slice %639 {offsets = [0, 3], sizes = [16, 8], strides = [1, 1]} : vector<16x12xf32> to vector<16x8xf32>
    %658 = vector.extract_strided_slice %639 {offsets = [0, 4], sizes = [16, 8], strides = [1, 1]} : vector<16x12xf32> to vector<16x8xf32>
    %659 = vector.extract_strided_slice %641 {offsets = [0, 0], sizes = [16, 8], strides = [1, 1]} : vector<16x12xf32> to vector<16x8xf32>
    %660 = vector.extract_strided_slice %641 {offsets = [0, 1], sizes = [16, 8], strides = [1, 1]} : vector<16x12xf32> to vector<16x8xf32>
    %661 = vector.extract_strided_slice %641 {offsets = [0, 2], sizes = [16, 8], strides = [1, 1]} : vector<16x12xf32> to vector<16x8xf32>
    %662 = vector.extract_strided_slice %641 {offsets = [0, 3], sizes = [16, 8], strides = [1, 1]} : vector<16x12xf32> to vector<16x8xf32>
    %663 = vector.extract_strided_slice %641 {offsets = [0, 4], sizes = [16, 8], strides = [1, 1]} : vector<16x12xf32> to vector<16x8xf32>
    %664 = vector.extract_strided_slice %643 {offsets = [0, 0], sizes = [16, 8], strides = [1, 1]} : vector<16x12xf32> to vector<16x8xf32>
    %665 = vector.extract_strided_slice %643 {offsets = [0, 1], sizes = [16, 8], strides = [1, 1]} : vector<16x12xf32> to vector<16x8xf32>
    %666 = vector.extract_strided_slice %643 {offsets = [0, 2], sizes = [16, 8], strides = [1, 1]} : vector<16x12xf32> to vector<16x8xf32>
    %667 = vector.extract_strided_slice %643 {offsets = [0, 3], sizes = [16, 8], strides = [1, 1]} : vector<16x12xf32> to vector<16x8xf32>
    %668 = vector.extract_strided_slice %643 {offsets = [0, 4], sizes = [16, 8], strides = [1, 1]} : vector<16x12xf32> to vector<16x8xf32>
    %669 = tpu.concatenate %644, %645, %646, %647, %648, %649, %650, %651, %652, %653, %654, %655, %656, %657, %658, %659 in 0 : vector<16x8xf32>, vector<16x8xf32>, vector<16x8xf32>, vector<16x8xf32>, vector<16x8xf32>, vector<16x8xf32>, vector<16x8xf32>, vector<16x8xf32>, vector<16x8xf32>, vector<16x8xf32>, vector<16x8xf32>, vector<16x8xf32>, vector<16x8xf32>, vector<16x8xf32>, vector<16x8xf32>, vector<16x8xf32> -> vector<256x8xf32>
    %670 = tpu.concatenate %660, %661, %662, %663, %664, %665, %666, %667, %668 in 0 : vector<16x8xf32>, vector<16x8xf32>, vector<16x8xf32>, vector<16x8xf32>, vector<16x8xf32>, vector<16x8xf32>, vector<16x8xf32>, vector<16x8xf32>, vector<16x8xf32> -> vector<144x8xf32>
    %671 = tpu.concatenate %669, %670 in 0 : vector<256x8xf32>, vector<144x8xf32> -> vector<400x8xf32>
    %672 = arith.truncf %671 : vector<400x8xf32> to vector<400x8xbf16>
    %cst_480 = arith.constant dense<0.000000e+00> : vector<32x8xf32>
    %673 = tpu.matmul %410, %672, %cst_480 {dimension_numbers = #tpu.dot_dimension_numbers<[1], [0], [0], [1], [0, 0, 1, 1], [], []>} : vector<32x400xbf16>, vector<400x8xbf16>, vector<32x8xf32> -> vector<32x8xf32>
    %674 = arith.maximumf %633, %673 : vector<32x8xf32>
    %cst_481 = arith.constant dense<0.000000e+00> : vector<32x4xf32>
    %675 = tpu.matmul %674, %26, %cst_481 {dimension_numbers = #tpu.dot_dimension_numbers<[1], [0], [0], [1], [0, 0, 1, 1], [], []>} : vector<32x8xf32>, vector<8x4xf32>, vector<32x4xf32> -> vector<32x4xf32>
    %cst_482 = arith.constant dense<0.000000e+00> : vector<32x4xf32>
    %676 = tpu.matmul %674, %35, %cst_482 {dimension_numbers = #tpu.dot_dimension_numbers<[1], [0], [0], [1], [0, 0, 1, 1], [], []>} : vector<32x8xf32>, vector<8x4xf32>, vector<32x4xf32> -> vector<32x4xf32>
    %677 = arith.maximumf %675, %676 : vector<32x4xf32>
    %678 = vector.broadcast %411 : vector<32x1xf32> to vector<32x4xf32>
    %679 = arith.addf %677, %678 : vector<32x4xf32>
    %680 = vector.broadcast %413 : vector<32x1xf32> to vector<32x4xf32>
    %681 = arith.mulf %679, %680 : vector<32x4xf32>
    %cst_483 = arith.constant 0.000000e+00 : f32
    %682 = vector.broadcast %cst_483 : f32 to vector<32x4xf32>
    %683 = arith.maximumf %681, %682 : vector<32x4xf32>
    %c6_484 = arith.constant 6 : index
    %c0_485 = arith.constant 0 : index
    %c0_486 = arith.constant 0 : index
    %684 = vector.load %arg8[%c6_484, %c0_485, %c0_486] : memref<12x16x12xf32, #tpu.memory_space<vmem>>, vector<1x16x12xf32>
    %685 = vector.shape_cast %684 : vector<1x16x12xf32> to vector<16x12xf32>
    %c7_487 = arith.constant 7 : index
    %c0_488 = arith.constant 0 : index
    %c0_489 = arith.constant 0 : index
    %686 = vector.load %arg8[%c7_487, %c0_488, %c0_489] : memref<12x16x12xf32, #tpu.memory_space<vmem>>, vector<1x16x12xf32>
    %687 = vector.shape_cast %686 : vector<1x16x12xf32> to vector<16x12xf32>
    %c8_490 = arith.constant 8 : index
    %c0_491 = arith.constant 0 : index
    %c0_492 = arith.constant 0 : index
    %688 = vector.load %arg8[%c8_490, %c0_491, %c0_492] : memref<12x16x12xf32, #tpu.memory_space<vmem>>, vector<1x16x12xf32>
    %689 = vector.shape_cast %688 : vector<1x16x12xf32> to vector<16x12xf32>
    %c9_493 = arith.constant 9 : index
    %c0_494 = arith.constant 0 : index
    %c0_495 = arith.constant 0 : index
    %690 = vector.load %arg8[%c9_493, %c0_494, %c0_495] : memref<12x16x12xf32, #tpu.memory_space<vmem>>, vector<1x16x12xf32>
    %691 = vector.shape_cast %690 : vector<1x16x12xf32> to vector<16x12xf32>
    %c10_496 = arith.constant 10 : index
    %c0_497 = arith.constant 0 : index
    %c0_498 = arith.constant 0 : index
    %692 = vector.load %arg8[%c10_496, %c0_497, %c0_498] : memref<12x16x12xf32, #tpu.memory_space<vmem>>, vector<1x16x12xf32>
    %693 = vector.shape_cast %692 : vector<1x16x12xf32> to vector<16x12xf32>
    %694 = vector.extract_strided_slice %685 {offsets = [0, 0], sizes = [16, 8], strides = [1, 1]} : vector<16x12xf32> to vector<16x8xf32>
    %695 = vector.extract_strided_slice %685 {offsets = [0, 1], sizes = [16, 8], strides = [1, 1]} : vector<16x12xf32> to vector<16x8xf32>
    %696 = vector.extract_strided_slice %685 {offsets = [0, 2], sizes = [16, 8], strides = [1, 1]} : vector<16x12xf32> to vector<16x8xf32>
    %697 = vector.extract_strided_slice %685 {offsets = [0, 3], sizes = [16, 8], strides = [1, 1]} : vector<16x12xf32> to vector<16x8xf32>
    %698 = vector.extract_strided_slice %685 {offsets = [0, 4], sizes = [16, 8], strides = [1, 1]} : vector<16x12xf32> to vector<16x8xf32>
    %699 = vector.extract_strided_slice %687 {offsets = [0, 0], sizes = [16, 8], strides = [1, 1]} : vector<16x12xf32> to vector<16x8xf32>
    %700 = vector.extract_strided_slice %687 {offsets = [0, 1], sizes = [16, 8], strides = [1, 1]} : vector<16x12xf32> to vector<16x8xf32>
    %701 = vector.extract_strided_slice %687 {offsets = [0, 2], sizes = [16, 8], strides = [1, 1]} : vector<16x12xf32> to vector<16x8xf32>
    %702 = vector.extract_strided_slice %687 {offsets = [0, 3], sizes = [16, 8], strides = [1, 1]} : vector<16x12xf32> to vector<16x8xf32>
    %703 = vector.extract_strided_slice %687 {offsets = [0, 4], sizes = [16, 8], strides = [1, 1]} : vector<16x12xf32> to vector<16x8xf32>
    %704 = vector.extract_strided_slice %689 {offsets = [0, 0], sizes = [16, 8], strides = [1, 1]} : vector<16x12xf32> to vector<16x8xf32>
    %705 = vector.extract_strided_slice %689 {offsets = [0, 1], sizes = [16, 8], strides = [1, 1]} : vector<16x12xf32> to vector<16x8xf32>
    %706 = vector.extract_strided_slice %689 {offsets = [0, 2], sizes = [16, 8], strides = [1, 1]} : vector<16x12xf32> to vector<16x8xf32>
    %707 = vector.extract_strided_slice %689 {offsets = [0, 3], sizes = [16, 8], strides = [1, 1]} : vector<16x12xf32> to vector<16x8xf32>
    %708 = vector.extract_strided_slice %689 {offsets = [0, 4], sizes = [16, 8], strides = [1, 1]} : vector<16x12xf32> to vector<16x8xf32>
    %709 = vector.extract_strided_slice %691 {offsets = [0, 0], sizes = [16, 8], strides = [1, 1]} : vector<16x12xf32> to vector<16x8xf32>
    %710 = vector.extract_strided_slice %691 {offsets = [0, 1], sizes = [16, 8], strides = [1, 1]} : vector<16x12xf32> to vector<16x8xf32>
    %711 = vector.extract_strided_slice %691 {offsets = [0, 2], sizes = [16, 8], strides = [1, 1]} : vector<16x12xf32> to vector<16x8xf32>
    %712 = vector.extract_strided_slice %691 {offsets = [0, 3], sizes = [16, 8], strides = [1, 1]} : vector<16x12xf32> to vector<16x8xf32>
    %713 = vector.extract_strided_slice %691 {offsets = [0, 4], sizes = [16, 8], strides = [1, 1]} : vector<16x12xf32> to vector<16x8xf32>
    %714 = vector.extract_strided_slice %693 {offsets = [0, 0], sizes = [16, 8], strides = [1, 1]} : vector<16x12xf32> to vector<16x8xf32>
    %715 = vector.extract_strided_slice %693 {offsets = [0, 1], sizes = [16, 8], strides = [1, 1]} : vector<16x12xf32> to vector<16x8xf32>
    %716 = vector.extract_strided_slice %693 {offsets = [0, 2], sizes = [16, 8], strides = [1, 1]} : vector<16x12xf32> to vector<16x8xf32>
    %717 = vector.extract_strided_slice %693 {offsets = [0, 3], sizes = [16, 8], strides = [1, 1]} : vector<16x12xf32> to vector<16x8xf32>
    %718 = vector.extract_strided_slice %693 {offsets = [0, 4], sizes = [16, 8], strides = [1, 1]} : vector<16x12xf32> to vector<16x8xf32>
    %719 = tpu.concatenate %694, %695, %696, %697, %698, %699, %700, %701, %702, %703, %704, %705, %706, %707, %708, %709 in 0 : vector<16x8xf32>, vector<16x8xf32>, vector<16x8xf32>, vector<16x8xf32>, vector<16x8xf32>, vector<16x8xf32>, vector<16x8xf32>, vector<16x8xf32>, vector<16x8xf32>, vector<16x8xf32>, vector<16x8xf32>, vector<16x8xf32>, vector<16x8xf32>, vector<16x8xf32>, vector<16x8xf32>, vector<16x8xf32> -> vector<256x8xf32>
    %720 = tpu.concatenate %710, %711, %712, %713, %714, %715, %716, %717, %718 in 0 : vector<16x8xf32>, vector<16x8xf32>, vector<16x8xf32>, vector<16x8xf32>, vector<16x8xf32>, vector<16x8xf32>, vector<16x8xf32>, vector<16x8xf32>, vector<16x8xf32> -> vector<144x8xf32>
    %721 = tpu.concatenate %719, %720 in 0 : vector<256x8xf32>, vector<144x8xf32> -> vector<400x8xf32>
    %722 = arith.truncf %721 : vector<400x8xf32> to vector<400x8xbf16>
    %cst_499 = arith.constant dense<0.000000e+00> : vector<32x8xf32>
    %723 = tpu.matmul %410, %722, %cst_499 {dimension_numbers = #tpu.dot_dimension_numbers<[1], [0], [0], [1], [0, 0, 1, 1], [], []>} : vector<32x400xbf16>, vector<400x8xbf16>, vector<32x8xf32> -> vector<32x8xf32>
    %c7_500 = arith.constant 7 : index
    %c0_501 = arith.constant 0 : index
    %c0_502 = arith.constant 0 : index
    %724 = vector.load %arg8[%c7_500, %c0_501, %c0_502] : memref<12x16x12xf32, #tpu.memory_space<vmem>>, vector<1x16x12xf32>
    %725 = vector.shape_cast %724 : vector<1x16x12xf32> to vector<16x12xf32>
    %c8_503 = arith.constant 8 : index
    %c0_504 = arith.constant 0 : index
    %c0_505 = arith.constant 0 : index
    %726 = vector.load %arg8[%c8_503, %c0_504, %c0_505] : memref<12x16x12xf32, #tpu.memory_space<vmem>>, vector<1x16x12xf32>
    %727 = vector.shape_cast %726 : vector<1x16x12xf32> to vector<16x12xf32>
    %c9_506 = arith.constant 9 : index
    %c0_507 = arith.constant 0 : index
    %c0_508 = arith.constant 0 : index
    %728 = vector.load %arg8[%c9_506, %c0_507, %c0_508] : memref<12x16x12xf32, #tpu.memory_space<vmem>>, vector<1x16x12xf32>
    %729 = vector.shape_cast %728 : vector<1x16x12xf32> to vector<16x12xf32>
    %c10_509 = arith.constant 10 : index
    %c0_510 = arith.constant 0 : index
    %c0_511 = arith.constant 0 : index
    %730 = vector.load %arg8[%c10_509, %c0_510, %c0_511] : memref<12x16x12xf32, #tpu.memory_space<vmem>>, vector<1x16x12xf32>
    %731 = vector.shape_cast %730 : vector<1x16x12xf32> to vector<16x12xf32>
    %c11_512 = arith.constant 11 : index
    %c0_513 = arith.constant 0 : index
    %c0_514 = arith.constant 0 : index
    %732 = vector.load %arg8[%c11_512, %c0_513, %c0_514] : memref<12x16x12xf32, #tpu.memory_space<vmem>>, vector<1x16x12xf32>
    %733 = vector.shape_cast %732 : vector<1x16x12xf32> to vector<16x12xf32>
    %734 = vector.extract_strided_slice %725 {offsets = [0, 0], sizes = [16, 8], strides = [1, 1]} : vector<16x12xf32> to vector<16x8xf32>
    %735 = vector.extract_strided_slice %725 {offsets = [0, 1], sizes = [16, 8], strides = [1, 1]} : vector<16x12xf32> to vector<16x8xf32>
    %736 = vector.extract_strided_slice %725 {offsets = [0, 2], sizes = [16, 8], strides = [1, 1]} : vector<16x12xf32> to vector<16x8xf32>
    %737 = vector.extract_strided_slice %725 {offsets = [0, 3], sizes = [16, 8], strides = [1, 1]} : vector<16x12xf32> to vector<16x8xf32>
    %738 = vector.extract_strided_slice %725 {offsets = [0, 4], sizes = [16, 8], strides = [1, 1]} : vector<16x12xf32> to vector<16x8xf32>
    %739 = vector.extract_strided_slice %727 {offsets = [0, 0], sizes = [16, 8], strides = [1, 1]} : vector<16x12xf32> to vector<16x8xf32>
    %740 = vector.extract_strided_slice %727 {offsets = [0, 1], sizes = [16, 8], strides = [1, 1]} : vector<16x12xf32> to vector<16x8xf32>
    %741 = vector.extract_strided_slice %727 {offsets = [0, 2], sizes = [16, 8], strides = [1, 1]} : vector<16x12xf32> to vector<16x8xf32>
    %742 = vector.extract_strided_slice %727 {offsets = [0, 3], sizes = [16, 8], strides = [1, 1]} : vector<16x12xf32> to vector<16x8xf32>
    %743 = vector.extract_strided_slice %727 {offsets = [0, 4], sizes = [16, 8], strides = [1, 1]} : vector<16x12xf32> to vector<16x8xf32>
    %744 = vector.extract_strided_slice %729 {offsets = [0, 0], sizes = [16, 8], strides = [1, 1]} : vector<16x12xf32> to vector<16x8xf32>
    %745 = vector.extract_strided_slice %729 {offsets = [0, 1], sizes = [16, 8], strides = [1, 1]} : vector<16x12xf32> to vector<16x8xf32>
    %746 = vector.extract_strided_slice %729 {offsets = [0, 2], sizes = [16, 8], strides = [1, 1]} : vector<16x12xf32> to vector<16x8xf32>
    %747 = vector.extract_strided_slice %729 {offsets = [0, 3], sizes = [16, 8], strides = [1, 1]} : vector<16x12xf32> to vector<16x8xf32>
    %748 = vector.extract_strided_slice %729 {offsets = [0, 4], sizes = [16, 8], strides = [1, 1]} : vector<16x12xf32> to vector<16x8xf32>
    %749 = vector.extract_strided_slice %731 {offsets = [0, 0], sizes = [16, 8], strides = [1, 1]} : vector<16x12xf32> to vector<16x8xf32>
    %750 = vector.extract_strided_slice %731 {offsets = [0, 1], sizes = [16, 8], strides = [1, 1]} : vector<16x12xf32> to vector<16x8xf32>
    %751 = vector.extract_strided_slice %731 {offsets = [0, 2], sizes = [16, 8], strides = [1, 1]} : vector<16x12xf32> to vector<16x8xf32>
    %752 = vector.extract_strided_slice %731 {offsets = [0, 3], sizes = [16, 8], strides = [1, 1]} : vector<16x12xf32> to vector<16x8xf32>
    %753 = vector.extract_strided_slice %731 {offsets = [0, 4], sizes = [16, 8], strides = [1, 1]} : vector<16x12xf32> to vector<16x8xf32>
    %754 = vector.extract_strided_slice %733 {offsets = [0, 0], sizes = [16, 8], strides = [1, 1]} : vector<16x12xf32> to vector<16x8xf32>
    %755 = vector.extract_strided_slice %733 {offsets = [0, 1], sizes = [16, 8], strides = [1, 1]} : vector<16x12xf32> to vector<16x8xf32>
    %756 = vector.extract_strided_slice %733 {offsets = [0, 2], sizes = [16, 8], strides = [1, 1]} : vector<16x12xf32> to vector<16x8xf32>
    %757 = vector.extract_strided_slice %733 {offsets = [0, 3], sizes = [16, 8], strides = [1, 1]} : vector<16x12xf32> to vector<16x8xf32>
    %758 = vector.extract_strided_slice %733 {offsets = [0, 4], sizes = [16, 8], strides = [1, 1]} : vector<16x12xf32> to vector<16x8xf32>
    %759 = tpu.concatenate %734, %735, %736, %737, %738, %739, %740, %741, %742, %743, %744, %745, %746, %747, %748, %749 in 0 : vector<16x8xf32>, vector<16x8xf32>, vector<16x8xf32>, vector<16x8xf32>, vector<16x8xf32>, vector<16x8xf32>, vector<16x8xf32>, vector<16x8xf32>, vector<16x8xf32>, vector<16x8xf32>, vector<16x8xf32>, vector<16x8xf32>, vector<16x8xf32>, vector<16x8xf32>, vector<16x8xf32>, vector<16x8xf32> -> vector<256x8xf32>
    %760 = tpu.concatenate %750, %751, %752, %753, %754, %755, %756, %757, %758 in 0 : vector<16x8xf32>, vector<16x8xf32>, vector<16x8xf32>, vector<16x8xf32>, vector<16x8xf32>, vector<16x8xf32>, vector<16x8xf32>, vector<16x8xf32>, vector<16x8xf32> -> vector<144x8xf32>
    %761 = tpu.concatenate %759, %760 in 0 : vector<256x8xf32>, vector<144x8xf32> -> vector<400x8xf32>
    %762 = arith.truncf %761 : vector<400x8xf32> to vector<400x8xbf16>
    %cst_515 = arith.constant dense<0.000000e+00> : vector<32x8xf32>
    %763 = tpu.matmul %410, %762, %cst_515 {dimension_numbers = #tpu.dot_dimension_numbers<[1], [0], [0], [1], [0, 0, 1, 1], [], []>} : vector<32x400xbf16>, vector<400x8xbf16>, vector<32x8xf32> -> vector<32x8xf32>
    %764 = arith.maximumf %723, %763 : vector<32x8xf32>
    %cst_516 = arith.constant dense<0.000000e+00> : vector<32x4xf32>
    %765 = tpu.matmul %764, %26, %cst_516 {dimension_numbers = #tpu.dot_dimension_numbers<[1], [0], [0], [1], [0, 0, 1, 1], [], []>} : vector<32x8xf32>, vector<8x4xf32>, vector<32x4xf32> -> vector<32x4xf32>
    %cst_517 = arith.constant dense<0.000000e+00> : vector<32x4xf32>
    %766 = tpu.matmul %764, %35, %cst_517 {dimension_numbers = #tpu.dot_dimension_numbers<[1], [0], [0], [1], [0, 0, 1, 1], [], []>} : vector<32x8xf32>, vector<8x4xf32>, vector<32x4xf32> -> vector<32x4xf32>
    %767 = arith.maximumf %765, %766 : vector<32x4xf32>
    %768 = vector.broadcast %411 : vector<32x1xf32> to vector<32x4xf32>
    %769 = arith.addf %767, %768 : vector<32x4xf32>
    %770 = vector.broadcast %413 : vector<32x1xf32> to vector<32x4xf32>
    %771 = arith.mulf %769, %770 : vector<32x4xf32>
    %cst_518 = arith.constant 0.000000e+00 : f32
    %772 = vector.broadcast %cst_518 : f32 to vector<32x4xf32>
    %773 = arith.maximumf %771, %772 : vector<32x4xf32>
    %774 = tpu.concatenate %503, %593, %683, %773 in 1 : vector<32x4xf32>, vector<32x4xf32>, vector<32x4xf32>, vector<32x4xf32> -> vector<32x16xf32>
    %c0_519 = arith.constant 0 : index
    %c0_520 = arith.constant 0 : index
    %c0_521 = arith.constant 0 : index
    %775 = vector.load %arg7[%c0_519, %c0_520, %c0_521] : memref<1x32x16xf32, #tpu.memory_space<vmem>>, vector<1x32x16xf32>
    %776 = vector.shape_cast %775 : vector<1x32x16xf32> to vector<32x16xf32>
    %777 = vector.shape_cast %774 : vector<32x16xf32> to vector<1x32x16xf32>
    tpu.vector_store %arg7[%c0_519, %c0_520, %c0_521], %777 {strides = array<i32>} : memref<1x32x16xf32, #tpu.memory_space<vmem>>, vector<1x32x16xf32>,
    return
  }
  func.func @transform_0(%arg0: i32) -> (i32, i32, i32) {
    %c0_i32 = arith.constant 0 : i32
    %c0_i32_0 = arith.constant 0 : i32
    %c0_i32_1 = arith.constant 0 : i32
    return %arg0, %c0_i32, %c0_i32_0 : i32, i32, i32
  }
  func.func @transform_1(%arg0: i32) -> (i32, i32, i32) {
    %c0_i32 = arith.constant 0 : i32
    %c0_i32_0 = arith.constant 0 : i32
    %c0_i32_1 = arith.constant 0 : i32
    return %arg0, %c0_i32, %c0_i32_0 : i32, i32, i32
  }
  func.func @transform_2(%arg0: i32) -> (i32, i32) {
    %c0_i32 = arith.constant 0 : i32
    %c0_i32_0 = arith.constant 0 : i32
    %c0_i32_1 = arith.constant 0 : i32
    return %c0_i32, %c0_i32_0 : i32, i32
  }
  func.func @transform_3(%arg0: i32) -> (i32, i32) {
    %c0_i32 = arith.constant 0 : i32
    %c0_i32_0 = arith.constant 0 : i32
    %c0_i32_1 = arith.constant 0 : i32
    return %c0_i32, %c0_i32_0 : i32, i32
  }
  func.func @transform_4(%arg0: i32) -> (i32, i32) {
    %c0_i32 = arith.constant 0 : i32
    %c0_i32_0 = arith.constant 0 : i32
    %c0_i32_1 = arith.constant 0 : i32
    return %c0_i32, %c0_i32_0 : i32, i32
  }
  func.func @transform_5(%arg0: i32) -> (i32, i32) {
    %c0_i32 = arith.constant 0 : i32
    %c0_i32_0 = arith.constant 0 : i32
    %c0_i32_1 = arith.constant 0 : i32
    return %c0_i32, %c0_i32_0 : i32, i32
  }
  func.func @transform_6(%arg0: i32) -> (i32, i32, i32) {
    %c0_i32 = arith.constant 0 : i32
    %c0_i32_0 = arith.constant 0 : i32
    %c0_i32_1 = arith.constant 0 : i32
    return %arg0, %c0_i32, %c0_i32_0 : i32, i32, i32
  }
}

</mosaic_0001>

<bundles_post_ra>
// kernel: tpu_custom_call.1
= control target key start
LH: loop header
LB: loop body
LE: loop exit
PB: predicated region body
PF: predicated region fallthrough
CT: control target
= control target key end

     0   :  { %s7814_s21 = smov 0   ;;  %s9897_s0 = inlined_call_operand.vmem [shape: f32[2,24,24], index: 0, kind: input, shape index: {}]   ;;  %s9898_s1 = inlined_call_operand.vmem [shape: f32[2,32,1], index: 1, kind: input, shape index: {}]   ;;  %s9899_s2 = inlined_call_operand.vmem [shape: bf16[16,25], index: 2, kind: input, shape index: {}]   ;;  %s9900_s3 = inlined_call_operand.vmem [shape: f32[16,1], index: 3, kind: input, shape index: {}]   ;;  %s9901_s4 = inlined_call_operand.vmem [shape: bf16[32,400], index: 4, kind: input, shape index: {}]   ;;  %s9902_s5 = inlined_call_operand.vmem [shape: f32[32,1], index: 5, kind: input, shape index: {}]   ;;  %s9903_s6 = inlined_call_operand.vmem [shape: f32[2,32,16], index: 6, kind: output, shape index: {}]  }
   0x1 LB: > { %s5944_s22 = sadd.s32 4294967295, %s7763_s21   ;;  %p5948_p0 = scmp.ge.s32.totalorder %s7763_s21, 1  ;;  %s7763_s21 = sphi %s7814_s21, %s16_s21  }
   0x2   : > { %p222_p1 = scmp.lt.s32.totalorder %s7763_s21, 3 }
   0x4   : > { %p223_p2 = pnand %p5948_p0, %p222_p1 }
   0x6   : > { %226 = sbr.rel (%p223_p2) target bundleno = 3945 (0xf69), region = 44 }
   0xd   : > { %p257_p3 = scmp.lt.s32.totalorder %s5944_s22, 1  ;;  %v9908_v2 = vmov 0.0   ;;  %s7766_s27 = smov 125   ;;  %vm7768_vm0 = vmmov 0   ;;  %v273_v29 = vlaneseq  ;;  %vm352_vm1 = vcmask 1043456  }
   0xe   : > { %6573 = vmatprep.subr.bf16.mxu0 %v9908_v2  ;;  %6581 = vmatprep.subr.bf16.mxu1 %v9908_v2  ;;  %s7767_s28 = smov 127   ;;  %s7769_s29 = smov 124   ;;  %vm346_vm2 = vcmask 1044480   ;;  %vm348_vm3 = vcmask 1041408   ;;  %vm350_vm4 = vcmask 1046528   ;;  %v7771_v44 = vmov 65535  }
   0xf   : > { %s10031_s22 = smov (!%p257_p3, %s5944_s22), 1  ;;  %6577 = vmatprep.mubr.msk.bf16.mxu0 %vm7768_vm0, %v9908_v2  ;;  %6585 = vmatprep.mubr.msk.bf16.mxu1 %vm7768_vm0, %v9908_v2  ;;  %s7770_s30 = smov 126   ;;  %v7872_v32 = vshrl.u32 %v273_v29, 7  ;;  %v278_v33 = vand.u32 127, %v273_v29  ;;  %v365_v45 = vsel %vm352_vm1, 4294967295, %v7771_v44  ;;  %v9944_v61 = vmov 0 }
  0x10   : > { %s7059_s23 = smul.u32 24, %s10031_s22  ;;  %v7887_v60 = vsel %vm346_vm2, %v365_v45, 0  ;;  %vm361_vm8 = vcmask 203776   ;;  %vm481_vm14 = vcmask 162816   ;;  %vm299_vm15 = vcmask 97280   ;;  %s7774_s13 = smov 1  }
  0x11   : > { %v275_v46 = vadd.s32 8, %v7872_v32  ;;  %v279_v47 = vmul.u32 2, %v278_v33  ;;  %307 = vst.msk [vmem:[#allocation2 + $0x38] sm:$0xff] %vm299_vm15, %v9908_v2  ;;  %300 = vst.msk [vmem:[#allocation2] sm:$0xff] %vm299_vm15, %v9908_v2  ;;  %s6147_s15 = sshll.u32 %s10031_s22, 5  ;;  %s7776_s17 = smov 4  }
  0x12   : > { %s7828_s26 = scalar_lea.vmem %s9897_s0, %s7059_s23  ;;  %301 = vst.msk [vmem:[#allocation2 + $0x8] sm:$0xff] %vm299_vm15, %v9908_v2  ;;  %302 = vst.msk [vmem:[#allocation2 + $0x10] sm:$0xff] %vm299_vm15, %v9908_v2  ;;  %s266_s23 = scalar_lea.vmem %s9898_s1, %s6147_s15 }
  0x13   : > { %v7831_v0 = vld [vmem:[%s7828_s26] sm:$0x1f]  ;;  %vm7890_vm5 = vcmp.eq.s32.totalorder %v7872_v32, %v279_v47  ;;  %vm281_vm6 = vcmp.eq.s32.totalorder %v275_v46, %v279_v47  ;;  %303 = vst.msk [vmem:[#allocation2 + $0x18] sm:$0xff] %vm299_vm15, %v9908_v2  ;;  %304 = vst.msk [vmem:[#allocation2 + $0x20] sm:$0xff] %vm299_vm15, %v9908_v2  ;;  %s7777_s18 = smov 8   ;;  %s7778_s19 = smov 12  }
  0x14   : > { %v7834_v1 = vld [vmem:[%s7828_s26 + $0x1] sm:$0x1f]  ;;  %v338_v3 = vrot.slane %v7831_v0, 1  ;;  %v330_v5 = vrot.slane %v7831_v0, 3  ;;  %v342_v7 = vrot.slane %v7831_v0, 4  ;;  %v334_v9 = vrot.slane %v7831_v0, 6  ;;  %vm7900_vm7 = vmpackc.low %vm281_vm6, %vm7890_vm5  ;;  %s271_s24 = scalar_lea.vmem %s9903_s6, %s6147_s15 }
  0x15   : > { %v421_v4 = vrot.slane %v7834_v1, 1  ;;  %v413_v6 = vrot.slane %v7834_v1, 3  ;;  %v425_v8 = vrot.slane %v7834_v1, 4  ;;  %v417_v10 = vrot.slane %v7834_v1, 6  ;;  %v7855_v15 = vld [vmem:[%s7828_s26 + $0x2] sm:$0x1f] }
  0x16   : > { %v7858_v16 = vld [vmem:[%s7828_s26 + $0x3] sm:$0x1f]  ;;  %v674_v17 = vrot.slane %v7855_v15, 3  ;;  %v678_v19 = vrot.slane %v7855_v15, 6  ;;  %v682_v21 = vrot.slane %v7855_v15, 1  ;;  %v686_v23 = vrot.slane %v7855_v15, 4 }
  0x17   : > { %v7092_v11 = vpack.i.bf16 %v421_v4, %v338_v3  ;;  %v7082_v12 = vpack.i.bf16 %v413_v6, %v330_v5  ;;  %v7097_v13 = vpack.i.bf16 %v425_v8, %v342_v7  ;;  %v7087_v14 = vpack.i.bf16 %v417_v10, %v334_v9  ;;  %305 = vst.msk [vmem:[#allocation2 + $0x28] sm:$0xff] %vm299_vm15, %v9908_v2 }
  0x18   : > { %v742_v18 = vrot.slane %v7858_v16, 3  ;;  %v746_v20 = vrot.slane %v7858_v16, 6  ;;  %v750_v22 = vrot.slane %v7858_v16, 1  ;;  %v754_v24 = vrot.slane %v7858_v16, 4  ;;  %306 = vst.msk [vmem:[#allocation2 + $0x30] sm:$0xff] %vm299_vm15, %v9908_v2  ;;  %308 = vst.msk [vmem:[#allocation2 + $0x40] sm:$0xff] %vm299_vm15, %v9908_v2 }
  0x19   : > { %7093 = vrot.lane.b32.xlu1 %v7092_v11, %s7766_s27  ;;  %7083 = vrot.lane.b32.xlu0 %v7082_v12, %s7767_s28  ;;  %v9945_v61 = vsel %vm7890_vm5, 4294967295, %v9944_v61  ;;  %v9906_v3 = vmov 1.0|1.0   ;;  %v7931_v9 = vadd.s32 16, %v7872_v32  ;;  %v7936_v12 = vadd.s32 1, %v279_v47  ;;  %309 = vst.msk [vmem:[#allocation2 + $0x48] sm:$0xff] %vm299_vm15, %v9908_v2 }
  0x1a   : > { %v7102_v25 = vpack.i.bf16 %v742_v18, %v674_v17  ;;  %v7107_v26 = vpack.i.bf16 %v746_v20, %v678_v19  ;;  %v7112_v27 = vpack.i.bf16 %v750_v22, %v682_v21  ;;  %v7117_v28 = vpack.i.bf16 %v754_v24, %v686_v23  ;;  %9946 = vst [vmem:[#allocation3_spill] sm:$0xff] %v9945_v61 }
  0x1b   : > { %vm282_vm9 = vcmp.eq.s32.totalorder %v7931_v9, %v279_v47  ;;  %vm7945_vm10 = vcmp.eq.s32.totalorder %v7872_v32, %v7936_v12  ;;  %vm291_vm11 = vcmp.eq.s32.totalorder %v275_v46, %v7936_v12  ;;  %vm292_vm13 = vcmp.eq.s32.totalorder %v7931_v9, %v7936_v12  ;;  %v7996_v32 = vld [vmem:[%s7828_s26 + $0x7] sm:$0x1f]  ;;  %310 = vst.msk [vmem:[#allocation2 + $0x50] sm:$0xff] %vm299_vm15, %v9908_v2 }
  0x1c   : > { %vm7959_vm12 = vmpackc.low %vm291_vm11, %vm7945_vm10  ;;  %v1364_v44 = vrot.slane %v7996_v32, 3  ;;  %v8013_v47 = vld [vmem:[%s7828_s26 + $0x8] sm:$0x1f]  ;;  %311 = vst.msk [vmem:[#allocation2 + $0x58] sm:$0xff] %vm299_vm15, %v9908_v2  ;;  %vm669_vm6 = vcmask 89096   ;;  %v9984_v20 = vmov 0  }
  0x1d   : > { %7098 = vrot.lane.b32.xlu1 %v7097_v13, %s7769_s29  ;;  %7088 = vrot.lane.b32.xlu0 %v7087_v14, %s7770_s30  ;;  %v7939_v13 = vsel %vm282_vm9, 1.0, %v9908_v2  ;;  %v9949_v14 = vmov 0  ;;  %312 = vst.msk [vmem:[#allocation2 + $0x60] sm:$0xff] %vm299_vm15, %v9908_v2  ;;  %313 = vst.msk [vmem:[#allocation2 + $0x68] sm:$0xff] %vm299_vm15, %v9908_v2 }
  0x1e   : > { %v9950_v14 = vsel %vm7945_vm10, 4294967295, %v9949_v14  ;;  %314 = vst.msk [vmem:[#allocation2 + $0x70] sm:$0xff] %vm299_vm15, %v9908_v2  ;;  %315 = vst.msk [vmem:[#allocation2 + $0x78] sm:$0xff] %vm299_vm15, %v9908_v2 }
  0x1f   : > { %9951 = vst [vmem:[#allocation4_spill] sm:$0xff] %v9950_v14  ;;  %316 = vst.msk [vmem:[#allocation2 + $0x80] sm:$0xff] %vm299_vm15, %v9908_v2 }
  0x20   : > { %317 = vst.msk [vmem:[#allocation2 + $0x88] sm:$0xff] %vm299_vm15, %v9908_v2  ;;  %318 = vst.msk [vmem:[#allocation2 + $0x90] sm:$0xff] %vm299_vm15, %v9908_v2 }
  0x21   : > { %7103 = vrot.lane.b32.xlu0 %v7102_v25, %s7767_s28  ;;  %7108 = vrot.lane.b32.xlu1 %v7107_v26, %s7770_s30  ;;  %v7983_v25 = vld [vmem:[%s7828_s26 + $0x4] sm:$0x1f]  ;;  %319 = vst.msk [vmem:[#allocation2 + $0x98] sm:$0xff] %vm299_vm15, %v9908_v2  ;;  %320 = vst.msk [vmem:[#allocation2 + $0xa0] sm:$0xff] %vm299_vm15, %v9908_v2 }
  0x22   : > { %v7986_v26 = vld [vmem:[%s7828_s26 + $0x5] sm:$0x1f]  ;;  %v997_v33 = vrot.slane %v7983_v25, 4  ;;  %321 = vst.msk [vmem:[#allocation2 + $0xa8] sm:$0xff] %vm299_vm15, %v9908_v2  ;;  %322 = vst.msk [vmem:[#allocation2 + $0xb0] sm:$0xff] %vm299_vm15, %v9908_v2 }
  0x23   : > { %v1057_v29 = vrot.slane %v7986_v26, 6  ;;  %323 = vst.msk [vmem:[#allocation2 + $0xb8] sm:$0xff] %vm299_vm15, %v9908_v2 }
  0x25   : > { %7113 = vrot.lane.b32.xlu0 %v7112_v27, %s7766_s27  ;;  %7118 = vrot.lane.b32.xlu1 %v7117_v28, %s7769_s29  ;;  %v7989_v27 = vld [vmem:[%s7828_s26 + $0x6] sm:$0x1f]  ;;  %v989_v28 = vrot.slane %v7983_v25, 6 }
  0x26   : > { %v1308_v46 = vrot.slane %v7989_v27, 4 }
  0x8b   : > { %v7094_v30 = vpop.permute.xlu1 %7093  ;;  %v7084_v31 = vpop.permute.xlu0 %7083 }
  0x8c   : > { %v7096_v34 = vunpack.i.h.bf16 %v7094_v30  ;;  %v7095_v35 = vunpack.i.l.bf16 %v7094_v30  ;;  %v7086_v36 = vunpack.i.h.bf16 %v7084_v31  ;;  %v7085_v37 = vunpack.i.l.bf16 %v7084_v31 }
  0x8d   : > { %v985_v30 = vrot.slane %v7983_v25, 3  ;;  %v1053_v31 = vrot.slane %v7986_v26, 3 }
  0x8e   : > { %v347_v52 = vsel %vm346_vm2, %v7831_v0, %v7085_v37  ;;  %v429_v54 = vsel %vm346_vm2, %v7834_v1, %v7086_v36  ;;  %v7907_v1 = vld [vmem:[%s9899_s2] sm:$0xff]  }
  0x8f   : > { %v7099_v38 = vpop.permute.xlu1 %7098  ;;  %v7089_v39 = vpop.permute.xlu0 %7088 }
  0x90   : > { %v7101_v40 = vunpack.i.h.bf16 %v7099_v38  ;;  %v7100_v41 = vunpack.i.l.bf16 %v7099_v38  ;;  %v7091_v42 = vunpack.i.h.bf16 %v7089_v39  ;;  %v7090_v43 = vunpack.i.l.bf16 %v7089_v39 }
  0x91   : > { %v7122_v38 = vpack.i.bf16 %v1053_v31, %v985_v30  ;;  %v1300_v39 = vrot.slane %v7989_v27, 6  ;;  %v8049_v30 = vld [vmem:[%s7828_s26 + $0xc] sm:$0x1f] }
  0x92   : > { %v353_v48 = vsel %vm352_vm1, %v7095_v35, %v7100_v41  ;;  %v432_v49 = vsel %vm352_vm1, %v7096_v34, %v7101_v40  ;;  %v349_v50 = vsel %vm348_vm3, %v7085_v37, %v7090_v43  ;;  %v430_v51 = vsel %vm348_vm3, %v7086_v36, %v7091_v42 }
  0x93   : > { %v351_v53 = vsel %vm350_vm4, %v349_v50, %v7095_v35  ;;  %v431_v55 = vsel %vm350_vm4, %v430_v51, %v7096_v34  ;;  %v355_v56 = vpack.c.bf16 %v7100_v41, %v353_v48  ;;  %v434_v57 = vpack.c.bf16 %v7101_v40, %v432_v49  ;;  %v7922_v4 = vpop.permute.xlu0 %7103  ;;  %v7924_v5 = vpop.permute.xlu1 %7108  ;;  %7123 = vrot.lane.b32.xlu0 %v7122_v38, %s7767_s28 }
  0x94   : > { %v354_v58 = vpack.c.bf16 %v351_v53, %v347_v52  ;;  %v433_v59 = vpack.c.bf16 %v431_v55, %v429_v54  ;;  %v7105_v6 = vunpack.i.l.bf16 %v7922_v4  ;;  %v7110_v7 = vunpack.i.l.bf16 %v7924_v5  ;;  %v8021_v52 = vld [vmem:[%s7828_s26 + $0x9] sm:$0x1f] }
  0x95   : > { %v368_v62 = vand.u32 %v7887_v60, %v355_v56  ;;  %v436_v63 = vand.u32 %v434_v57, %v7887_v60  ;;  %v1065_v34 = vrot.slane %v7986_v26, 4  ;;  %v993_v35 = vrot.slane %v7983_v25, 1 }
  0x96   : > { %6574 = vmatpush3.bf16.msra.mxu0 %v354_v58  ;;  %6582 = vmatpush3.bf16.msra.mxu1 %v433_v59  ;;  %v691_v11 = vsel %vm348_vm3, %v7105_v6, %v7110_v7  ;;  %v690_v17 = vsel %vm346_vm2, %v7855_v15, %v7105_v6  ;;  %v1061_v36 = vrot.slane %v7986_v26, 1  ;;  %v7127_v37 = vpack.i.bf16 %v1057_v29, %v989_v28 }
  0x97   : > { %6575 = vmatprep.subr.bf16.mxu0 %v9908_v2  ;;  %6583 = vmatprep.subr.bf16.mxu1 %v9908_v2  ;;  %v7928_v8 = vpop.permute.xlu0 %7113  ;;  %v7955_v19 = vpop.permute.xlu1 %7118  ;;  %v1368_v40 = vrot.slane %v7996_v32, 6  ;;  %v7137_v41 = vpack.i.bf16 %v1065_v34, %v997_v33  ;;  %v1296_v43 = vrot.slane %v7989_v27, 3  ;;  %v1376_v49 = vrot.slane %v7996_v32, 4 }
  0x98   : > { %v7115_v10 = vunpack.i.l.bf16 %v7928_v8  ;;  %v7120_v21 = vunpack.i.l.bf16 %v7955_v19  ;;  %7128 = vrot.lane.b32.xlu1 %v7127_v37, %s7770_s30  ;;  %v7132_v42 = vpack.i.bf16 %v1061_v36, %v993_v35  ;;  %v1304_v50 = vrot.slane %v7989_v27, 1  ;;  %v8057_v36 = vld [vmem:[%s7828_s26 + $0xd] sm:$0x1f] }
  0x99   : > { %v7147_v45 = vpack.i.bf16 %v1368_v40, %v1300_v39  ;;  %v7142_v48 = vpack.i.bf16 %v1364_v44, %v1296_v43  ;;  %v1372_v51 = vrot.slane %v7996_v32, 1  ;;  %v1611_v53 = vrot.slane %v8013_v47, 6 }
  0x9a   : > { %6576 = vmatpush3.bf16.msra.mxu0 %v368_v62  ;;  %6584 = vmatpush3.bf16.msra.mxu1 %v436_v63  ;;  %v692_v18 = vsel %vm350_vm4, %v691_v11, %v7115_v10  ;;  %v693_v15 = vsel %vm352_vm1, %v7115_v10, %v7120_v21  ;;  %v1679_v54 = vrot.slane %v8021_v52, 6  ;;  %v7157_v55 = vpack.i.bf16 %v1376_v49, %v1308_v46  ;;  %v8031_v63 = vld [vmem:[%s7828_s26 + $0xa] sm:$0x1f] }
  0x9b   : > { %6978 = vmatprep.subr.msk.bf16.mxu1 %vm7900_vm7, %v9906_v3  ;;  %6607 = vmatprep.subr.bf16.mxu0 %v9908_v2  ;;  %v694_v22 = vpack.c.bf16 %v692_v18, %v690_v17  ;;  %v695_v23 = vpack.c.bf16 %v7120_v21, %v693_v15  ;;  %v7152_v56 = vpack.i.bf16 %v1372_v51, %v1304_v50  ;;  %v1607_v57 = vrot.slane %v8013_v47, 3  ;;  %v8039_v17 = vld [vmem:[%s7828_s26 + $0xb] sm:$0x1f] }
  0x9c   : > { %7138 = vrot.lane.b32.xlu1 %v7137_v41, %s7769_s29  ;;  %7133 = vrot.lane.b32.xlu0 %v7132_v42, %s7766_s27  ;;  %v1675_v58 = vrot.slane %v8021_v52, 3  ;;  %v7167_v59 = vpack.i.bf16 %v1679_v54, %v1611_v53  ;;  %v1619_v62 = vrot.slane %v8013_v47, 4  ;;  %v1687_v7 = vrot.slane %v8021_v52, 4  ;;  %v2538_v46 = vld [vmem:[%s7828_s26 + $0xe] sm:$0x1f] }
  0x9d   : > { %6578 = vmatmul.mubr.msk.bf16.vlgmr.msra.gmra.mrb[0].mxu0 %vm361_vm8, %v7907_v1  ;;  %6586 = vmatmul.mubr.msk.bf16.vlgmr.msra.gmra.mrb[0].mxu1 %vm361_vm8, %v7907_v1  ;;  %v697_v24 = vand.u32 %v695_v23, %v7887_v60  ;;  %v1615_v10 = vrot.slane %v8013_v47, 1  ;;  %v1683_v11 = vrot.slane %v8021_v52, 1  ;;  %v1922_v18 = vrot.slane %v8031_v63, 6  ;;  %v2606_v53 = vld [vmem:[%s7828_s26 + $0xf] sm:$0x1f] }
  0x9e   : > { %6980 = vmatpush3.bf16.msk.msra.mxu1 %vm7900_vm7, %v9906_v3  ;;  %6611 = vmatprep.mubr.msk.bf16.mxu0 %vm7768_vm0, %v9908_v2  ;;  %v7162_v6 = vpack.i.bf16 %v1675_v58, %v1607_v57  ;;  %v1990_v21 = vrot.slane %v8039_v17, 6  ;;  %v7177_v15 = vpack.i.bf16 %v1687_v7, %v1619_v62  ;;  %v1918_v23 = vrot.slane %v8031_v63, 3  ;;  %v2849_v7 = vld [vmem:[%s7828_s26 + $0x10] sm:$0x1f] }
  0x9f   : > { %6593 = vmatprep.subr.msk.mxu1 %vm352_vm1, %v7939_v13  ;;  %6608 = vmatpush3.bf16.msra.mxu0 %v694_v22  ;;  %v7172_v22 = vpack.i.bf16 %v1683_v11, %v1615_v10  ;;  %v1930_v29 = vrot.slane %v8031_v63, 4  ;;  %v1998_v33 = vrot.slane %v8039_v17, 4  ;;  %v1926_v34 = vrot.slane %v8031_v63, 1 }
  0xa0   : > { %6609 = vmatprep.subr.bf16.mxu0 %v9908_v2  ;;  %7148 = vrot.lane.b32.xlu1 %v7147_v45, %s7770_s30  ;;  %v7187_v28 = vpack.i.bf16 %v1990_v21, %v1922_v18  ;;  %v1994_v35 = vrot.slane %v8039_v17, 1  ;;  %v9904_v37 = vmov 0   ;;  %v2233_v38 = vrot.slane %v8049_v30, 6 }
  0xa1   : > { %7143 = vrot.lane.b32.xlu0 %v7142_v48, %s7767_s28  ;;  %7283 = vset.pattern.permute.xlu1 %v9904_v37  ;;  %v2301_v39 = vrot.slane %v8057_v36, 6  ;;  %v7197_v40 = vpack.i.bf16 %v1998_v33, %v1930_v29  ;;  %v2229_v42 = vrot.slane %v8049_v30, 3  ;;  %v2297_v43 = vrot.slane %v8057_v36, 3 }
  0xa2   : > { %6594 = vmatpush3.msk.msra.mxu1 %vm352_vm1, %v7939_v13  ;;  %7282 = vset.pattern.permute.xlu0 %v9904_v37  ;;  %v7192_v41 = vpack.i.bf16 %v1994_v35, %v1926_v34  ;;  %v2241_v45 = vrot.slane %v8049_v30, 4  ;;  %v2309_v49 = vrot.slane %v8057_v36, 4  ;;  %v2237_v50 = vrot.slane %v8049_v30, 1  ;;  %v3160_v35 = vld [vmem:[%s7828_s26 + $0x12] sm:$0x1f] }
  0xa3   : > { %6982 = vmatprep.subr.msk.bf16.mxu1 %vm7959_vm12, %v9906_v3  ;;  %6610 = vmatpush3.bf16.msra.mxu0 %v697_v24  ;;  %v1986_v24 = vrot.slane %v8039_v17, 3  ;;  %v7207_v44 = vpack.i.bf16 %v2301_v39, %v2233_v38  ;;  %v7202_v48 = vpack.i.bf16 %v2297_v43, %v2229_v42  ;;  %v2305_v51 = vrot.slane %v8057_v36, 1  ;;  %v3228_v42 = vld [vmem:[%s7828_s26 + $0x13] sm:$0x1f] }
  0xa4   : > { %6986 = vmatprep.subr.msk.bf16.mxu0 %vm7900_vm7, %v9906_v3  ;;  %7158 = vrot.lane.b32.xlu1 %v7157_v55, %s7769_s29  ;;  %v2544_v54 = vrot.slane %v2538_v46, 6  ;;  %v2612_v55 = vrot.slane %v2606_v53, 6  ;;  %v2540_v58 = vrot.slane %v2538_v46, 3  ;;  %v2620_v11 = vrot.slane %v2606_v53, 4 }
  0xa5   : > { %7153 = vrot.lane.b32.xlu0 %v7152_v56, %s7766_s27  ;;  %v7182_v31 = vpack.i.bf16 %v1986_v24, %v1918_v23  ;;  %v7217_v56 = vpack.i.bf16 %v2309_v49, %v2241_v45  ;;  %v7212_v57 = vpack.i.bf16 %v2305_v51, %v2237_v50  ;;  %v2548_v18 = vrot.slane %v2538_v46, 1 }
  0xa6   : > { %6612 = vmatmul.mubr.msk.bf16.vlgmr.msra.gmra.mrb[4].mxu0 %vm361_vm8, %v7907_v1  ;;  %v7227_v62 = vpack.i.bf16 %v2612_v55, %v2544_v54  ;;  %v2616_v21 = vrot.slane %v2606_v53, 1  ;;  %v2851_v29 = vrot.slane %v2849_v7, 3  ;;  %v2863_v34 = vrot.slane %v2849_v7, 4 }
  0xa7   : > { %6988 = vmatpush3.bf16.msk.msra.mxu0 %vm7900_vm7, %v9906_v3  ;;  %v3166_v43 = vrot.slane %v3160_v35, 6  ;;  %v3230_v49 = vrot.slane %v3228_v42, 3  ;;  %v3174_v51 = vrot.slane %v3160_v35, 4  ;;  %v3242_v54 = vrot.slane %v3228_v42, 4 }
  0xa8   : > { %6627 = vmatprep.subr.msk.mxu0 %vm352_vm1, %v7939_v13  ;;  %7168 = vrot.lane.b32.xlu1 %v7167_v59, %s7770_s30  ;;  %v2608_v59 = vrot.slane %v2606_v53, 3  ;;  %v3170_v55 = vrot.slane %v3160_v35, 1 }
  0xa9   : > { %7163 = vrot.lane.b32.xlu0 %v7162_v6, %s7767_s28  ;;  %v2552_v6 = vrot.slane %v2538_v46, 4 }
  0xaa   : > { %v7222_v10 = vpack.i.bf16 %v2608_v59, %v2540_v58  ;;  %v327_v59 = vld [vmem:[%s9900_s3 + $0x8] sm:$0xff] }
  0xab   : > { %6628 = vmatpush3.msk.msra.mxu0 %vm352_vm1, %v7939_v13  ;;  %v7237_v24 = vpack.i.bf16 %v2620_v11, %v2552_v6  ;;  %v7106_v6 = vunpack.i.h.bf16 %v7922_v4 }
  0xac   : > { %6641 = vmatprep.subr.bf16.mxu0 %v9908_v2  ;;  %7178 = vrot.lane.b32.xlu1 %v7177_v15, %s7769_s29  ;;  %v2917_v15 = vld [vmem:[%s7828_s26 + $0x11] sm:$0x1f] }
  0xad   : > { %7173 = vrot.lane.b32.xlu0 %v7172_v22, %s7766_s27  ;;  %v2855_v22 = vrot.slane %v2849_v7, 6  ;;  %v2923_v23 = vrot.slane %v2917_v15, 6  ;;  %v2931_v39 = vrot.slane %v2917_v15, 4 }
  0xaf   : > { %v7247_v33 = vpack.i.bf16 %v2923_v23, %v2855_v22  ;;  %v7257_v45 = vpack.i.bf16 %v2931_v39, %v2863_v34 }
  0xb0   : > { %7188 = vrot.lane.b32.xlu1 %v7187_v28, %s7770_s30  ;;  %v7232_v28 = vpack.i.bf16 %v2616_v21, %v2548_v18 }
  0xb1   : > { %7183 = vrot.lane.b32.xlu0 %v7182_v31, %s7767_s28  ;;  %v2919_v31 = vrot.slane %v2917_v15, 3 }
  0xb3   : > { %v7242_v38 = vpack.i.bf16 %v2919_v31, %v2851_v29 }
  0xb4   : > { %7198 = vrot.lane.b32.xlu1 %v7197_v40, %s7769_s29  ;;  %v2859_v40 = vrot.slane %v2849_v7, 1  ;;  %v7111_v7 = vunpack.i.h.bf16 %v7924_v5  ;;  %v8111_v5 = vsel %vm292_vm13, 1.0, %v9908_v2 }
  0xb5   : > { %7193 = vrot.lane.b32.xlu0 %v7192_v41, %s7766_s27  ;;  %v2927_v41 = vrot.slane %v2917_v15, 1 }
  0xb6   : > { %v759_v4 = vsel %vm348_vm3, %v7106_v6, %v7111_v7 }
  0xb7   : > { %v7252_v46 = vpack.i.bf16 %v2927_v41, %v2859_v40 }
  0xb8   : > { %7208 = vrot.lane.b32.xlu1 %v7207_v44, %s7770_s30  ;;  %v3234_v44 = vrot.slane %v3228_v42, 6 }
  0xb9   : > { %7203 = vrot.lane.b32.xlu0 %v7202_v48, %s7767_s28  ;;  %v3162_v48 = vrot.slane %v3160_v35, 3 }
  0xba   : > { %v7267_v50 = vpack.i.bf16 %v3234_v44, %v3166_v43 }
  0xbb   : > { %v7262_v53 = vpack.i.bf16 %v3230_v49, %v3162_v48 }
  0xbc   : > { %7218 = vrot.lane.b32.xlu1 %v7217_v56, %s7769_s29  ;;  %v3238_v56 = vrot.slane %v3228_v42, 1 }
  0xbd   : > { %7213 = vrot.lane.b32.xlu0 %v7212_v57, %s7766_s27  ;;  %v7277_v57 = vpack.i.bf16 %v3242_v54, %v3174_v51 }
  0xbe   : > { %v7272_v58 = vpack.i.bf16 %v3238_v56, %v3170_v55 }
  0xc0   : > { %7228 = vrot.lane.b32.xlu1 %v7227_v62, %s7770_s30  ;;  %v326_v62 = vld [vmem:[%s9900_s3] sm:$0xff] }
  0xc1   : > { %7223 = vrot.lane.b32.xlu0 %v7222_v10, %s7767_s28 }
  0xc4   : > { %7238 = vrot.lane.b32.xlu1 %v7237_v24, %s7769_s29  ;;  %v7116_v24 = vunpack.i.h.bf16 %v7928_v8  ;;  %v758_v8 = vsel %vm346_vm2, %v7858_v16, %v7106_v6 }
  0xc5   : > { %7233 = vrot.lane.b32.xlu0 %v7232_v28, %s7766_s27 }
  0xc8   : > { %7248 = vrot.lane.b32.xlu1 %v7247_v33, %s7770_s30  ;;  %v7121_v33 = vunpack.i.h.bf16 %v7955_v19  ;;  %v760_v19 = vsel %vm350_vm4, %v759_v4, %v7116_v24 }
  0xc9   : > { %7243 = vrot.lane.b32.xlu0 %v7242_v38, %s7767_s28  ;;  %v762_v12 = vpack.c.bf16 %v760_v19, %v758_v8 }
  0xca   : > { %v761_v34 = vsel %vm352_vm1, %v7116_v24, %v7121_v33 }
  0xcb   : > { %v763_v9 = vpack.c.bf16 %v7121_v33, %v761_v34 }
  0xcc   : > { %7258 = vrot.lane.b32.xlu1 %v7257_v45, %s7769_s29 }
  0xcd   : > { %7253 = vrot.lane.b32.xlu0 %v7252_v46, %s7766_s27  ;;  %v765_v16 = vand.u32 %v763_v9, %v7887_v60 }
  0xd0   : > { %7268 = vrot.lane.b32.xlu1 %v7267_v50, %s7770_s30 }
  0xd1   : > { %7263 = vrot.lane.b32.xlu0 %v7262_v53, %s7767_s28 }
  0xd4   : > { %7278 = vrot.lane.b32.xlu1 %v7277_v57, %s7769_s29 }
  0xd5   : > { %7273 = vrot.lane.b32.xlu0 %v7272_v58, %s7766_s27 }
  0xd8   : > { %653 = vperm.xlu1 %7283, %v327_v59  }
  0xd9   : > { %648 = vperm.xlu0 %7282, %v326_v62  }
 0x105   : > { %v7124_v44 = vpop.permute.xlu0 %7123 }
 0x106   : > { %v7126_v51 = vunpack.i.h.bf16 %v7124_v44  ;;  %v7125_v53 = vunpack.i.l.bf16 %v7124_v44 }
 0x10a   : > { %v7129_v43 = vpop.permute.xlu1 %7128 }
 0x10b   : > { %v7131_v46 = vunpack.i.h.bf16 %v7129_v43  ;;  %v7130_v50 = vunpack.i.l.bf16 %v7129_v43 }
 0x10d   : > { %v1070_v6 = vsel %vm348_vm3, %v7126_v51, %v7131_v46  ;;  %v1002_v7 = vsel %vm348_vm3, %v7125_v53, %v7130_v50 }
 0x10e   : > { %v7139_v55 = vpop.permute.xlu1 %7138  ;;  %v7134_v57 = vpop.permute.xlu0 %7133 }
 0x10f   : > { %v7141_v56 = vunpack.i.h.bf16 %v7139_v55  ;;  %v7140_v58 = vunpack.i.l.bf16 %v7139_v55  ;;  %v7136_v59 = vunpack.i.h.bf16 %v7134_v57  ;;  %v7135_v62 = vunpack.i.l.bf16 %v7134_v57 }
 0x112   : > { %v7149_v9 = vpop.permute.xlu1 %7148 }
 0x113   : > { %v7150_v44 = vunpack.i.l.bf16 %v7149_v9 }
 0x170   : > { %v404_v10 = vpop.f32.mrb[0].mxu0  ;;  %v472_v11 = vpop.f32.mrb[0].mxu1 }
 0x171   : > { %v479_v18 = vmax.f32 %v404_v10, %v472_v11  ;;  %v6579_v21 = vpop.f32.mrb[1].mxu0  ;;  %v6587_v15 = vpop.f32.mrb[1].mxu1  ;;  %v1069_v10 = vsel %vm346_vm2, %v7986_v26, %v7126_v51  ;;  %v1001_v11 = vsel %vm346_vm2, %v7983_v25, %v7125_v53 }
 0x172   : > { %v407_v22 = vpop.f32.mrb[2].mxu0  ;;  %v475_v23 = vpop.f32.mrb[2].mxu1  ;;  %v1003_v15 = vsel %vm350_vm4, %v1002_v7, %v7135_v62 }
 0x173   : > { %v480_v28 = vmax.f32 %v407_v22, %v475_v23  ;;  %v6580_v29 = vpop.f32.mrb[3].mxu0  ;;  %v6588_v31 = vpop.f32.mrb[3].mxu1  ;;  %6595 = vmatprep.mubr.msk.f32.mxu1 %vm481_vm14, %v479_v18  ;;  %v1004_v22 = vsel %vm352_vm1, %v7135_v62, %v7140_v58  ;;  %v1071_v23 = vsel %vm350_vm4, %v1070_v6, %v7136_v59  ;;  %v1005_v4 = vpack.c.bf16 %v1003_v15, %v1001_v11 }
 0x174   : > { %v1006_v25 = vpack.c.bf16 %v7140_v58, %v1004_v22  ;;  %v1073_v8 = vpack.c.bf16 %v1071_v23, %v1069_v10  ;;  %v7159_v53 = vpop.permute.xlu1 %7158 }
 0x175   : > { %6596 = vmatmul.mubr.msk.f32.vlgmr.msra.gmra.mrb[4].mxu1 %vm481_vm14, %v480_v28  ;;  %v7161_v55 = vunpack.i.h.bf16 %v7159_v53  ;;  %v7160_v57 = vunpack.i.l.bf16 %v7159_v53 }
 0x176   : > { %6984 = vmatpush3.bf16.msk.msra.mxu1 %vm7959_vm12, %v9906_v3  ;;  %6604 = vmatprep.mubr.msk.f32.mxu1 %vm481_vm14, %v479_v18  ;;  %v1072_v18 = vsel %vm352_vm1, %v7136_v59, %v7141_v56  ;;  %v1008_v19 = vand.u32 %v1006_v25, %v7887_v60 }
 0x177   : > { %6602 = vmatprep.subr.msk.mxu1 %vm352_vm1, %v8111_v5  ;;  %v1074_v26 = vpack.c.bf16 %v7141_v56, %v1072_v18 }
 0x179   : > { %v733_v35 = vpop.f32.mrb[4].mxu0  ;;  %v1076_v34 = vand.u32 %v1074_v26, %v7887_v60 }
 0x17a   : > { %6603 = vmatpush3.msk.msra.mxu1 %vm352_vm1, %v8111_v5  ;;  %v6613_v38 = vpop.f32.mrb[5].mxu0 }
 0x17b   : > { %6605 = vmatmul.mubr.msk.f32.vlgmr.msra.gmra.mrb[6].mxu1 %vm481_vm14, %v480_v28  ;;  %6615 = vmatprep.subr.bf16.mxu1 %v9908_v2  ;;  %v736_v39 = vpop.f32.mrb[6].mxu0  ;;  %v7151_v38 = vunpack.i.h.bf16 %v7149_v9 }
 0x17c   : > { %6616 = vmatpush3.bf16.msra.mxu1 %v762_v12  ;;  %6619 = vmatprep.mubr.msk.bf16.mxu1 %vm7768_vm0, %v9908_v2  ;;  %v6614_v40 = vpop.f32.mrb[7].mxu0  ;;  %v7144_v12 = vpop.permute.xlu0 %7143 }
 0x17d   : > { %6617 = vmatprep.subr.bf16.mxu1 %v9908_v2  ;;  %v7146_v46 = vunpack.i.h.bf16 %v7144_v12  ;;  %v7145_v50 = vunpack.i.l.bf16 %v7144_v12  ;;  %v7169_v12 = vpop.permute.xlu1 %7168 }
 0x17f   : > { %v1381_v62 = vsel %vm348_vm3, %v7146_v46, %v7151_v38  ;;  %v1313_v6 = vsel %vm348_vm3, %v7145_v50, %v7150_v44  ;;  %v1380_v7 = vsel %vm346_vm2, %v7996_v32, %v7146_v46  ;;  %v1312_v10 = vsel %vm346_vm2, %v7989_v27, %v7145_v50 }
 0x180   : > { %6618 = vmatpush3.bf16.msra.mxu1 %v765_v16  ;;  %v7154_v56 = vpop.permute.xlu0 %7153 }
 0x181   : > { %6990 = vmatprep.subr.msk.bf16.mxu1 %vm7959_vm12, %v9906_v3  ;;  %v7156_v58 = vunpack.i.h.bf16 %v7154_v56  ;;  %v7155_v59 = vunpack.i.l.bf16 %v7154_v56  ;;  %v8313_v44 = vpop.permute.xlu1 %7178 }
 0x182   : > { %v7181_v51 = vunpack.i.h.bf16 %v8313_v44  ;;  %v7180_v48 = vunpack.i.l.bf16 %v8313_v44 }
 0x183   : > { %6620 = vmatmul.mubr.msk.bf16.vlgmr.msra.gmra.mrb[8].mxu1 %vm361_vm8, %v7907_v1  ;;  %v1383_v11 = vsel %vm352_vm1, %v7156_v58, %v7161_v55  ;;  %v1314_v15 = vsel %vm350_vm4, %v1313_v6, %v7155_v59  ;;  %v1315_v22 = vsel %vm352_vm1, %v7155_v59, %v7160_v57  ;;  %v1382_v23 = vsel %vm350_vm4, %v1381_v62, %v7156_v58 }
 0x184   : > { %6992 = vmatpush3.bf16.msk.msra.mxu1 %vm7959_vm12, %v9906_v3  ;;  %v1385_v27 = vpack.c.bf16 %v7161_v55, %v1383_v11  ;;  %v7164_v38 = vpop.permute.xlu0 %7163 }
 0x185   : > { %6636 = vmatprep.subr.msk.mxu1 %vm352_vm1, %v8111_v5  ;;  %v8315_v50 = vpop.permute.xlu1 %7188 }
 0x186   : > { %v1387_v9 = vand.u32 %v1385_v27, %v7887_v60 }
 0x188   : > { %6637 = vmatpush3.msk.msra.mxu1 %vm352_vm1, %v8111_v5  ;;  %v7174_v46 = vpop.permute.xlu0 %7173 }
 0x189   : > { %6649 = vmatprep.subr.bf16.mxu1 %v9908_v2  ;;  %v8319_v55 = vpop.permute.xlu1 %7198 }
 0x18c   : > { %v8317_v53 = vpop.permute.xlu0 %7183 }
 0x190   : > { %v8321_v56 = vpop.permute.xlu0 %7193 }
 0x194   : > { %v8325_v58 = vpop.permute.xlu0 %7203 }
 0x198   : > { %v8329_v62 = vpop.permute.xlu0 %7213 }
 0x248   : > { %v8145_v41 = vpop.f32.mrb[4].mxu1 }
 0x249   : > { %v8147_v42 = vpop.f32.mrb[5].mxu1 }
 0x24e   : > { %v8149_v45 = vpop.f32.mrb[6].mxu1 }
 0x24f   : > { %v8153_v49 = vpop.f32.mrb[7].mxu1 }
 0x256   : > { %v801_v21 = vpop.f32.mrb[8].mxu1 }
 0x257   : > { %v808_v24 = vmax.f32 %v733_v35, %v801_v21  ;;  %v6621_v28 = vpop.f32.mrb[9].mxu1 }
 0x258   : > { %v804_v29 = vpop.f32.mrb[10].mxu1 }
 0x259   : > { %v809_v31 = vmax.f32 %v736_v39, %v804_v29  ;;  %v6622_v33 = vpop.f32.mrb[11].mxu1  ;;  %6629 = vmatprep.mubr.msk.f32.mxu0 %vm481_vm14, %v808_v24  ;;  %6638 = vmatprep.mubr.msk.f32.mxu1 %vm481_vm14, %v808_v24 }
 0x25b   : > { %6630 = vmatmul.mubr.msk.f32.vlgmr.msra.gmra.mrb[8].mxu0 %vm481_vm14, %v809_v31  ;;  %6639 = vmatmul.mubr.msk.f32.vlgmr.msra.gmra.mrb[12].mxu1 %vm481_vm14, %v809_v31 }
 0x25c   : > { %6642 = vmatpush3.bf16.msra.mxu0 %v1005_v4  ;;  %6650 = vmatpush3.bf16.msra.mxu1 %v1073_v8  ;;  %v1317_v4 = vpack.c.bf16 %v7160_v57, %v1315_v22  ;;  %v1316_v8 = vpack.c.bf16 %v1314_v15, %v1312_v10  ;;  %v8323_v57 = vpop.permute.xlu1 %7208 }
 0x25d   : > { %6643 = vmatprep.subr.bf16.mxu0 %v9908_v2  ;;  %6651 = vmatprep.subr.bf16.mxu1 %v9908_v2 }
 0x25e   : > { %6645 = vmatprep.mubr.msk.bf16.mxu0 %vm7768_vm0, %v9908_v2  ;;  %6653 = vmatprep.mubr.msk.bf16.mxu1 %vm7768_vm0, %v9908_v2 }
 0x260   : > { %6644 = vmatpush3.bf16.msra.mxu0 %v1008_v19  ;;  %6652 = vmatpush3.bf16.msra.mxu1 %v1076_v34  ;;  %v1384_v19 = vpack.c.bf16 %v1382_v23, %v1380_v7  ;;  %v1319_v34 = vand.u32 %v1317_v4, %v7887_v60  ;;  %v8327_v59 = vpop.permute.xlu1 %7218  ;;  %v8333_v7 = vpop.permute.xlu0 %7223  ;;  %v7170_v4 = vunpack.i.l.bf16 %v7169_v12 }
 0x261   : > { %6994 = vmatprep.subr.msk.bf16.mxu0 %vm7900_vm7, %v9906_v3  ;;  %6998 = vmatprep.subr.msk.bf16.mxu1 %vm7959_vm12, %v9906_v3 }
 0x263   : > { %6646 = vmatmul.mubr.msk.bf16.vlgmr.msra.gmra.mrb[12].mxu0 %vm361_vm8, %v7907_v1  ;;  %6654 = vmatmul.mubr.msk.bf16.vlgmr.msra.gmra.mrb[16].mxu1 %vm361_vm8, %v7907_v1 }
 0x264   : > { %6996 = vmatpush3.bf16.msk.msra.mxu0 %vm7900_vm7, %v9906_v3  ;;  %7000 = vmatpush3.bf16.msk.msra.mxu1 %vm7959_vm12, %v9906_v3  ;;  %v8331_v6 = vpop.permute.xlu1 %7228  ;;  %v8337_v11 = vpop.permute.xlu0 %7233 }
 0x265   : > { %6661 = vmatprep.subr.msk.mxu0 %vm352_vm1, %v7939_v13  ;;  %6670 = vmatprep.subr.msk.mxu1 %vm352_vm1, %v8111_v5 }
 0x268   : > { %6662 = vmatpush3.msk.msra.mxu0 %vm352_vm1, %v7939_v13  ;;  %6671 = vmatpush3.msk.msra.mxu1 %vm352_vm1, %v8111_v5  ;;  %v8335_v10 = vpop.permute.xlu1 %7238 }
 0x269   : > { %6675 = vmatprep.subr.bf16.mxu0 %v9908_v2  ;;  %6683 = vmatprep.subr.bf16.mxu1 %v9908_v2 }
 0x32e   : > { %v8205_v16 = vpop.f32.mrb[8].mxu0  ;;  %v8207_v35 = vpop.f32.mrb[12].mxu1 }
 0x32f   : > { %v8211_v40 = vpop.f32.mrb[9].mxu0  ;;  %v8213_v43 = vpop.f32.mrb[13].mxu1 }
 0x336   : > { %v1044_v18 = vpop.f32.mrb[12].mxu0  ;;  %v1112_v21 = vpop.f32.mrb[16].mxu1 }
 0x337   : > { %v1119_v24 = vmax.f32 %v1044_v18, %v1112_v21  ;;  %v6647_v28 = vpop.f32.mrb[13].mxu0  ;;  %v6655_v29 = vpop.f32.mrb[17].mxu1 }
 0x338   : > { %v1047_v31 = vpop.f32.mrb[14].mxu0  ;;  %v1115_v33 = vpop.f32.mrb[18].mxu1 }
 0x339   : > { %v1120_v26 = vmax.f32 %v1047_v31, %v1115_v33  ;;  %v6648_v32 = vpop.f32.mrb[15].mxu0  ;;  %v6656_v25 = vpop.f32.mrb[19].mxu1  ;;  %6663 = vmatprep.mubr.msk.f32.mxu0 %vm481_vm14, %v1119_v24  ;;  %6672 = vmatprep.mubr.msk.f32.mxu1 %vm481_vm14, %v1119_v24 }
 0x33a   : > { %v8339_v18 = vpop.permute.xlu1 %7248  ;;  %v8341_v21 = vpop.permute.xlu0 %7243 }
 0x33b   : > { %6664 = vmatmul.mubr.msk.f32.vlgmr.msra.gmra.mrb[10].mxu0 %vm481_vm14, %v1120_v26  ;;  %6673 = vmatmul.mubr.msk.f32.vlgmr.msra.gmra.mrb[14].mxu1 %vm481_vm14, %v1120_v26  ;;  %v7171_v26 = vunpack.i.h.bf16 %v7169_v12 }
 0x33c   : > { %6676 = vmatpush3.bf16.msra.mxu0 %v1316_v8  ;;  %6684 = vmatpush3.bf16.msra.mxu1 %v1384_v19  ;;  %v7166_v8 = vunpack.i.h.bf16 %v7164_v38  ;;  %v7165_v19 = vunpack.i.l.bf16 %v7164_v38 }
 0x33d   : > { %6677 = vmatprep.subr.bf16.mxu0 %v9908_v2  ;;  %6685 = vmatprep.subr.bf16.mxu1 %v9908_v2 }
 0x33e   : > { %6679 = vmatprep.mubr.msk.bf16.mxu0 %vm7768_vm0, %v9908_v2  ;;  %6687 = vmatprep.mubr.msk.bf16.mxu1 %vm7768_vm0, %v9908_v2  ;;  %v8343_v15 = vpop.permute.xlu1 %7258  ;;  %v8345_v22 = vpop.permute.xlu0 %7253  ;;  %v1692_v12 = vsel %vm348_vm3, %v7166_v8, %v7171_v26  ;;  %v1624_v38 = vsel %vm348_vm3, %v7165_v19, %v7170_v4 }
 0x340   : > { %6678 = vmatpush3.bf16.msra.mxu0 %v1319_v34  ;;  %6686 = vmatpush3.bf16.msra.mxu1 %v1387_v9 }
 0x341   : > { %7002 = vmatprep.subr.msk.bf16.mxu0 %vm7900_vm7, %v9906_v3  ;;  %7006 = vmatprep.subr.msk.bf16.mxu1 %vm7959_vm12, %v9906_v3 }
 0x342   : > { %v8347_v23 = vpop.permute.xlu1 %7268  ;;  %v8349_v24 = vpop.permute.xlu0 %7263 }
 0x343   : > { %6680 = vmatmul.mubr.msk.bf16.vlgmr.msra.gmra.mrb[16].mxu0 %vm361_vm8, %v7907_v1  ;;  %6688 = vmatmul.mubr.msk.bf16.vlgmr.msra.gmra.mrb[20].mxu1 %vm361_vm8, %v7907_v1 }
 0x344   : > { %7004 = vmatpush3.bf16.msk.msra.mxu0 %vm7900_vm7, %v9906_v3  ;;  %7008 = vmatpush3.bf16.msk.msra.mxu1 %vm7959_vm12, %v9906_v3  ;;  %v7176_v3 = vunpack.i.h.bf16 %v7174_v46 }
 0x345   : > { %6695 = vmatprep.subr.msk.mxu0 %vm352_vm1, %v7939_v13  ;;  %6704 = vmatprep.subr.msk.mxu1 %vm352_vm1, %v8111_v5 }
 0x346   : > { %v8351_v28 = vpop.permute.xlu1 %7278  ;;  %v8353_v29 = vpop.permute.xlu0 %7273 }
 0x347   : > { %9954 = vst [vmem:[#allocation5_spill] sm:$0xff] %v8353_v29 }
 0x348   : > { %6696 = vmatpush3.msk.msra.mxu0 %vm352_vm1, %v7939_v13  ;;  %6705 = vmatpush3.msk.msra.mxu1 %vm352_vm1, %v8111_v5 }
 0x349   : > { %6709 = vmatprep.subr.bf16.mxu0 %v9908_v2  ;;  %6717 = vmatprep.subr.bf16.mxu1 %v9908_v2 }
 0x34a   : > { %v8355_v34 = vpop.permute.xlu1 %653  ;;  %v8357_v37 = vpop.permute.xlu0 %648 }
 0x40e   : > { %v6665_v31 = vpop.f32.mrb[10].mxu0  ;;  %v6674_v33 = vpop.f32.mrb[14].mxu1 }
 0x40f   : > { %v1278_v32 = vmax.f32 %v6665_v31, %v6674_v33  ;;  %v1193_v25 = vpop.f32.mrb[11].mxu0  ;;  %v1268_v27 = vpop.f32.mrb[15].mxu1  ;;  %v7175_v31 = vunpack.i.l.bf16 %v7174_v46 }
 0x410   : > { %v1277_v9 = vmax.f32 %v1193_v25, %v1268_v27  ;;  %v1623_v25 = vsel %vm346_vm2, %v8013_v47, %v7165_v19  ;;  %v1694_v27 = vsel %vm352_vm1, %v7176_v3, %v7181_v51 }
 0x411   : > { %v1280_v39 = vadd.f32 %v1278_v32, %v8355_v34  ;;  %v1691_v32 = vsel %vm346_vm2, %v8021_v52, %v7166_v8  ;;  %v1626_v46 = vsel %vm352_vm1, %v7175_v31, %v7180_v48  ;;  %v1696_v19 = vpack.c.bf16 %v7181_v51, %v1694_v27 }
 0x412   : > { %v1279_v54 = vadd.f32 %v1277_v9, %v8357_v37 }
 0x413   : > { %v1282_v33 = vmax.f32 %v1280_v39, 0.0  ;;  %v1625_v39 = vsel %vm350_vm4, %v1624_v38, %v7175_v31 }
 0x414   : > { %v1281_v2 = vmax.f32 %v1279_v54, 0.0  ;;  %v1693_v54 = vsel %vm350_vm4, %v1692_v12, %v7176_v3  ;;  %v1627_v29 = vpack.c.bf16 %v1625_v39, %v1623_v25  ;;  %v9955_v3 = vmov 0.0  }
 0x415   : > { %1287 = vrot.lane.b32.xlu0 %v1282_v33, %s7774_s13  ;;  %v1695_v38 = vpack.c.bf16 %v1693_v54, %v1691_v32  ;;  %v7190_v54 = vunpack.i.l.bf16 %v8315_v50 }
 0x416   : > { %v1423_v44 = vpop.f32.mrb[20].mxu1  ;;  %v1355_v9 = vpop.f32.mrb[16].mxu0  ;;  %1285 = vrot.lane.b32.xlu1 %v1281_v2, %s7774_s13  ;;  %v1628_v2 = vpack.c.bf16 %v7180_v48, %v1626_v46  ;;  %v9956_v48 = vmov 1.0|1.0  }
 0x417   : > { %v1430_v26 = vmax.f32 %v1355_v9, %v1423_v44  ;;  %v6681_v4 = vpop.f32.mrb[17].mxu0  ;;  %v6689_v33 = vpop.f32.mrb[21].mxu1  ;;  %v7191_v44 = vunpack.i.h.bf16 %v8315_v50 }
 0x418   : > { %v1358_v14 = vpop.f32.mrb[18].mxu0  ;;  %v1426_v52 = vpop.f32.mrb[22].mxu1  ;;  %v7185_v4 = vunpack.i.l.bf16 %v8317_v53 }
 0x419   : > { %v1431_v8 = vmax.f32 %v1358_v14, %v1426_v52  ;;  %v6682_v61 = vpop.f32.mrb[19].mxu0  ;;  %v6690_v47 = vpop.f32.mrb[23].mxu1  ;;  %6697 = vmatprep.mubr.msk.f32.mxu0 %vm481_vm14, %v1430_v26  ;;  %6706 = vmatprep.mubr.msk.f32.mxu1 %vm481_vm14, %v1430_v26  ;;  %v1698_v14 = vand.u32 %v1696_v19, %v7887_v60  ;;  %v7186_v26 = vunpack.i.h.bf16 %v8317_v53  ;;  %v7200_v19 = vunpack.i.l.bf16 %v8319_v55 }
 0x41a   : > { %v1630_v61 = vand.u32 %v1628_v2, %v7887_v60  ;;  %v7196_v2 = vunpack.i.h.bf16 %v8321_v56 }
 0x41b   : > { %6698 = vmatmul.mubr.msk.f32.vlgmr.msra.gmra.mrb[20].mxu0 %vm481_vm14, %v1431_v8  ;;  %6707 = vmatmul.mubr.msk.f32.vlgmr.msra.gmra.mrb[24].mxu1 %vm481_vm14, %v1431_v8  ;;  %v7201_v8 = vunpack.i.h.bf16 %v8319_v55  ;;  %v2003_v50 = vsel %vm348_vm3, %v7186_v26, %v7191_v44  ;;  %v2002_v53 = vsel %vm346_vm2, %v8039_v17, %v7186_v26 }
 0x41c   : > { %6710 = vmatpush3.bf16.msra.mxu0 %v1627_v29  ;;  %6718 = vmatpush3.bf16.msra.mxu1 %v1695_v38  ;;  %v7195_v38 = vunpack.i.l.bf16 %v8321_v56 }
 0x41d   : > { %6711 = vmatprep.subr.bf16.mxu0 %v9955_v3  ;;  %6719 = vmatprep.subr.bf16.mxu1 %v9955_v3  ;;  %v2005_v55 = vsel %vm352_vm1, %v7196_v2, %v7201_v8 }
 0x41e   : > { %6713 = vmatprep.mubr.msk.bf16.mxu0 %vm7768_vm0, %v9955_v3  ;;  %6721 = vmatprep.mubr.msk.bf16.mxu1 %vm7768_vm0, %v9955_v3 }
 0x420   : > { %6712 = vmatpush3.bf16.msra.mxu0 %v1630_v61  ;;  %6720 = vmatpush3.bf16.msra.mxu1 %v1698_v14  ;;  %v1935_v14 = vsel %vm348_vm3, %v7185_v4, %v7190_v54 }
 0x421   : > { %7010 = vmatprep.subr.msk.bf16.mxu0 %vm7900_vm7, %v9956_v48  ;;  %7014 = vmatprep.subr.msk.bf16.mxu1 %vm7959_vm12, %v9956_v48  ;;  %v1936_v56 = vsel %vm350_vm4, %v1935_v14, %v7195_v38 }
 0x423   : > { %6714 = vmatmul.mubr.msk.bf16.vlgmr.msra.gmra.mrb[24].mxu0 %vm361_vm8, %v7907_v1  ;;  %6722 = vmatmul.mubr.msk.bf16.vlgmr.msra.gmra.mrb[28].mxu1 %vm361_vm8, %v7907_v1 }
 0x424   : > { %7012 = vmatpush3.bf16.msk.msra.mxu0 %vm7900_vm7, %v9956_v48  ;;  %7016 = vmatpush3.bf16.msk.msra.mxu1 %vm7959_vm12, %v9956_v48 }
 0x425   : > { %6729 = vmatprep.subr.msk.mxu0 %vm352_vm1, %v7939_v13  ;;  %6738 = vmatprep.subr.msk.mxu1 %vm352_vm1, %v8111_v5 }
 0x428   : > { %6730 = vmatpush3.msk.msra.mxu0 %vm352_vm1, %v7939_v13  ;;  %6739 = vmatpush3.msk.msra.mxu1 %vm352_vm1, %v8111_v5 }
 0x429   : > { %6743 = vmatprep.subr.bf16.mxu0 %v9955_v3  ;;  %6751 = vmatprep.subr.bf16.mxu1 %v9955_v3 }
 0x487   : > { %v1288_v1 = vpop.permute.xlu0 %1287 }
 0x488   : > { %1293 = vst.msk [vmem:[#allocation2 + $0x38] sm:$0xff] %vm669_vm6, %v1288_v1  ;;  %v1286_v51 = vpop.permute.xlu1 %1285 }
 0x489   : > { %1292 = vst.msk [vmem:[#allocation2 + $0x30] sm:$0xff] %vm669_vm6, %v1286_v51  ;;  %v1934_v51 = vsel %vm346_vm2, %v8031_v63, %v7185_v4  ;;  %v2007_v4 = vpack.c.bf16 %v7201_v8, %v2005_v55  ;;  %v8462_v8 = vld [vmem:[%s9899_s2] sm:$0xff]   ;;  %v7206_v55 = vunpack.i.h.bf16 %v8325_v58 }
 0x48f   : > { %v3494_v29 = vld [vmem:[#allocation2 + $0x38] sm:$0xff] }
 0x490   : > { %v3493_v31 = vld [vmem:[#allocation2 + $0x30] sm:$0xff] }
 0x491   : > { %v8415_v12 = vpack.i.bf16 %v3494_v29, %v3493_v31  ;;  %v8417_v32 = vpack.c.bf16 %v3494_v29, %v3493_v31 }
 0x493   : > { %9957 = vst [vmem:[#allocation6_spill] sm:$0xff] %v8417_v32 }
 0x4ee   : > { %v6699_v25 = vpop.f32.mrb[20].mxu0  ;;  %v6708_v27 = vpop.f32.mrb[24].mxu1 }
 0x4ef   : > { %v1589_v9 = vmax.f32 %v6699_v25, %v6708_v27  ;;  %v1504_v39 = vpop.f32.mrb[21].mxu0  ;;  %v1579_v46 = vpop.f32.mrb[25].mxu1  ;;  %v1937_v25 = vsel %vm352_vm1, %v7195_v38, %v7200_v19  ;;  %v2004_v27 = vsel %vm350_vm4, %v2003_v50, %v7196_v2  ;;  %v2009_v38 = vand.u32 %v2007_v4, %v7887_v60 }
 0x4f0   : > { %v1588_v33 = vmax.f32 %v1504_v39, %v1579_v46  ;;  %v7216_v4 = vunpack.i.h.bf16 %v8329_v62 }
 0x4f1   : > { %v1591_v52 = vadd.f32 %v1589_v9, %v8355_v34 }
 0x4f2   : > { %v1590_v47 = vadd.f32 %v1588_v33, %v8357_v37  ;;  %v1939_v33 = vpack.c.bf16 %v7200_v19, %v1937_v25 }
 0x4f3   : > { %v1593_v61 = vmax.f32 %v1591_v52, 0.0  ;;  %v1938_v52 = vpack.c.bf16 %v1936_v56, %v1934_v51  ;;  %v7211_v51 = vunpack.i.h.bf16 %v8323_v57 }
 0x4f4   : > { %v1592_v1 = vmax.f32 %v1590_v47, 0.0  ;;  %v2006_v47 = vpack.c.bf16 %v2004_v27, %v2002_v53  ;;  %v1941_v2 = vand.u32 %v1939_v33, %v7887_v60  ;;  %v7215_v33 = vunpack.i.l.bf16 %v8329_v62 }
 0x4f5   : > { %1598 = vrot.lane.b32.xlu0 %v1593_v61, %s7774_s13 }
 0x4f6   : > { %v1734_v29 = vpop.f32.mrb[28].mxu1  ;;  %v1666_v31 = vpop.f32.mrb[24].mxu0  ;;  %1596 = vrot.lane.b32.xlu1 %v1592_v1, %s7774_s13 }
 0x4f7   : > { %v1741_v44 = vmax.f32 %v1666_v31, %v1734_v29  ;;  %v6715_v9 = vpop.f32.mrb[25].mxu0  ;;  %v6723_v39 = vpop.f32.mrb[29].mxu1 }
 0x4f8   : > { %v1669_v46 = vpop.f32.mrb[26].mxu0  ;;  %v1737_v17 = vpop.f32.mrb[30].mxu1  ;;  %v7205_v9 = vunpack.i.l.bf16 %v8325_v58  ;;  %v9959_v58 = vmax.f32 %v8145_v41, %v8149_v45 }
 0x4f9   : > { %v1742_v54 = vmax.f32 %v1669_v46, %v1737_v17  ;;  %v6716_v26 = vpop.f32.mrb[27].mxu0  ;;  %v6724_v63 = vpop.f32.mrb[31].mxu1  ;;  %6731 = vmatprep.mubr.msk.f32.mxu0 %vm481_vm14, %v1741_v44  ;;  %6740 = vmatprep.mubr.msk.f32.mxu1 %vm481_vm14, %v1741_v44  ;;  %v7210_v44 = vunpack.i.l.bf16 %v8323_v57  ;;  %v2314_v17 = vsel %vm348_vm3, %v7206_v55, %v7211_v51 }
 0x4fa   : > { %v7220_v63 = vunpack.i.l.bf16 %v8327_v59  ;;  %v2245_v62 = vsel %vm346_vm2, %v8049_v30, %v7205_v9  ;;  %v2315_v45 = vsel %vm350_vm4, %v2314_v17, %v7216_v4 }
 0x4fb   : > { %6732 = vmatmul.mubr.msk.f32.vlgmr.msra.gmra.mrb[22].mxu0 %vm481_vm14, %v1742_v54  ;;  %6741 = vmatmul.mubr.msk.f32.vlgmr.msra.gmra.mrb[26].mxu1 %vm481_vm14, %v1742_v54  ;;  %v7221_v54 = vunpack.i.h.bf16 %v8327_v59  ;;  %v2246_v57 = vsel %vm348_vm3, %v7205_v9, %v7210_v44  ;;  %v2313_v59 = vsel %vm346_vm2, %v8057_v36, %v7206_v55  ;;  %v9961_v36 = vmax.f32 %v8211_v40, %v8213_v43 }
 0x4fc   : > { %6744 = vmatpush3.bf16.msra.mxu0 %v1938_v52  ;;  %6752 = vmatpush3.bf16.msra.mxu1 %v2006_v47  ;;  %v2247_v41 = vsel %vm350_vm4, %v2246_v57, %v7215_v33  ;;  %v9962_v40 = vmax.f32 %v8205_v16, %v8207_v35 }
 0x4fd   : > { %6745 = vmatprep.subr.bf16.mxu0 %v9955_v3  ;;  %6753 = vmatprep.subr.bf16.mxu1 %v9955_v3  ;;  %v968_v30 = vadd.f32 %v9961_v36, %v8357_v37  ;;  %v2249_v17 = vpack.c.bf16 %v2247_v41, %v2245_v62 }
 0x4fe   : > { %6747 = vmatprep.mubr.msk.bf16.mxu0 %vm7768_vm0, %v9955_v3  ;;  %6755 = vmatprep.mubr.msk.bf16.mxu1 %vm7768_vm0, %v9955_v3  ;;  %v969_v43 = vadd.f32 %v9962_v40, %v8355_v34 }
 0x500   : > { %6746 = vmatpush3.bf16.msra.mxu0 %v1941_v2  ;;  %6754 = vmatpush3.bf16.msra.mxu1 %v2009_v38  ;;  %v657_v2 = vadd.f32 %v8355_v34, %v9959_v58  ;;  %v9960_v38 = vmax.f32 %v8147_v42, %v8153_v49  ;;  %v2248_v42 = vsel %vm352_vm1, %v7215_v33, %v7220_v63  ;;  %v971_v16 = vmax.f32 %v969_v43, 0.0 }
 0x501   : > { %7018 = vmatprep.subr.msk.bf16.mxu0 %vm7900_vm7, %v9956_v48  ;;  %7022 = vmatprep.subr.msk.bf16.mxu1 %vm7959_vm12, %v9956_v48 }
 0x503   : > { %6748 = vmatmul.mubr.msk.bf16.vlgmr.msra.gmra.mrb[28].mxu0 %vm361_vm8, %v8462_v8  ;;  %6756 = vmatmul.mubr.msk.bf16.vlgmr.msra.gmra.mrb[32].mxu1 %vm361_vm8, %v8462_v8 }
 0x504   : > { %7020 = vmatpush3.bf16.msk.msra.mxu0 %vm7900_vm7, %v9956_v48  ;;  %7024 = vmatpush3.bf16.msk.msra.mxu1 %vm7959_vm12, %v9956_v48 }
 0x505   : > { %6763 = vmatprep.subr.msk.mxu0 %vm352_vm1, %v7939_v13  ;;  %6772 = vmatprep.subr.msk.mxu1 %vm352_vm1, %v8111_v5 }
 0x508   : > { %6764 = vmatpush3.msk.msra.mxu0 %vm352_vm1, %v7939_v13  ;;  %6773 = vmatpush3.msk.msra.mxu1 %vm352_vm1, %v8111_v5 }
 0x509   : > { %6777 = vmatprep.subr.bf16.mxu0 %v9955_v3  ;;  %6785 = vmatprep.subr.bf16.mxu1 %v9955_v3 }
 0x567   : > { %v1599_v19 = vpop.permute.xlu0 %1598 }
 0x568   : > { %1604 = vst.msk [vmem:[#allocation2 + $0x48] sm:$0xff] %vm669_vm6, %v1599_v19  ;;  %v1597_v61 = vpop.permute.xlu1 %1596  ;;  %v656_v19 = vadd.f32 %v8357_v37, %v9960_v38 }
 0x569   : > { %1603 = vst.msk [vmem:[#allocation2 + $0x40] sm:$0xff] %vm669_vm6, %v1597_v61  ;;  %v2316_v61 = vsel %vm352_vm1, %v7216_v4, %v7221_v54 }
 0x56f   : > { %v3496_v50 = vld [vmem:[#allocation2 + $0x48] sm:$0xff] }
 0x570   : > { %v3495_v14 = vld [vmem:[#allocation2 + $0x40] sm:$0xff] }
 0x571   : > { %v8486_v1 = vpack.i.bf16 %v3496_v50, %v3495_v14  ;;  %v8488_v53 = vpack.c.bf16 %v3496_v50, %v3495_v14 }
 0x573   : > { %9958 = vst [vmem:[#allocation7_spill] sm:$0xff] %v8488_v53 }
 0x5ce   : > { %v6733_v29 = vpop.f32.mrb[22].mxu0  ;;  %v6742_v31 = vpop.f32.mrb[26].mxu1 }
 0x5cf   : > { %v1900_v56 = vmax.f32 %v6733_v29, %v6742_v31  ;;  %v1815_v25 = vpop.f32.mrb[23].mxu0  ;;  %v1890_v27 = vpop.f32.mrb[27].mxu1 }
 0x5d0   : > { %v1899_v39 = vmax.f32 %v1815_v25, %v1890_v27  ;;  %v658_v25 = vmax.f32 %v656_v19, 0.0  ;;  %v2318_v27 = vpack.c.bf16 %v7221_v54, %v2316_v61  ;;  %v970_v54 = vmax.f32 %v968_v30, 0.0 }
 0x5d1   : > { %v1902_v46 = vadd.f32 %v1900_v56, %v8355_v34  ;;  %v659_v56 = vmax.f32 %v657_v2, 0.0 }
 0x5d2   : > { %v1901_v26 = vadd.f32 %v1899_v39, %v8357_v37  ;;  %v2320_v4 = vand.u32 %v2318_v27, %v7887_v60  ;;  %v8603_v27 = vld [vmem:[#allocation2] sm:$0xff] }
 0x5d3   : > { %v1904_v52 = vmax.f32 %v1902_v46, 0.0  ;;  %v2250_v46 = vpack.c.bf16 %v7220_v63, %v2248_v42 }
 0x5d4   : > { %v1903_v47 = vmax.f32 %v1901_v26, 0.0  ;;  %v2317_v26 = vpack.c.bf16 %v2315_v45, %v2313_v59 }
 0x5d5   : > { %1909 = vrot.lane.b32.xlu0 %v1904_v52, %s7774_s13  ;;  %v2252_v63 = vand.u32 %v2250_v46, %v7887_v60 }
 0x5d6   : > { %v2045_v50 = vpop.f32.mrb[32].mxu1  ;;  %v1977_v14 = vpop.f32.mrb[28].mxu0  ;;  %1907 = vrot.lane.b32.xlu1 %v1903_v47, %s7774_s13 }
 0x5d7   : > { %v2052_v49 = vmax.f32 %v1977_v14, %v2045_v50  ;;  %v6749_v51 = vpop.f32.mrb[29].mxu0  ;;  %v6757_v29 = vpop.f32.mrb[33].mxu1 }
 0x5d8   : > { %v1980_v55 = vpop.f32.mrb[30].mxu0  ;;  %v2048_v31 = vpop.f32.mrb[34].mxu1 }
 0x5d9   : > { %v2053_v44 = vmax.f32 %v1980_v55, %v2048_v31  ;;  %v6750_v9 = vpop.f32.mrb[31].mxu0  ;;  %v6758_v39 = vpop.f32.mrb[35].mxu1  ;;  %6765 = vmatprep.mubr.msk.f32.mxu0 %vm481_vm14, %v2052_v49  ;;  %6774 = vmatprep.mubr.msk.f32.mxu1 %vm481_vm14, %v2052_v49 }
 0x5da   : > { %664 = vrot.lane.b32.xlu0 %v659_v56, %s7774_s13  ;;  %662 = vrot.lane.b32.xlu1 %v658_v25, %s7774_s13 }
 0x5db   : > { %6766 = vmatmul.mubr.msk.f32.vlgmr.msra.gmra.mrb[32].mxu0 %vm481_vm14, %v2053_v44  ;;  %6775 = vmatmul.mubr.msk.f32.vlgmr.msra.gmra.mrb[36].mxu1 %vm481_vm14, %v2053_v44  ;;  %v8605_v44 = vld [vmem:[#allocation2 + $0x8] sm:$0xff] }
 0x5dc   : > { %6778 = vmatpush3.bf16.msra.mxu0 %v2249_v17  ;;  %6786 = vmatpush3.bf16.msra.mxu1 %v2317_v26  ;;  %v7349_v17 = vpack.i.bf16 %v8605_v44, %v8603_v27 }
 0x5dd   : > { %6779 = vmatprep.subr.bf16.mxu0 %v9955_v3  ;;  %6787 = vmatprep.subr.bf16.mxu1 %v9955_v3 }
 0x5de   : > { %974 = vrot.lane.b32.xlu0 %v970_v54, %s7774_s13  ;;  %7285 = vrot.lane.b32.xlu1 %v8415_v12, %s7767_s28 }
 0x5df   : > { %6781 = vmatprep.mubr.msk.bf16.mxu0 %vm7768_vm0, %v9955_v3  ;;  %6789 = vmatprep.mubr.msk.bf16.mxu1 %vm7768_vm0, %v9955_v3 }
 0x5e0   : > { %6780 = vmatpush3.bf16.msra.mxu0 %v2252_v63  ;;  %6788 = vmatpush3.bf16.msra.mxu1 %v2320_v4 }
 0x5e1   : > { %7026 = vmatprep.subr.msk.bf16.mxu0 %vm7900_vm7, %v9956_v48  ;;  %7030 = vmatprep.subr.msk.bf16.mxu1 %vm7959_vm12, %v9956_v48 }
 0x5e2   : > { %7290 = vrot.lane.b32.xlu0 %v8415_v12, %s7770_s30  ;;  %976 = vrot.lane.b32.xlu1 %v971_v16, %s7774_s13 }
 0x5e3   : > { %6782 = vmatmul.mubr.msk.bf16.vlgmr.msra.gmra.mrb[36].mxu0 %vm361_vm8, %v8462_v8  ;;  %6790 = vmatmul.mubr.msk.bf16.vlgmr.msra.gmra.mrb[40].mxu1 %vm361_vm8, %v8462_v8 }
 0x5e4   : > { %7028 = vmatpush3.bf16.msk.msra.mxu0 %vm7900_vm7, %v9956_v48  ;;  %7032 = vmatpush3.bf16.msk.msra.mxu1 %vm7959_vm12, %v9956_v48 }
 0x5e5   : > { %6797 = vmatprep.subr.msk.mxu0 %vm352_vm1, %v7939_v13  ;;  %6806 = vmatprep.subr.msk.mxu1 %vm352_vm1, %v8111_v5 }
 0x5e6   : > { %7300 = vrot.lane.b32.xlu0 %v8486_v1, %s7774_s13  ;;  %7295 = vrot.lane.b32.xlu1 %v8415_v12, %s7766_s27 }
 0x5e8   : > { %6798 = vmatpush3.msk.msra.mxu0 %vm352_vm1, %v7939_v13  ;;  %6807 = vmatpush3.msk.msra.mxu1 %vm352_vm1, %v8111_v5 }
 0x5e9   : > { %6811 = vmatprep.subr.bf16.mxu0 %v9955_v3  ;;  %6819 = vmatprep.subr.bf16.mxu1 %v9955_v3 }
 0x5ea   : > { %7310 = vrot.lane.b32.xlu0 %v8486_v1, %s7770_s30  ;;  %7305 = vrot.lane.b32.xlu1 %v8486_v1, %s7767_s28 }
 0x5ee   : > { %7315 = vrot.lane.b32.xlu1 %v8486_v1, %s7766_s27 }
 0x647   : > { %v1910_v35 = vpop.permute.xlu0 %1909 }
 0x648   : > { %1915 = vst.msk [vmem:[#allocation2 + $0x58] sm:$0xff] %vm669_vm6, %v1910_v35  ;;  %v1908_v33 = vpop.permute.xlu1 %1907 }
 0x649   : > { %1914 = vst.msk [vmem:[#allocation2 + $0x50] sm:$0xff] %vm669_vm6, %v1908_v33 }
 0x64c   : > { %v665_v52 = vpop.permute.xlu0 %664  ;;  %v663_v57 = vpop.permute.xlu1 %662 }
 0x64d   : > { %671 = vst.msk [vmem:[#allocation2 + $0x18] sm:$0xff] %vm669_vm6, %v665_v52  ;;  %670 = vst.msk [vmem:[#allocation2 + $0x10] sm:$0xff] %vm669_vm6, %v663_v57 }
 0x64f   : > { %v3822_v47 = vld [vmem:[#allocation2 + $0x58] sm:$0xff] }
 0x650   : > { %v975_v58 = vpop.permute.xlu0 %974  ;;  %v7286_v2 = vpop.permute.xlu1 %7285  ;;  %v3821_v38 = vld [vmem:[#allocation2 + $0x50] sm:$0xff] }
 0x651   : > { %981 = vst.msk [vmem:[#allocation2 + $0x20] sm:$0xff] %vm669_vm6, %v975_v58  ;;  %v7288_v19 = vunpack.i.h.bf16 %v7286_v2  ;;  %v7287_v59 = vunpack.i.l.bf16 %v7286_v2  ;;  %v8589_v62 = vpack.i.bf16 %v3822_v47, %v3821_v38  ;;  %v8591_v61 = vpack.c.bf16 %v3822_v47, %v3821_v38  ;;  %7325 = vrot.lane.b32.xlu1 %v7286_v2, %s7767_s28 }
 0x653   : > { %9963 = vst [vmem:[#allocation8_spill] sm:$0xff] %v8591_v61  ;;  %v8593_v50 = vpack.c.bf16 %v7288_v19, %v7287_v59  ;;  %v7231_v59 = vunpack.i.h.bf16 %v8331_v6 }
 0x654   : > { %v7291_v14 = vpop.permute.xlu0 %7290  ;;  %v977_v41 = vpop.permute.xlu1 %976  ;;  %v3489_v42 = vld [vmem:[#allocation2 + $0x10] sm:$0xff]  ;;  %v3490_v45 = vld [vmem:[#allocation2 + $0x18] sm:$0xff] }
 0x655   : > { %v7293_v49 = vunpack.i.h.bf16 %v7291_v14  ;;  %v7292_v51 = vunpack.i.l.bf16 %v7291_v14  ;;  %982 = vst.msk [vmem:[#allocation2 + $0x28] sm:$0xff] %vm669_vm6, %v977_v41  ;;  %v7319_v29 = vpack.i.bf16 %v3490_v45, %v3489_v42  ;;  %v8597_v36 = vpack.c.bf16 %v3490_v45, %v3489_v42 }
 0x656   : > { %v7230_v45 = vunpack.i.l.bf16 %v8331_v6  ;;  %v7743_v6 = vld [vmem:[%s7828_s26 + $0xf] sm:$0x1f] }
 0x657   : > { %7320 = vrot.lane.b32.xlu0 %v7319_v29, %s7766_s27  ;;  %v8600_v30 = vpack.c.bf16 %v7293_v49, %v7292_v51  ;;  %7330 = vrot.lane.b32.xlu1 %v7319_v29, %s7769_s29  ;;  %v7226_v49 = vunpack.i.h.bf16 %v8333_v7 }
 0x658   : > { %v7301_v55 = vpop.permute.xlu0 %7300  ;;  %v7296_v31 = vpop.permute.xlu1 %7295  ;;  %v3491_v4 = vld [vmem:[#allocation2 + $0x20] sm:$0xff] }
 0x659   : > { %9964 = vst [vmem:[#allocation9_spill] sm:$0xff] %v8600_v30  ;;  %v7298_v56 = vunpack.i.h.bf16 %v7296_v31  ;;  %v7297_v25 = vunpack.i.l.bf16 %v7296_v31 }
 0x65b   : > { %7335 = vrot.lane.b32.xlu0 %v8589_v62, %s7774_s13  ;;  %v8609_v9 = vpack.c.bf16 %v7298_v56, %v7297_v25  ;;  %7345 = vrot.lane.b32.xlu1 %v8589_v62, %s7767_s28  ;;  %v7235_v56 = vunpack.i.l.bf16 %v8337_v11  ;;  %v2625_v25 = vsel %vm348_vm3, %v7226_v49, %v7231_v59 }
 0x65c   : > { %v7311_v39 = vpop.permute.xlu0 %7310  ;;  %v7306_v46 = vpop.permute.xlu1 %7305  ;;  %v3492_v26 = vld [vmem:[#allocation2 + $0x28] sm:$0xff] }
 0x65d   : > { %9965 = vst [vmem:[#allocation10_spill] sm:$0xff] %v8609_v9  ;;  %v7313_v40 = vunpack.i.h.bf16 %v7311_v39  ;;  %v7312_v43 = vunpack.i.l.bf16 %v7311_v39  ;;  %v7308_v54 = vunpack.i.h.bf16 %v7306_v46  ;;  %v7307_v63 = vunpack.i.l.bf16 %v7306_v46 }
 0x65e   : > { %v8618_v35 = vpack.c.bf16 %v3492_v26, %v3491_v4  ;;  %v7364_v2 = vpack.i.bf16 %v3492_v26, %v3491_v4 }
 0x65f   : > { %v8615_v16 = vpack.c.bf16 %v7308_v54, %v7307_v63  ;;  %7340 = vrot.lane.b32.xlu0 %v7291_v14, %s7767_s28  ;;  %v8620_v52 = vpack.c.bf16 %v7313_v40, %v7312_v43  ;;  %7350 = vrot.lane.b32.xlu1 %v7349_v17, %s7767_s28 }
 0x660   : > { %v7316_v33 = vpop.permute.xlu1 %7315 }
 0x661   : > { %9966 = vst [vmem:[#allocation11_spill] sm:$0xff] %v8620_v52  ;;  %v7318_v57 = vunpack.i.h.bf16 %v7316_v33  ;;  %v7317_v47 = vunpack.i.l.bf16 %v7316_v33 }
 0x663   : > { %7360 = vrot.lane.b32.xlu0 %v7349_v17, %s7770_s30  ;;  %v8624_v58 = vpack.c.bf16 %v7318_v57, %v7317_v47  ;;  %7355 = vrot.lane.b32.xlu1 %v7296_v31, %s7767_s28  ;;  %v7236_v31 = vunpack.i.h.bf16 %v8337_v11 }
 0x665   : > { %9967 = vst [vmem:[#allocation12_spill] sm:$0xff] %v8624_v58  ;;  %v2626_v11 = vsel %vm350_vm4, %v2625_v25, %v7236_v31  ;;  %v7251_v58 = vunpack.i.h.bf16 %v8339_v18 }
 0x667   : > { %7370 = vrot.lane.b32.xlu0 %v8589_v62, %s7770_s30  ;;  %7365 = vrot.lane.b32.xlu1 %v7364_v2, %s7767_s28 }
 0x66b   : > { %7375 = vrot.lane.b32.xlu0 %v8589_v62, %s7766_s27  ;;  %7385 = vrot.lane.b32.xlu1 %v7349_v17, %s7766_s27 }
 0x66f   : > { %7380 = vrot.lane.b32.xlu0 %v7301_v55, %s7767_s28  ;;  %7395 = vrot.lane.b32.xlu1 %v7349_v17, %s7769_s29  ;;  %v7240_v55 = vunpack.i.l.bf16 %v8335_v10  ;;  %v7744_v17 = vld [vmem:[%s7828_s26 + $0xe] sm:$0x1f] }
 0x671   : > { %v2559_v54 = vsel %vm352_vm1, %v7235_v56, %v7240_v55 }
 0x673   : > { %7390 = vrot.lane.b32.xlu0 %v7364_v2, %s7770_s30  ;;  %7405 = vrot.lane.b32.xlu1 %v7306_v46, %s7767_s28  ;;  %v2624_v46 = vsel %vm346_vm2, %v7743_v6, %v7226_v49 }
 0x677   : > { %7400 = vrot.lane.b32.xlu0 %v7364_v2, %s7766_s27  ;;  %7415 = vrot.lane.b32.xlu1 %v7311_v39, %s7767_s28 }
 0x67b   : > { %7410 = vrot.lane.b32.xlu0 %v7364_v2, %s7769_s29  ;;  %7425 = vrot.lane.b32.xlu1 %v7316_v33, %s7767_s28 }
 0x67f   : > { %7420 = vrot.lane.b32.xlu0 %v7319_v29, %s7767_s28 }
 0x683   : > { %7430 = vrot.lane.b32.xlu0 %v7319_v29, %s7770_s30  ;;  %v7241_v29 = vunpack.i.h.bf16 %v8335_v10 }
 0x685   : > { %v2627_v26 = vsel %vm352_vm1, %v7236_v31, %v7241_v29 }
 0x686   : > { %v2629_v49 = vpack.c.bf16 %v7241_v29, %v2627_v26 }
 0x687   : > { %7440 = vrot.lane.b32.xlu0 %v8415_v12, %s7769_s29  ;;  %v7225_v12 = vunpack.i.l.bf16 %v8333_v7 }
 0x689   : > { %v2557_v39 = vsel %vm348_vm3, %v7225_v12, %v7230_v45  ;;  %v2556_v7 = vsel %vm346_vm2, %v7744_v17, %v7225_v12  ;;  %v2561_v12 = vpack.c.bf16 %v7240_v55, %v2559_v54 }
 0x68a   : > { %v2558_v10 = vsel %vm350_vm4, %v2557_v39, %v7235_v56  ;;  %v2628_v39 = vpack.c.bf16 %v2626_v11, %v2624_v46  ;;  %v2631_v56 = vand.u32 %v2629_v49, %v7887_v60 }
 0x68b   : > { %v2560_v6 = vpack.c.bf16 %v2558_v10, %v2556_v7  ;;  %v2563_v31 = vand.u32 %v2561_v12, %v7887_v60 }
 0x6ae   : > { %v8645_v38 = vpop.f32.mrb[32].mxu0  ;;  %v8647_v19 = vpop.f32.mrb[36].mxu1 }
 0x6af   : > { %v2211_v14 = vmax.f32 %v8645_v38, %v8647_v19  ;;  %v8652_v41 = vpop.f32.mrb[33].mxu0  ;;  %v8654_v42 = vpop.f32.mrb[37].mxu1 }
 0x6b0   : > { %v2210_v51 = vmax.f32 %v8652_v41, %v8654_v42 }
 0x6b6   : > { %v2288_v40 = vpop.f32.mrb[36].mxu0  ;;  %v2356_v43 = vpop.f32.mrb[40].mxu1 }
 0x6b7   : > { %v2363_v63 = vmax.f32 %v2288_v40, %v2356_v43  ;;  %v6783_v4 = vpop.f32.mrb[37].mxu0  ;;  %v6791_v33 = vpop.f32.mrb[41].mxu1 }
 0x6b8   : > { %v2291_v57 = vpop.f32.mrb[38].mxu0  ;;  %v2359_v47 = vpop.f32.mrb[42].mxu1  ;;  %v2212_v4 = vadd.f32 %v2210_v51, %v8357_v37 }
 0x6b9   : > { %v2364_v2 = vmax.f32 %v2291_v57, %v2359_v47  ;;  %v6784_v59 = vpop.f32.mrb[39].mxu0  ;;  %v6792_v45 = vpop.f32.mrb[43].mxu1  ;;  %6799 = vmatprep.mubr.msk.f32.mxu0 %vm481_vm14, %v2363_v63  ;;  %6808 = vmatprep.mubr.msk.f32.mxu1 %vm481_vm14, %v2363_v63 }
 0x6ba   : > { %v2213_v59 = vadd.f32 %v2211_v14, %v8355_v34  ;;  %v2214_v45 = vmax.f32 %v2212_v4, 0.0 }
 0x6bb   : > { %6800 = vmatmul.mubr.msk.f32.vlgmr.msra.gmra.mrb[34].mxu0 %vm481_vm14, %v2364_v2  ;;  %6809 = vmatmul.mubr.msk.f32.vlgmr.msra.gmra.mrb[38].mxu1 %vm481_vm14, %v2364_v2 }
 0x6bc   : > { %6812 = vmatpush3.bf16.msra.mxu0 %v2560_v6  ;;  %6820 = vmatpush3.bf16.msra.mxu1 %v2628_v39  ;;  %v2215_v41 = vmax.f32 %v2213_v59, 0.0 }
 0x6bd   : > { %6813 = vmatprep.subr.bf16.mxu0 %v9955_v3  ;;  %6821 = vmatprep.subr.bf16.mxu1 %v9955_v3 }
 0x6be   : > { %6815 = vmatprep.mubr.msk.bf16.mxu0 %vm7768_vm0, %v9955_v3  ;;  %6823 = vmatprep.mubr.msk.bf16.mxu1 %vm7768_vm0, %v9955_v3 }
 0x6c0   : > { %6814 = vmatpush3.bf16.msra.mxu0 %v2563_v31  ;;  %6822 = vmatpush3.bf16.msra.mxu1 %v2631_v56 }
 0x6c1   : > { %7034 = vmatprep.subr.msk.bf16.mxu0 %vm7900_vm7, %v9956_v48  ;;  %7038 = vmatprep.subr.msk.bf16.mxu1 %vm7959_vm12, %v9956_v48 }
 0x6c3   : > { %6816 = vmatmul.mubr.msk.bf16.vlgmr.msra.gmra.mrb[40].mxu0 %vm361_vm8, %v8462_v8  ;;  %6824 = vmatmul.mubr.msk.bf16.vlgmr.msra.gmra.mrb[44].mxu1 %vm361_vm8, %v8462_v8  ;;  %v8707_v29 = vpop.permute.xlu1 %7325 }
 0x6c4   : > { %7036 = vmatpush3.bf16.msk.msra.mxu0 %vm7900_vm7, %v9956_v48  ;;  %7040 = vmatpush3.bf16.msk.msra.mxu1 %vm7959_vm12, %v9956_v48 }
 0x6c5   : > { %6831 = vmatprep.subr.msk.mxu0 %vm352_vm1, %v7939_v13  ;;  %6840 = vmatprep.subr.msk.mxu1 %vm352_vm1, %v8111_v5 }
 0x6c8   : > { %6832 = vmatpush3.msk.msra.mxu0 %vm352_vm1, %v7939_v13  ;;  %6841 = vmatpush3.msk.msra.mxu1 %vm352_vm1, %v8111_v5 }
 0x6c9   : > { %v8713_v55 = vpop.permute.xlu0 %7320  ;;  %6845 = vmatprep.subr.bf16.mxu0 %v9955_v3  ;;  %6853 = vmatprep.subr.bf16.mxu1 %v9955_v3  ;;  %v8717_v25 = vpop.permute.xlu1 %7330 }
 0x6cd   : > { %v7336_v46 = vpop.permute.xlu0 %7335  ;;  %v7346_v17 = vpop.permute.xlu1 %7345 }
 0x6ce   : > { %v7348_v7 = vunpack.i.h.bf16 %v7346_v17  ;;  %v7347_v26 = vunpack.i.l.bf16 %v7346_v17  ;;  %7435 = vrot.lane.b32.xlu1 %v7336_v46, %s7767_s28 }
 0x6d0   : > { %v8721_v43 = vpack.c.bf16 %v7348_v7, %v7347_v26 }
 0x6d1   : > { %v8719_v40 = vpop.permute.xlu0 %7340  ;;  %v8743_v42 = vpop.permute.xlu1 %7350 }
 0x6d2   : > { %9968 = vst [vmem:[#allocation13_spill] sm:$0xff] %v8721_v43  ;;  %7445 = vrot.lane.b32.xlu1 %v7346_v17, %s7767_s28 }
 0x6d5   : > { %v8724_v10 = vpop.permute.xlu0 %7360  ;;  %v8745_v51 = vpop.permute.xlu1 %7355 }
 0x6d9   : > { %v7371_v54 = vpop.permute.xlu0 %7370  ;;  %v8747_v12 = vpop.permute.xlu1 %7365 }
 0x6da   : > { %v7373_v11 = vunpack.i.h.bf16 %v7371_v54  ;;  %v7372_v63 = vunpack.i.l.bf16 %v7371_v54  ;;  %7450 = vrot.lane.b32.xlu0 %v7371_v54, %s7767_s28 }
 0x6dc   : > { %v8731_v33 = vpack.c.bf16 %v7373_v11, %v7372_v63 }
 0x6dd   : > { %v7376_v57 = vpop.permute.xlu0 %7375  ;;  %v8751_v38 = vpop.permute.xlu1 %7385 }
 0x6de   : > { %9969 = vst [vmem:[#allocation14_spill] sm:$0xff] %v8731_v33  ;;  %v7378_v47 = vunpack.i.h.bf16 %v7376_v57  ;;  %v7377_v2 = vunpack.i.l.bf16 %v7376_v57  ;;  %7455 = vrot.lane.b32.xlu1 %v7376_v57, %s7767_s28  ;;  %2218 = vrot.lane.b32.xlu0 %v2214_v45, %s7774_s13 }
 0x6e0   : > { %v8738_v49 = vpack.c.bf16 %v7378_v47, %v7377_v2 }
 0x6e1   : > { %v8749_v6 = vpop.permute.xlu0 %7380  ;;  %v8755_v14 = vpop.permute.xlu1 %7395 }
 0x6e2   : > { %9970 = vst [vmem:[#allocation15_spill] sm:$0xff] %v8738_v49  ;;  %2220 = vrot.lane.b32.xlu1 %v2215_v41, %s7774_s13 }
 0x6e5   : > { %v8753_v19 = vpop.permute.xlu0 %7390  ;;  %v8759_v31 = vpop.permute.xlu1 %7405 }
 0x6e9   : > { %v8757_v39 = vpop.permute.xlu0 %7400  ;;  %v8763_v46 = vpop.permute.xlu1 %7415 }
 0x6ed   : > { %v8761_v56 = vpop.permute.xlu0 %7410  ;;  %v8767_v7 = vpop.permute.xlu1 %7425 }
 0x6ee   : > { %9971 = vst [vmem:[#allocation16_spill] sm:$0xff] %v8767_v7 }
 0x6f1   : > { %v8765_v17 = vpop.permute.xlu0 %7420 }
 0x6f5   : > { %v8769_v26 = vpop.permute.xlu0 %7430 }
 0x6f9   : > { %v8773_v11 = vpop.permute.xlu0 %7440 }
 0x6fa   : > { %9973 = vst [vmem:[#allocation18_spill] sm:$0xff] %v8773_v11 }
 0x740   : > { %v8771_v54 = vpop.permute.xlu1 %7435 }
 0x741   : > { %9972 = vst [vmem:[#allocation17_spill] sm:$0xff] %v8771_v54 }
 0x744   : > { %v8775_v63 = vpop.permute.xlu1 %7445 }
 0x745   : > { %9974 = vst [vmem:[#allocation19_spill] sm:$0xff] %v8775_v63  ;;  %v7260_v63 = vunpack.i.l.bf16 %v8343_v15 }
 0x74c   : > { %v8777_v4 = vpop.permute.xlu0 %7450 }
 0x74d   : > { %9975 = vst [vmem:[#allocation20_spill] sm:$0xff] %v8777_v4 }
 0x750   : > { %v8779_v57 = vpop.permute.xlu1 %7455  ;;  %v2219_v47 = vpop.permute.xlu0 %2218 }
 0x751   : > { %9976 = vst [vmem:[#allocation21_spill] sm:$0xff] %v8779_v57  ;;  %2225 = vst.msk [vmem:[#allocation2 + $0x60] sm:$0xff] %vm669_vm6, %v2219_v47  ;;  %v7250_v57 = vunpack.i.l.bf16 %v8339_v18  ;;  %v7246_v47 = vunpack.i.h.bf16 %v8341_v21 }
 0x753   : > { %v2936_v18 = vsel %vm348_vm3, %v7246_v47, %v7251_v58 }
 0x754   : > { %v2221_v2 = vpop.permute.xlu1 %2220 }
 0x755   : > { %2226 = vst.msk [vmem:[#allocation2 + $0x68] sm:$0xff] %vm669_vm6, %v2221_v2  ;;  %v7245_v2 = vunpack.i.l.bf16 %v8341_v21  ;;  %v7745_v21 = vld [vmem:[%s7828_s26 + $0x11] sm:$0x1f] }
 0x757   : > { %v2868_v11 = vsel %vm348_vm3, %v7245_v2, %v7250_v57 }
 0x758   : > { %v4227_v45 = vld [vmem:[#allocation2 + $0x60] sm:$0xff] }
 0x75c   : > { %v4228_v59 = vld [vmem:[#allocation2 + $0x68] sm:$0xff] }
 0x75d   : > { %v8783_v41 = vpack.c.bf16 %v4228_v59, %v4227_v45  ;;  %v8785_v49 = vpack.i.bf16 %v4228_v59, %v4227_v45  ;;  %v7261_v59 = vunpack.i.h.bf16 %v8343_v15 }
 0x75f   : > { %9977 = vst [vmem:[#allocation22_spill] sm:$0xff] %v8783_v41 }
 0x78e   : > { %v6801_v33 = vpop.f32.mrb[34].mxu0  ;;  %v6810_v61 = vpop.f32.mrb[38].mxu1 }
 0x78f   : > { %v2522_v52 = vmax.f32 %v6801_v33, %v6810_v61  ;;  %v2437_v4 = vpop.f32.mrb[35].mxu0  ;;  %v2512_v53 = vpop.f32.mrb[39].mxu1  ;;  %v7256_v61 = vunpack.i.h.bf16 %v8345_v22  ;;  %v7255_v33 = vunpack.i.l.bf16 %v8345_v22 }
 0x790   : > { %v2521_v43 = vmax.f32 %v2437_v4, %v2512_v53  ;;  %v2935_v53 = vsel %vm346_vm2, %v7745_v21, %v7246_v47 }
 0x791   : > { %v2524_v41 = vadd.f32 %v2522_v52, %v8355_v34  ;;  %v7746_v52 = vld [vmem:[%s7828_s26 + $0x10] sm:$0x1f]  ;;  %v2938_v15 = vsel %vm352_vm1, %v7256_v61, %v7261_v59  ;;  %v2869_v22 = vsel %vm350_vm4, %v2868_v11, %v7255_v33  ;;  %v2870_v58 = vsel %vm352_vm1, %v7255_v33, %v7260_v63 }
 0x792   : > { %v2523_v45 = vadd.f32 %v2521_v43, %v8357_v37  ;;  %v2867_v43 = vsel %vm346_vm2, %v7746_v52, %v7245_v2  ;;  %v2937_v57 = vsel %vm350_vm4, %v2936_v18, %v7256_v61  ;;  %v2940_v21 = vpack.c.bf16 %v7261_v59, %v2938_v15 }
 0x793   : > { %v2526_v9 = vmax.f32 %v2524_v41, 0.0  ;;  %v2871_v11 = vpack.c.bf16 %v2869_v22, %v2867_v43  ;;  %v2939_v33 = vpack.c.bf16 %v2937_v57, %v2935_v53 }
 0x794   : > { %v2525_v54 = vmax.f32 %v2523_v45, 0.0 }
 0x795   : > { %2531 = vrot.lane.b32.xlu1 %v2526_v9, %s7774_s13 }
 0x796   : > { %v2599_v4 = vpop.f32.mrb[40].mxu0  ;;  %v2667_v30 = vpop.f32.mrb[44].mxu1  ;;  %2529 = vrot.lane.b32.xlu0 %v2525_v54, %s7774_s13  ;;  %v2872_v54 = vpack.c.bf16 %v7260_v63, %v2870_v58 }
 0x797   : > { %v2674_v41 = vmax.f32 %v2599_v4, %v2667_v30  ;;  %v6817_v9 = vpop.f32.mrb[41].mxu0  ;;  %v6825_v45 = vpop.f32.mrb[45].mxu1 }
 0x798   : > { %v2602_v7 = vpop.f32.mrb[42].mxu0  ;;  %v2670_v47 = vpop.f32.mrb[46].mxu1  ;;  %v2874_v30 = vand.u32 %v2872_v54, %v7887_v60 }
 0x799   : > { %v2675_v32 = vmax.f32 %v2602_v7, %v2670_v47  ;;  %v6818_v2 = vpop.f32.mrb[43].mxu0  ;;  %v6826_v52 = vpop.f32.mrb[47].mxu1  ;;  %6833 = vmatprep.mubr.msk.f32.mxu0 %vm481_vm14, %v2674_v41  ;;  %6842 = vmatprep.mubr.msk.f32.mxu1 %vm481_vm14, %v2674_v41  ;;  %v2942_v7 = vand.u32 %v2940_v21, %v7887_v60 }
 0x79a   : > { %7465 = vrot.lane.b32.xlu1 %v8785_v49, %s7767_s28  ;;  %7460 = vrot.lane.b32.xlu0 %v8785_v49, %s7774_s13 }
 0x79b   : > { %6834 = vmatmul.mubr.msk.f32.vlgmr.msra.gmra.mrb[44].mxu0 %vm481_vm14, %v2675_v32  ;;  %6843 = vmatmul.mubr.msk.f32.vlgmr.msra.gmra.mrb[48].mxu1 %vm481_vm14, %v2675_v32 }
 0x79c   : > { %6846 = vmatpush3.bf16.msra.mxu0 %v2871_v11  ;;  %6854 = vmatpush3.bf16.msra.mxu1 %v2939_v33  ;;  %v7271_v33 = vunpack.i.h.bf16 %v8347_v23 }
 0x79d   : > { %6847 = vmatprep.subr.bf16.mxu0 %v9955_v3  ;;  %6855 = vmatprep.subr.bf16.mxu1 %v9955_v3 }
 0x79e   : > { %7475 = vrot.lane.b32.xlu1 %v8785_v49, %s7766_s27  ;;  %7470 = vrot.lane.b32.xlu0 %v8785_v49, %s7770_s30 }
 0x79f   : > { %6849 = vmatprep.mubr.msk.bf16.mxu0 %vm7768_vm0, %v9955_v3  ;;  %6857 = vmatprep.mubr.msk.bf16.mxu1 %vm7768_vm0, %v9955_v3 }
 0x7a0   : > { %6848 = vmatpush3.bf16.msra.mxu0 %v2874_v30  ;;  %6856 = vmatpush3.bf16.msra.mxu1 %v2942_v7 }
 0x7a1   : > { %7042 = vmatprep.subr.msk.bf16.mxu0 %vm7900_vm7, %v9956_v48  ;;  %7046 = vmatprep.subr.msk.bf16.mxu1 %vm7959_vm12, %v9956_v48 }
 0x7a3   : > { %6850 = vmatmul.mubr.msk.bf16.vlgmr.msra.gmra.mrb[48].mxu0 %vm361_vm8, %v8462_v8  ;;  %6858 = vmatmul.mubr.msk.bf16.vlgmr.msra.gmra.mrb[52].mxu1 %vm361_vm8, %v8462_v8 }
 0x7a4   : > { %7044 = vmatpush3.bf16.msk.msra.mxu0 %vm7900_vm7, %v9956_v48  ;;  %7048 = vmatpush3.bf16.msk.msra.mxu1 %vm7959_vm12, %v9956_v48 }
 0x7a5   : > { %6865 = vmatprep.subr.msk.mxu0 %vm352_vm1, %v7939_v13  ;;  %6874 = vmatprep.subr.msk.mxu1 %vm352_vm1, %v8111_v5 }
 0x7a8   : > { %6866 = vmatpush3.msk.msra.mxu0 %vm352_vm1, %v7939_v13  ;;  %6875 = vmatpush3.msk.msra.mxu1 %vm352_vm1, %v8111_v5 }
 0x7a9   : > { %6879 = vmatprep.subr.bf16.mxu0 %v9955_v3  ;;  %6887 = vmatprep.subr.bf16.mxu1 %v9955_v3 }
 0x807   : > { %v2532_v32 = vpop.permute.xlu1 %2531 }
 0x808   : > { %2537 = vst.msk [vmem:[#allocation2 + $0x78] sm:$0xff] %vm669_vm6, %v2532_v32  ;;  %v2530_v63 = vpop.permute.xlu0 %2529 }
 0x809   : > { %2536 = vst.msk [vmem:[#allocation2 + $0x70] sm:$0xff] %vm669_vm6, %v2530_v63  ;;  %v7266_v63 = vunpack.i.h.bf16 %v8349_v24 }
 0x80c   : > { %v7466_v59 = vpop.permute.xlu1 %7465  ;;  %v7461_v61 = vpop.permute.xlu0 %7460 }
 0x80d   : > { %v7468_v18 = vunpack.i.h.bf16 %v7466_v59  ;;  %v7467_v53 = vunpack.i.l.bf16 %v7466_v59 }
 0x80f   : > { %v8857_v43 = vpack.c.bf16 %v7468_v18, %v7467_v53  ;;  %v4391_v15 = vld [vmem:[#allocation2 + $0x78] sm:$0xff]  ;;  %v7280_v18 = vunpack.i.l.bf16 %v8351_v28  ;;  %v9983_v53 = vld [vmem:[#allocation5_spill] sm:$0xff] }
 0x810   : > { %v7476_v4 = vpop.permute.xlu1 %7475  ;;  %v7471_v22 = vpop.permute.xlu0 %7470  ;;  %v4390_v58 = vld [vmem:[#allocation2 + $0x70] sm:$0xff] }
 0x811   : > { %9978 = vst [vmem:[#allocation23_spill] sm:$0xff] %v8857_v43  ;;  %v7478_v57 = vunpack.i.h.bf16 %v7476_v4  ;;  %v7477_v41 = vunpack.i.l.bf16 %v7476_v4  ;;  %v7473_v9 = vunpack.i.h.bf16 %v7471_v22  ;;  %v7472_v45 = vunpack.i.l.bf16 %v7471_v22 }
 0x812   : > { %v8859_v47 = vpack.i.bf16 %v4391_v15, %v4390_v58  ;;  %v8869_v52 = vpack.c.bf16 %v4391_v15, %v4390_v58  ;;  %v7276_v15 = vunpack.i.h.bf16 %v9983_v53 }
 0x813   : > { %v8861_v21 = vpack.c.bf16 %v7478_v57, %v7477_v41  ;;  %v8863_v2 = vpack.c.bf16 %v7473_v9, %v7472_v45  ;;  %v7748_v41 = vld [vmem:[%s7828_s26 + $0x12] sm:$0x1f] }
 0x814   : > { %9979 = vst [vmem:[#allocation24_spill] sm:$0xff] %v8859_v47  ;;  %7485 = vrot.lane.b32.xlu1 %v8859_v47, %s7767_s28  ;;  %7480 = vrot.lane.b32.xlu0 %v8859_v47, %s7774_s13  ;;  %9982 = vst [vmem:[#allocation27_spill] sm:$0xff] %v8869_v52 }
 0x815   : > { %9980 = vst [vmem:[#allocation25_spill] sm:$0xff] %v8861_v21  ;;  %9981 = vst [vmem:[#allocation26_spill] sm:$0xff] %v8863_v2 }
 0x818   : > { %7495 = vrot.lane.b32.xlu1 %v8859_v47, %s7766_s27  ;;  %7490 = vrot.lane.b32.xlu0 %v8859_v47, %s7770_s30 }
 0x81c   : > { %7505 = vrot.lane.b32.xlu1 %v7466_v59, %s7767_s28  ;;  %7500 = vrot.lane.b32.xlu0 %v7461_v61, %s7767_s28  ;;  %v7281_v61 = vunpack.i.h.bf16 %v8351_v28 }
 0x81e   : > { %v3249_v9 = vsel %vm352_vm1, %v7276_v15, %v7281_v61 }
 0x820   : > { %7515 = vrot.lane.b32.xlu1 %v7471_v22, %s7767_s28  ;;  %7510 = vrot.lane.b32.xlu0 %v8486_v1, %s7769_s29  ;;  %v7270_v1 = vunpack.i.l.bf16 %v8347_v23  ;;  %v3247_v22 = vsel %vm348_vm3, %v7266_v63, %v7271_v33  ;;  %v7747_v23 = vld [vmem:[%s7828_s26 + $0x13] sm:$0x1f] }
 0x821   : > { %v3246_v57 = vsel %vm346_vm2, %v7747_v23, %v7266_v63 }
 0x824   : > { %7520 = vrot.lane.b32.xlu0 %v7476_v4, %s7767_s28  ;;  %v7275_v4 = vunpack.i.l.bf16 %v9983_v53  ;;  %v3248_v53 = vsel %vm350_vm4, %v3247_v22, %v7276_v15 }
 0x826   : > { %v3181_v59 = vsel %vm352_vm1, %v7275_v4, %v7280_v18 }
 0x828   : > { %7530 = vrot.lane.b32.xlu0 %v8589_v62, %s7769_s29  ;;  %v7265_v62 = vunpack.i.l.bf16 %v8349_v24 }
 0x82a   : > { %v3179_v58 = vsel %vm348_vm3, %v7265_v62, %v7270_v1  ;;  %v3178_v24 = vsel %vm346_vm2, %v7748_v41, %v7265_v62  ;;  %v3251_v62 = vpack.c.bf16 %v7281_v61, %v3249_v9  ;;  %v3183_v41 = vpack.c.bf16 %v7280_v18, %v3181_v59 }
 0x82b   : > { %v3180_v28 = vsel %vm350_vm4, %v3179_v58, %v7275_v4  ;;  %v3250_v58 = vpack.c.bf16 %v3248_v53, %v3246_v57  ;;  %vm5860_vm2 = vcmask 31744  }
 0x82c   : > { %v3182_v47 = vpack.c.bf16 %v3180_v28, %v3178_v24 }
 0x86e   : > { %v8883_v54 = vpop.f32.mrb[44].mxu0  ;;  %v8885_v11 = vpop.f32.mrb[48].mxu1 }
 0x86f   : > { %v8890_v7 = vpop.f32.mrb[45].mxu0  ;;  %v8892_v32 = vpop.f32.mrb[49].mxu1  ;;  %v9986_v57 = vmax.f32 %v8883_v54, %v8885_v11 }
 0x871   : > { %v2835_v24 = vadd.f32 %v9986_v57, %v8355_v34  ;;  %v7332_v57 = vunpack.i.l.bf16 %v8717_v25 }
 0x876   : > { %v2910_v45 = vpop.f32.mrb[48].mxu0  ;;  %v2978_v30 = vpop.f32.mrb[52].mxu1 }
 0x877   : > { %v2985_v52 = vmax.f32 %v2910_v45, %v2978_v30  ;;  %v6851_v33 = vpop.f32.mrb[49].mxu0  ;;  %v6859_v21 = vpop.f32.mrb[53].mxu1 }
 0x878   : > { %v2913_v1 = vpop.f32.mrb[50].mxu0  ;;  %v2981_v2 = vpop.f32.mrb[54].mxu1  ;;  %v3185_v21 = vand.u32 %v3183_v41, %v7887_v60 }
 0x879   : > { %v2986_v43 = vmax.f32 %v2913_v1, %v2981_v2  ;;  %v6852_v63 = vpop.f32.mrb[51].mxu0  ;;  %v6860_v23 = vpop.f32.mrb[55].mxu1  ;;  %6867 = vmatprep.mubr.msk.f32.mxu0 %vm481_vm14, %v2985_v52  ;;  %6876 = vmatprep.mubr.msk.f32.mxu1 %vm481_vm14, %v2985_v52  ;;  %v3253_v2 = vand.u32 %v3251_v62, %v7887_v60  ;;  %v7322_v60 = vunpack.i.l.bf16 %v8713_v55 }
 0x87b   : > { %6868 = vmatmul.mubr.msk.f32.vlgmr.msra.gmra.mrb[46].mxu0 %vm481_vm14, %v2986_v43  ;;  %6877 = vmatmul.mubr.msk.f32.vlgmr.msra.gmra.mrb[50].mxu1 %vm481_vm14, %v2986_v43  ;;  %v7323_v43 = vunpack.i.h.bf16 %v8713_v55 }
 0x87c   : > { %6880 = vmatpush3.bf16.msra.mxu0 %v3182_v47  ;;  %6888 = vmatpush3.bf16.msra.mxu1 %v3250_v58 }
 0x87d   : > { %6881 = vmatprep.subr.bf16.mxu0 %v9955_v3  ;;  %6889 = vmatprep.subr.bf16.mxu1 %v9955_v3  ;;  %v8947_v47 = vpack.c.bf16 %v7323_v43, %v7322_v60 }
 0x87e   : > { %6883 = vmatprep.mubr.msk.bf16.mxu0 %vm7768_vm0, %v9955_v3  ;;  %6891 = vmatprep.mubr.msk.bf16.mxu1 %vm7768_vm0, %v9955_v3  ;;  %vm3716_vm0 = vcmask 130048  }
 0x880   : > { %6882 = vmatpush3.bf16.msra.mxu0 %v3185_v21  ;;  %6890 = vmatpush3.bf16.msra.mxu1 %v3253_v2 }
 0x881   : > { %7050 = vmatprep.subr.msk.bf16.mxu0 %vm7900_vm7, %v9956_v48  ;;  %7054 = vmatprep.subr.msk.bf16.mxu1 %vm7959_vm12, %v9956_v48 }
 0x883   : > { %6884 = vmatmul.mubr.msk.bf16.vlgmr.msra.gmra.mrb[52].mxu0 %vm361_vm8, %v8462_v8  ;;  %6892 = vmatmul.mubr.msk.bf16.vlgmr.msra.gmra.mrb[56].mxu1 %vm361_vm8, %v8462_v8 }
 0x884   : > { %7052 = vmatpush3.bf16.msk.msra.mxu0 %vm7900_vm7, %v9956_v48  ;;  %7056 = vmatpush3.bf16.msk.msra.mxu1 %vm7959_vm12, %v9956_v48 }
 0x885   : > { %6899 = vmatprep.subr.msk.mxu0 %vm352_vm1, %v7939_v13  ;;  %6908 = vmatprep.subr.msk.mxu1 %vm352_vm1, %v8111_v5 }
 0x886   : > { %v7486_v3 = vpop.permute.xlu1 %7485  ;;  %v7481_v55 = vpop.permute.xlu0 %7480 }
 0x887   : > { %v7488_v52 = vunpack.i.h.bf16 %v7486_v3  ;;  %v7487_v8 = vunpack.i.l.bf16 %v7486_v3  ;;  %7525 = vrot.lane.b32.xlu1 %v7481_v55, %s7767_s28 }
 0x888   : > { %6900 = vmatpush3.msk.msra.mxu0 %vm352_vm1, %v7939_v13  ;;  %6909 = vmatpush3.msk.msra.mxu1 %vm352_vm1, %v8111_v5  ;;  %v9985_v13 = vmax.f32 %v8890_v7, %v8892_v32  ;;  %v2837_v7 = vmax.f32 %v2835_v24, 0.0  ;;  %v7353_v24 = vunpack.i.h.bf16 %v8743_v42  ;;  %vm3988_vm1 = vcmask 64512  }
 0x889   : > { %v8953_v0 = vpack.c.bf16 %v7488_v52, %v7487_v8  ;;  %6309 = vmatprep.subr.bf16.mxu0 %v8947_v47  ;;  %3772 = vmatprep.subr.bf16.mxu1 %v9984_v20 }
 0x88a   : > { %v7496_v48 = vpop.permute.xlu1 %7495  ;;  %v7491_v30 = vpop.permute.xlu0 %7490  ;;  %v2834_v4 = vadd.f32 %v9985_v13, %v8357_v37 }
 0x88b   : > { %v7498_v59 = vunpack.i.h.bf16 %v7496_v48  ;;  %v7497_v61 = vunpack.i.l.bf16 %v7496_v48  ;;  %v7493_v18 = vunpack.i.h.bf16 %v7491_v30  ;;  %v7492_v15 = vunpack.i.l.bf16 %v7491_v30  ;;  %7535 = vrot.lane.b32.xlu1 %v7486_v3, %s7767_s28  ;;  %7540 = vrot.lane.b32.xlu0 %v7491_v30, %s7767_s28 }
 0x88c   : > { %v2836_v9 = vmax.f32 %v2834_v4, 0.0  ;;  %v7333_v4 = vunpack.i.h.bf16 %v8717_v25 }
 0x88d   : > { %v8962_v5 = vpack.c.bf16 %v7498_v59, %v7497_v61  ;;  %v8964_v22 = vpack.c.bf16 %v7493_v18, %v7492_v15 }
 0x88e   : > { %v8975_v32 = vpop.permute.xlu0 %7500  ;;  %v8979_v28 = vpop.permute.xlu1 %7505 }
 0x88f   : > { %7545 = vrot.lane.b32.xlu1 %v7496_v48, %s7767_s28  ;;  %2840 = vrot.lane.b32.xlu0 %v2836_v9, %s7774_s13 }
 0x892   : > { %v8977_v45 = vpop.permute.xlu0 %7510  ;;  %v8983_v33 = vpop.permute.xlu1 %7515 }
 0x893   : > { %2842 = vrot.lane.b32.xlu1 %v2837_v7, %s7774_s13 }
 0x896   : > { %v8981_v53 = vpop.permute.xlu0 %7520 }
 0x89a   : > { %v8985_v54 = vpop.permute.xlu0 %7530 }
 0x8f9   : > { %v8987_v11 = vpop.permute.xlu1 %7525 }
 0x8fd   : > { %v8989_v1 = vpop.permute.xlu1 %7535  ;;  %v8991_v63 = vpop.permute.xlu0 %7540 }
 0x901   : > { %v8993_v23 = vpop.permute.xlu1 %7545  ;;  %v2841_v62 = vpop.permute.xlu0 %2840 }
 0x902   : > { %2847 = vst.msk [vmem:[#allocation2 + $0x80] sm:$0xff] %vm669_vm6, %v2841_v62 }
 0x905   : > { %v2843_v41 = vpop.permute.xlu1 %2842 }
 0x906   : > { %2848 = vst.msk [vmem:[#allocation2 + $0x88] sm:$0xff] %vm669_vm6, %v2843_v41  ;;  %v7352_v41 = vunpack.i.l.bf16 %v8743_v42 }
 0x908   : > { %v3654_v25 = vpack.c.bf16 %v7353_v24, %v7352_v41  ;;  %v7358_v24 = vunpack.i.h.bf16 %v8745_v51 }
 0x909   : > { %v4755_v21 = vld [vmem:[#allocation2 + $0x80] sm:$0xff] }
 0x90d   : > { %v4756_v58 = vld [vmem:[#allocation2 + $0x88] sm:$0xff] }
 0x90e   : > { %v8997_v2 = vpack.c.bf16 %v4756_v58, %v4755_v21  ;;  %v8999_v43 = vpack.i.bf16 %v4756_v58, %v4755_v21 }
 0x94e   : > { %v6869_v60 = vpop.f32.mrb[46].mxu0  ;;  %v6878_v3 = vpop.f32.mrb[50].mxu1 }
 0x94f   : > { %v3144_v55 = vmax.f32 %v6869_v60, %v6878_v3  ;;  %v3059_v52 = vpop.f32.mrb[47].mxu0  ;;  %v3134_v8 = vpop.f32.mrb[51].mxu1  ;;  %v3653_v60 = vpack.c.bf16 %v8605_v44, %v8603_v27  ;;  %v7328_v3 = vunpack.i.h.bf16 %v8707_v29  ;;  %v9021_v27 = vpack.c.bf16 %v7333_v4, %v7332_v57  ;;  %v9026_v44 = vld [vmem:[%s9901_s4 + $0x4] ss:$16 sps:$4 sm:$0xff]  }
 0x950   : > { %v3143_v48 = vmax.f32 %v3059_v52, %v3134_v8  ;;  %v7387_v4 = vunpack.i.l.bf16 %v8751_v38 }
 0x951   : > { %v3146_v30 = vadd.f32 %v3144_v55, %v8355_v34  ;;  %v7327_v55 = vunpack.i.l.bf16 %v8707_v29  ;;  %v9031_v29 = vld [vmem:[%s9901_s4 + $0xc] ss:$16 sps:$4 sm:$0xff]  }
 0x952   : > { %v3145_v59 = vadd.f32 %v3143_v48, %v8357_v37 }
 0x953   : > { %v3148_v61 = vmax.f32 %v3146_v30, 0.0  ;;  %v3670_v42 = vpack.c.bf16 %v7328_v3, %v7327_v55  ;;  %v7343_v30 = vunpack.i.h.bf16 %v8719_v40  ;;  %v7402_v55 = vunpack.i.l.bf16 %v8757_v39 }
 0x954   : > { %v3147_v18 = vmax.f32 %v3145_v59, 0.0  ;;  %v7342_v59 = vunpack.i.l.bf16 %v8719_v40  ;;  %v7388_v40 = vunpack.i.h.bf16 %v8751_v38  ;;  %v7398_v38 = vunpack.i.h.bf16 %v8755_v14 }
 0x955   : > { %3153 = vrot.lane.b32.xlu1 %v3148_v61, %s7774_s13  ;;  %v7363_v61 = vunpack.i.h.bf16 %v8724_v10 }
 0x956   : > { %v3221_v15 = vpop.f32.mrb[52].mxu0  ;;  %v3289_v13 = vpop.f32.mrb[56].mxu1  ;;  %3151 = vrot.lane.b32.xlu0 %v3147_v18, %s7774_s13  ;;  %v7362_v18 = vunpack.i.l.bf16 %v8724_v10  ;;  %v3671_v10 = vpack.c.bf16 %v7343_v30, %v7342_v59  ;;  %v3656_v41 = vpack.c.bf16 %v7388_v40, %v7387_v4  ;;  %v7422_v30 = vunpack.i.l.bf16 %v8765_v17  ;;  %v9988_v4 = vld [vmem:[#allocation16_spill] sm:$0xff] }
 0x957   : > { %v3296_v9 = vmax.f32 %v3221_v15, %v3289_v13  ;;  %v6885_v7 = vpop.f32.mrb[53].mxu0  ;;  %v6893_v62 = vpop.f32.mrb[57].mxu1  ;;  %v7368_v15 = vunpack.i.h.bf16 %v8747_v12  ;;  %v7367_v13 = vunpack.i.l.bf16 %v8747_v12  ;;  %v7357_v12 = vunpack.i.l.bf16 %v8745_v51 }
 0x958   : > { %v3224_v58 = vpop.f32.mrb[54].mxu0  ;;  %v3292_v21 = vpop.f32.mrb[58].mxu1  ;;  %v3655_v57 = vpack.c.bf16 %v7363_v61, %v7362_v18  ;;  %v7392_v7 = vunpack.i.l.bf16 %v8753_v19  ;;  %v7383_v51 = vunpack.i.h.bf16 %v8749_v6  ;;  %v7418_v61 = vunpack.i.h.bf16 %v8763_v46 }
 0x959   : > { %v3297_v52 = vmax.f32 %v3224_v58, %v3292_v21  ;;  %v6886_v8 = vpop.f32.mrb[55].mxu0  ;;  %v6894_v48 = vpop.f32.mrb[59].mxu1  ;;  %6901 = vmatprep.mubr.msk.f32.mxu0 %vm481_vm14, %v3296_v9  ;;  %6910 = vmatprep.mubr.msk.f32.mxu1 %vm481_vm14, %v3296_v9  ;;  %v7393_v9 = vunpack.i.h.bf16 %v8753_v19  ;;  %v9057_v62 = vpack.c.bf16 %v7368_v15, %v7367_v13  ;;  %v7397_v58 = vunpack.i.l.bf16 %v8755_v14  ;;  %v9987_v13 = vld [vmem:[#allocation6_spill] sm:$0xff] }
 0x95a   : > { %7555 = vrot.lane.b32.xlu1 %v8999_v43, %s7767_s28  ;;  %7550 = vrot.lane.b32.xlu0 %v8999_v43, %s7774_s13  ;;  %v3672_v21 = vpack.c.bf16 %v7358_v24, %v7357_v12  ;;  %v7403_v19 = vunpack.i.h.bf16 %v8757_v39  ;;  %v7413_v48 = vunpack.i.h.bf16 %v8761_v56  ;;  %v7407_v39 = vunpack.i.l.bf16 %v8759_v31  ;;  %v9105_v12 = vld [vmem:[%s9901_s4 + $0x24] ss:$16 sps:$4 sm:$0xff]  }
 0x95b   : > { %6902 = vmatmul.mubr.msk.f32.vlgmr.msra.gmra.mrb[56].mxu0 %vm481_vm14, %v3297_v52  ;;  %6911 = vmatmul.mubr.msk.f32.vlgmr.msra.gmra.mrb[60].mxu1 %vm481_vm14, %v3297_v52  ;;  %v9065_v3 = vpack.c.bf16 %v7393_v9, %v7392_v7  ;;  %v3657_v52 = vpack.c.bf16 %v7398_v38, %v7397_v58  ;;  %v7433_v15 = vunpack.i.h.bf16 %v8769_v26  ;;  %v9111_v9 = vld [vmem:[%s9901_s4 + $0x8] ss:$16 sps:$4 sm:$0xff]   ;;  %v9120_v7 = vld [vmem:[%s9901_s4 + $0x2c] ss:$16 sps:$4 sm:$0xff]   ;;  %v9989_v38 = vld [vmem:[#allocation9_spill] sm:$0xff] }
 0x95c   : > { %6310 = vmatpush3.bf16.msra.mxu0 %v3653_v60  ;;  %3773 = vmatpush1.bf16.msra.mxu1 %v8593_v50  ;;  %v7382_v60 = vunpack.i.l.bf16 %v8749_v6  ;;  %v9071_v8 = vpack.c.bf16 %v7403_v19, %v7402_v55  ;;  %v7412_v6 = vunpack.i.l.bf16 %v8761_v56  ;;  %v9990_v58 = vld [vmem:[#allocation17_spill] sm:$0xff] }
 0x95d   : > { %6311 = vmatprep.subr.bf16.mxu0 %v9021_v27  ;;  %3774 = vmatprep.subr.bf16.mxu1 %v9984_v20 }
 0x95e   : > { %7565 = vrot.lane.b32.xlu1 %v8999_v43, %s7766_s27  ;;  %7560 = vrot.lane.b32.xlu0 %v8999_v43, %s7770_s30  ;;  %v3673_v14 = vpack.c.bf16 %v7383_v51, %v7382_v60  ;;  %v9081_v59 = vpack.c.bf16 %v7413_v48, %v7412_v6  ;;  %v7437_v51 = vunpack.i.l.bf16 %v9990_v58  ;;  %v9991_v60 = vld [vmem:[#allocation18_spill] sm:$0xff]  ;;  %v9993_v48 = vld [vmem:[#allocation19_spill] sm:$0xff] }
 0x95f   : > { %3755 = vmatprep.mubr.bf16.mxu0 %v9026_v44  ;;  %6089 = vmatprep.mubr.msk.bf16.mxu1 %vm3716_vm0, %v9031_v29  ;;  %v7443_v19 = vunpack.i.h.bf16 %v9991_v60  ;;  %v7442_v55 = vunpack.i.l.bf16 %v9991_v60  ;;  %v7448_v6 = vunpack.i.h.bf16 %v9993_v48 }
 0x960   : > { %6312 = vmatpush3.bf16.msra.mxu0 %v3654_v25  ;;  %3775 = vmatpush1.bf16.msra.mxu1 %v3670_v42  ;;  %v7408_v25 = vunpack.i.h.bf16 %v8759_v31  ;;  %v7423_v42 = vunpack.i.h.bf16 %v8765_v17  ;;  %v7417_v31 = vunpack.i.l.bf16 %v8763_v46  ;;  %v7432_v17 = vunpack.i.l.bf16 %v8769_v26  ;;  %v9098_v46 = vld [vmem:[%s9901_s4] ss:$16 sps:$4 sm:$0xff]  }
 0x961   : > { %6313 = vmatprep.subr.bf16.mxu0 %v8618_v35  ;;  %3776 = vmatprep.subr.bf16.mxu1 %v9984_v20 }
 0x962   : > { %v3675_v56 = vpack.c.bf16 %v7408_v25, %v7407_v39  ;;  %v3659_v18 = vpack.c.bf16 %v7423_v42, %v7422_v30  ;;  %v3676_v40 = vpack.c.bf16 %v7418_v61, %v7417_v31  ;;  %v3660_v24 = vpack.c.bf16 %v7433_v15, %v7432_v17  ;;  %v9995_v39 = vld [vmem:[#allocation7_spill] sm:$0xff]  ;;  %v9996_v30 = vld [vmem:[#allocation20_spill] sm:$0xff] }
 0x963   : > { %v7447_v25 = vunpack.i.l.bf16 %v9993_v48  ;;  %v7452_v61 = vunpack.i.l.bf16 %v9996_v30 }
 0x964   : > { %6314 = vmatpush3.bf16.msra.mxu0 %v3655_v57  ;;  %3777 = vmatpush1.bf16.msra.mxu1 %v3671_v10  ;;  %v7428_v10 = vunpack.i.h.bf16 %v9988_v4  ;;  %v7427_v57 = vunpack.i.l.bf16 %v9988_v4  ;;  %v7513_v4 = vunpack.i.h.bf16 %v8977_v45 }
 0x965   : > { %6315 = vmatprep.subr.bf16.mxu0 %v9057_v62  ;;  %3778 = vmatprep.subr.bf16.mxu1 %v9984_v20  ;;  %v9166_v42 = vpack.c.bf16 %v7448_v6, %v7447_v25  ;;  %v7533_v25 = vunpack.i.h.bf16 %v8985_v54 }
 0x966   : > { %v3677_v26 = vpack.c.bf16 %v7428_v10, %v7427_v57  ;;  %v7512_v10 = vunpack.i.l.bf16 %v8977_v45 }
 0x968   : > { %6316 = vmatpush3.bf16.msra.mxu0 %v3656_v41  ;;  %3779 = vmatpush1.bf16.msra.mxu1 %v3672_v21  ;;  %v9126_v41 = vld [vmem:[%s9901_s4 + $0x20] ss:$16 sps:$4 sm:$0xff]   ;;  %v7438_v21 = vunpack.i.h.bf16 %v9990_v58  ;;  %v9203_v57 = vpack.c.bf16 %v7513_v4, %v7512_v10 }
 0x969   : > { %6317 = vmatprep.subr.bf16.mxu0 %v9065_v3  ;;  %3780 = vmatprep.subr.bf16.mxu1 %v9984_v20 }
 0x96c   : > { %6318 = vmatpush3.bf16.msra.mxu0 %v3657_v52  ;;  %3781 = vmatpush1.bf16.msra.mxu1 %v3673_v14  ;;  %v3881_v52 = vpack.c.bf16 %v7438_v21, %v7437_v51  ;;  %v9155_v14 = vpack.c.bf16 %v7443_v19, %v7442_v55 }
 0x96d   : > { %6319 = vmatprep.subr.bf16.mxu0 %v9071_v8  ;;  %3782 = vmatprep.subr.bf16.mxu1 %v9984_v20 }
 0x970   : > { %6320 = vmatpush3.bf16.msra.mxu0 %v8597_v36  ;;  %3783 = vmatpush1.bf16.msra.mxu1 %v8615_v16 }
 0x971   : > { %6321 = vmatprep.subr.bf16.mxu0 %v9081_v59  ;;  %3784 = vmatprep.subr.bf16.mxu1 %v9984_v20 }
 0x974   : > { %6322 = vmatpush3.bf16.msra.mxu0 %v3659_v18  ;;  %3785 = vmatpush1.bf16.msra.mxu1 %v3675_v56 }
 0x975   : > { %6323 = vmatprep.subr.bf16.mxu0 %v9987_v13  ;;  %3786 = vmatprep.subr.bf16.mxu1 %v9984_v20 }
 0x978   : > { %6324 = vmatpush3.bf16.msra.mxu0 %v3660_v24  ;;  %3787 = vmatpush1.bf16.msra.mxu1 %v3676_v40 }
 0x979   : > { %6337 = vmatprep.subr.bf16.mxu0 %v9071_v8  ;;  %3788 = vmatprep.subr.bf16.mxu1 %v9984_v20 }
 0x97b   : > { %3756 = vmatmul.mubr.bf16.vlgmr.msra.gmra.mrb[60].mxu0 %v9098_v46 }
 0x97c   : > { %3789 = vmatpush1.bf16.msra.mxu1 %v3677_v26  ;;  %6338 = vmatpush3.bf16.msra.mxu0 %v8597_v36  ;;  %v9137_v36 = vld [vmem:[%s9901_s4 + $0x28] ss:$16 sps:$4 sm:$0xff]  }
 0x97d   : > { %6339 = vmatprep.subr.bf16.mxu0 %v9081_v59  ;;  %3935 = vmatprep.subr.bf16.mxu1 %v9984_v20 }
 0x97e   : > { %3763 = vmatprep.mubr.bf16.mxu0 %v9105_v12 }
 0x97f   : > { %3805 = vmatmul.mubr.bf16.vlgmr.msra.gmra.mrb[64].mxu1 %v9111_v9 }
 0x980   : > { %6340 = vmatpush3.bf16.msra.mxu0 %v3659_v18  ;;  %3936 = vmatpush1.bf16.msra.mxu1 %v8615_v16  ;;  %v9997_v18 = vld [vmem:[#allocation21_spill] sm:$0xff] }
 0x981   : > { %6341 = vmatprep.subr.bf16.mxu0 %v9987_v13  ;;  %3937 = vmatprep.subr.bf16.mxu1 %v9984_v20  ;;  %v7458_v15 = vunpack.i.h.bf16 %v9997_v18  ;;  %v7457_v17 = vunpack.i.l.bf16 %v9997_v18  ;;  %v10006_v18 = vld [vmem:[#allocation15_spill] sm:$0xff] }
 0x982   : > { %6090 = vmatprep.mubr.msk.bf16.mxu1 %vm3716_vm0, %v9120_v7 }
 0x983   : > { %3764 = vmatmul.mubr.bf16.gmra.mrb[64].mxu0 %v9126_v41 }
 0x984   : > { %6342 = vmatpush3.bf16.msra.mxu0 %v3660_v24  ;;  %3938 = vmatpush1.bf16.msra.mxu1 %v3675_v56  ;;  %v7453_v56 = vunpack.i.h.bf16 %v9996_v30  ;;  %v7532_v30 = vunpack.i.l.bf16 %v8985_v54  ;;  %v10007_v54 = vld [vmem:[#allocation22_spill] sm:$0xff] }
 0x985   : > { %6343 = vmatprep.subr.bf16.mxu0 %v8593_v50  ;;  %3939 = vmatprep.subr.bf16.mxu1 %v9984_v20 }
 0x986   : > { %3918 = vmatprep.mubr.bf16.mxu0 %v9026_v44  ;;  %v9173_v31 = vpack.c.bf16 %v7453_v56, %v7452_v61 }
 0x987   : > { %3813 = vmatmul.mubr.bf16.gmra.mrb[68].mxu1 %v9137_v36 }
 0x988   : > { %6344 = vmatpush3.bf16.msra.mxu0 %v8947_v47  ;;  %3940 = vmatpush1.bf16.msra.mxu1 %v3676_v40  ;;  %v9992_v47 = vld [vmem:[#allocation10_spill] sm:$0xff]  ;;  %v9181_v40 = vpack.c.bf16 %v7458_v15, %v7457_v17  ;;  %v9243_v15 = vpack.c.bf16 %v7533_v25, %v7532_v30  ;;  %v9937_v17 = vmov 1.0  }
 0x989   : > { %6345 = vmatprep.subr.bf16.mxu0 %v9989_v38  ;;  %3941 = vmatprep.subr.bf16.mxu1 %v9984_v20 }
 0x98a   : > { %6091 = vmatprep.mubr.msk.bf16.mxu1 %vm3716_vm0, %v9031_v29 }
 0x98c   : > { %6346 = vmatpush3.bf16.msra.mxu0 %v9021_v27  ;;  %3942 = vmatpush1.bf16.msra.mxu1 %v3677_v26  ;;  %v9994_v27 = vld [vmem:[#allocation13_spill] sm:$0xff] }
 0x98d   : > { %6347 = vmatprep.subr.bf16.mxu0 %v9992_v47  ;;  %3943 = vmatprep.subr.bf16.mxu1 %v9984_v20 }
 0x990   : > { %6348 = vmatpush3.bf16.msra.mxu0 %v8618_v35  ;;  %3944 = vmatpush1.bf16.msra.mxu1 %v3881_v52  ;;  %v10002_v52 = vld [vmem:[#allocation14_spill] sm:$0xff] }
 0x991   : > { %6349 = vmatprep.subr.bf16.mxu0 %v9155_v14  ;;  %3945 = vmatprep.subr.bf16.mxu1 %v9984_v20 }
 0x994   : > { %6350 = vmatpush3.bf16.msra.mxu0 %v9057_v62  ;;  %3946 = vmatpush1.bf16.msra.mxu1 %v9994_v27 }
 0x995   : > { %6351 = vmatprep.subr.bf16.mxu0 %v9995_v39  ;;  %3947 = vmatprep.subr.bf16.mxu1 %v9984_v20 }
 0x998   : > { %6352 = vmatpush3.bf16.msra.mxu0 %v9065_v3  ;;  %3948 = vmatpush1.bf16.msra.mxu1 %v9166_v42 }
 0x999   : > { %3949 = vmatprep.subr.bf16.mxu1 %v9984_v20  ;;  %6913 = vmatprep.subr.msk.mxu0 %vm7890_vm5, %v9937_v17 }
 0x99b   : > { %3919 = vmatmul.mubr.bf16.vlgmr.msra.gmra.mrb[68].mxu0 %v9098_v46 }
 0x99c   : > { %3950 = vmatpush1.bf16.msra.mxu1 %v9173_v31  ;;  %3926 = vmatprep.mubr.bf16.mxu0 %v9105_v12 }
 0x99d   : > { %3951 = vmatprep.subr.bf16.mxu1 %v9984_v20  ;;  %6914 = vmatpush3.msk.msra.mxu0 %vm7890_vm5, %v9937_v17 }
 0x99e   : > { %6921 = vmatprep.subr.msk.mxu0 %vm7945_vm10, %v9937_v17 }
 0x9a0   : > { %3952 = vmatpush1.bf16.msra.mxu1 %v9181_v40 }
 0x9a1   : > { %6375 = vmatprep.subr.bf16.mxu1 %v9992_v47 }
 0x9a3   : > { %3968 = vmatmul.mubr.bf16.vlgmr.msra.gmra.mrb[72].mxu1 %v9111_v9  ;;  %3927 = vmatmul.mubr.bf16.gmra.mrb[72].mxu0 %v9126_v41 }
 0x9a4   : > { %6376 = vmatpush3.bf16.msra.mxu1 %v8618_v35  ;;  %6092 = vmatprep.mubr.msk.bf16.mxu1 %vm3716_vm0, %v9120_v7  ;;  %v9998_v35 = vld [vmem:[#allocation11_spill] sm:$0xff] }
 0x9a5   : > { %6377 = vmatprep.subr.bf16.mxu1 %v9155_v14 }
 0x9a8   : > { %6378 = vmatpush3.bf16.msra.mxu1 %v9057_v62  ;;  %v9999_v62 = vld [vmem:[#allocation12_spill] sm:$0xff] }
 0x9a9   : > { %6379 = vmatprep.subr.bf16.mxu1 %v9995_v39 }
 0x9ab   : > { %3976 = vmatmul.mubr.bf16.gmra.mrb[76].mxu1 %v9137_v36 }
 0x9ac   : > { %6380 = vmatpush3.bf16.msra.mxu1 %v9065_v3  ;;  %4324 = vmatprep.mubr.bf16.mxu1 %v9026_v44  ;;  %v10000_v3 = vld [vmem:[#allocation8_spill] sm:$0xff] }
 0x9ad   : > { %6381 = vmatprep.subr.bf16.mxu1 %v8615_v16 }
 0x9b0   : > { %6382 = vmatpush3.bf16.msra.mxu1 %v9071_v8 }
 0x9b1   : > { %6383 = vmatprep.subr.bf16.mxu1 %v9998_v35 }
 0x9b4   : > { %6384 = vmatpush3.bf16.msra.mxu1 %v9081_v59 }
 0x9b5   : > { %6385 = vmatprep.subr.bf16.mxu1 %v9999_v62 }
 0x9b8   : > { %6386 = vmatpush3.bf16.msra.mxu1 %v9987_v13 }
 0x9b9   : > { %6387 = vmatprep.subr.bf16.mxu1 %v9203_v57 }
 0x9bc   : > { %6388 = vmatpush3.bf16.msra.mxu1 %v8593_v50 }
 0x9bd   : > { %6389 = vmatprep.subr.bf16.mxu1 %v10000_v3 }
 0x9c0   : > { %6390 = vmatpush3.bf16.msra.mxu1 %v9989_v38 }
 0x9c1   : > { %6403 = vmatprep.subr.bf16.mxu1 %v9999_v62 }
 0x9c3   : > { %4325 = vmatmul.mubr.bf16.vlgmr.msra.gmra.mrb[80].mxu1 %v9098_v46 }
 0x9c4   : > { %6404 = vmatpush3.bf16.msra.mxu1 %v9987_v13  ;;  %4332 = vmatprep.mubr.bf16.mxu1 %v9105_v12 }
 0x9c5   : > { %6405 = vmatprep.subr.bf16.mxu1 %v9203_v57 }
 0x9c7   : > { %v3154_v45 = vpop.permute.xlu1 %3153 }
 0x9c8   : > { %6406 = vmatpush3.bf16.msra.mxu1 %v8593_v50  ;;  %3159 = vst.msk [vmem:[#allocation2 + $0x98] sm:$0xff] %vm669_vm6, %v3154_v45  ;;  %v3152_v8 = vpop.permute.xlu0 %3151 }
 0x9c9   : > { %6407 = vmatprep.subr.bf16.mxu1 %v10000_v3  ;;  %3158 = vst.msk [vmem:[#allocation2 + $0x90] sm:$0xff] %vm669_vm6, %v3152_v8 }
 0x9cb   : > { %4333 = vmatmul.mubr.bf16.gmra.mrb[84].mxu1 %v9126_v41 }
 0x9cc   : > { %6408 = vmatpush3.bf16.msra.mxu1 %v9989_v38  ;;  %v7556_v59 = vpop.permute.xlu1 %7555  ;;  %v7551_v13 = vpop.permute.xlu0 %7550  ;;  %4487 = vmatprep.mubr.bf16.mxu1 %v9026_v44 }
 0x9cd   : > { %v7558_v24 = vunpack.i.h.bf16 %v7556_v59  ;;  %v7557_v26 = vunpack.i.l.bf16 %v7556_v59  ;;  %6409 = vmatprep.subr.bf16.mxu1 %v9994_v27 }
 0x9cf   : > { %v9223_v50 = vpack.c.bf16 %v7558_v24, %v7557_v26  ;;  %v4919_v58 = vld [vmem:[#allocation2 + $0x98] sm:$0xff] }
 0x9d0   : > { %6410 = vmatpush3.bf16.msra.mxu1 %v9992_v47  ;;  %v7566_v21 = vpop.permute.xlu1 %7565  ;;  %v7561_v51 = vpop.permute.xlu0 %7560  ;;  %v4918_v60 = vld [vmem:[#allocation2 + $0x90] sm:$0xff] }
 0x9d1   : > { %10001 = vst [vmem:[#allocation5_spill] sm:$0xff] %v9223_v50  ;;  %v7568_v19 = vunpack.i.h.bf16 %v7566_v21  ;;  %v7567_v55 = vunpack.i.l.bf16 %v7566_v21  ;;  %6411 = vmatprep.subr.bf16.mxu1 %v10002_v52  ;;  %v7563_v38 = vunpack.i.h.bf16 %v7561_v51  ;;  %v7562_v48 = vunpack.i.l.bf16 %v7561_v51 }
 0x9d2   : > { %v9227_v6 = vpack.i.bf16 %v4919_v58, %v4918_v60  ;;  %v9238_v47 = vpack.c.bf16 %v4919_v58, %v4918_v60 }
 0x9d3   : > { %v9231_v56 = vpack.c.bf16 %v7568_v19, %v7567_v55  ;;  %v9233_v61 = vpack.c.bf16 %v7563_v38, %v7562_v48 }
 0x9d4   : > { %6412 = vmatpush3.bf16.msra.mxu1 %v9155_v14  ;;  %7575 = vrot.lane.b32.xlu1 %v9227_v6, %s7767_s28  ;;  %10005 = vst [vmem:[#allocation9_spill] sm:$0xff] %v9238_v47  ;;  %v10008_v14 = vld [vmem:[#allocation24_spill] sm:$0xff] }
 0x9d5   : > { %10003 = vst [vmem:[#allocation6_spill] sm:$0xff] %v9231_v56  ;;  %10004 = vst [vmem:[#allocation16_spill] sm:$0xff] %v9233_v61  ;;  %7570 = vrot.lane.b32.xlu0 %v9227_v6, %s7774_s13  ;;  %6413 = vmatprep.subr.bf16.mxu1 %v10006_v18 }
 0x9d8   : > { %6414 = vmatpush3.bf16.msra.mxu1 %v9995_v39  ;;  %7585 = vrot.lane.b32.xlu1 %v9227_v6, %s7766_s27 }
 0x9d9   : > { %7580 = vrot.lane.b32.xlu0 %v9227_v6, %s7770_s30  ;;  %6415 = vmatprep.subr.bf16.mxu1 %v9243_v15 }
 0x9dc   : > { %6416 = vmatpush3.bf16.msra.mxu1 %v8615_v16  ;;  %7595 = vrot.lane.b32.xlu1 %v7556_v59, %s7767_s28 }
 0x9dd   : > { %7590 = vrot.lane.b32.xlu0 %v7551_v13, %s7767_s28  ;;  %6417 = vmatprep.subr.bf16.mxu1 %v10007_v54 }
 0x9e0   : > { %6418 = vmatpush3.bf16.msra.mxu1 %v9998_v35  ;;  %7605 = vrot.lane.b32.xlu1 %v7561_v51, %s7767_s28 }
 0x9e1   : > { %7600 = vrot.lane.b32.xlu0 %v8785_v49, %s7769_s29  ;;  %6929 = vmatprep.subr.msk.mxu1 %vm7890_vm5, %v9937_v17 }
 0x9e3   : > { %4488 = vmatmul.mubr.bf16.vlgmr.msra.gmra.mrb[88].mxu1 %v9098_v46 }
 0x9e4   : > { %4495 = vmatprep.mubr.bf16.mxu1 %v9105_v12  ;;  %6930 = vmatpush3.msk.msra.mxu1 %vm7890_vm5, %v9937_v17 }
 0x9e5   : > { %7610 = vrot.lane.b32.xlu0 %v7566_v21, %s7767_s28  ;;  %6937 = vmatprep.subr.msk.mxu1 %vm7945_vm10, %v9937_v17 }
 0x9e9   : > { %7620 = vrot.lane.b32.xlu0 %v10008_v14, %s7769_s29 }
 0x9eb   : > { %4496 = vmatmul.mubr.bf16.gmra.mrb[92].mxu1 %v9126_v41 }
 0xa2e   : > { %v6903_v10 = vpop.f32.mrb[56].mxu0  ;;  %v6912_v45 = vpop.f32.mrb[60].mxu1 }
 0xa2f   : > { %v3455_v8 = vmax.f32 %v6903_v10, %v6912_v45  ;;  %v3370_v59 = vpop.f32.mrb[57].mxu0  ;;  %v3445_v13 = vpop.f32.mrb[61].mxu1 }
 0xa30   : > { %v3454_v24 = vmax.f32 %v3370_v59, %v3445_v13 }
 0xa31   : > { %v3457_v47 = vadd.f32 %v3455_v8, %v8355_v34 }
 0xa32   : > { %v3456_v10 = vadd.f32 %v3454_v24, %v8357_v37 }
 0xa34   : > { %v3458_v56 = vmax.f32 %v3456_v10, 0.0 }
 0xa46   : > { %v7576_v26 = vpop.permute.xlu1 %7575 }
 0xa47   : > { %v7578_v58 = vunpack.i.h.bf16 %v7576_v26  ;;  %v7577_v21 = vunpack.i.l.bf16 %v7576_v26  ;;  %v7571_v51 = vpop.permute.xlu0 %7570 }
 0xa48   : > { %7615 = vrot.lane.b32.xlu1 %v7571_v51, %s7767_s28 }
 0xa49   : > { %v9283_v60 = vpack.c.bf16 %v7578_v58, %v7577_v21 }
 0xa4a   : > { %v7586_v19 = vpop.permute.xlu1 %7585 }
 0xa4b   : > { %10011 = vst [vmem:[#allocation17_spill] sm:$0xff] %v9283_v60  ;;  %v7588_v55 = vunpack.i.h.bf16 %v7586_v19  ;;  %v7587_v38 = vunpack.i.l.bf16 %v7586_v19  ;;  %v7581_v48 = vpop.permute.xlu0 %7580 }
 0xa4c   : > { %v7583_v25 = vunpack.i.h.bf16 %v7581_v48  ;;  %v7582_v30 = vunpack.i.l.bf16 %v7581_v48  ;;  %7625 = vrot.lane.b32.xlu1 %v7576_v26, %s7767_s28  ;;  %7630 = vrot.lane.b32.xlu0 %v7581_v48, %s7767_s28  ;;  %v3459_v26 = vmax.f32 %v3457_v47, 0.0 }
 0xa4d   : > { %v9286_v14 = vpack.c.bf16 %v7588_v55, %v7587_v38 }
 0xa4e   : > { %v9289_v45 = vpack.c.bf16 %v7583_v25, %v7582_v30  ;;  %v6325_v59 = vpop.f32.mrb[60].mxu0 }
 0xa4f   : > { %10012 = vst [vmem:[#allocation18_spill] sm:$0xff] %v9286_v14  ;;  %v6326_v13 = vpop.f32.mrb[61].mxu0 }
 0xa50   : > { %10013 = vst [vmem:[#allocation10_spill] sm:$0xff] %v9289_v45  ;;  %v6327_v58 = vadd.f32 %v6326_v13, %v6325_v59  ;;  %v6328_v21 = vpop.f32.mrb[62].mxu0  ;;  %7635 = vrot.lane.b32.xlu1 %v7586_v19, %s7767_s28  ;;  %3462 = vrot.lane.b32.xlu0 %v3458_v56, %s7774_s13 }
 0xa51   : > { %v6329_v17 = vpop.f32.mrb[63].mxu0 }
 0xa52   : > { %v6330_v61 = vadd.f32 %v6329_v17, %v6328_v21  ;;  %v3806_v51 = vpop.f32.mrb[64].mxu1 }
 0xa53   : > { %v3807_v55 = vadd.f32 %v6327_v58, %v3806_v51  ;;  %v3808_v38 = vpop.f32.mrb[65].mxu1 }
 0xa54   : > { %v3809_v37 = vpop.f32.mrb[66].mxu1  ;;  %3464 = vrot.lane.b32.xlu1 %v3459_v26, %s7774_s13 }
 0xa55   : > { %v3810_v24 = vadd.f32 %v6330_v61, %v3809_v37  ;;  %v3811_v25 = vpop.f32.mrb[67].mxu1 }
 0xa56   : > { %v6331_v30 = vpop.f32.mrb[64].mxu0 }
 0xa57   : > { %v6332_v48 = vpop.f32.mrb[65].mxu0 }
 0xa58   : > { %v6333_v59 = vadd.f32 %v6332_v48, %v6331_v30  ;;  %v6334_v13 = vpop.f32.mrb[66].mxu0 }
 0xa59   : > { %v6335_v34 = vpop.f32.mrb[67].mxu0 }
 0xa5a   : > { %v6336_v8 = vadd.f32 %v6335_v34, %v6334_v13  ;;  %v3814_v17 = vpop.f32.mrb[68].mxu1 }
 0xa5b   : > { %v3815_v10 = vadd.f32 %v6333_v59, %v3814_v17  ;;  %v3816_v58 = vpop.f32.mrb[69].mxu1 }
 0xa5c   : > { %v3817_v21 = vpop.f32.mrb[70].mxu1 }
 0xa5d   : > { %v3818_v51 = vadd.f32 %v6336_v8, %v3817_v21  ;;  %v3819_v19 = vpop.f32.mrb[71].mxu1 }
 0xa6e   : > { %v6353_v38 = vpop.f32.mrb[68].mxu0 }
 0xa6f   : > { %v6354_v56 = vpop.f32.mrb[69].mxu0 }
 0xa70   : > { %v6355_v14 = vadd.f32 %v6354_v56, %v6353_v38  ;;  %v6356_v61 = vpop.f32.mrb[70].mxu0  ;;  %v10014_v38 = vmov 1.0  }
 0xa71   : > { %v6357_v37 = vpop.f32.mrb[71].mxu0 }
 0xa72   : > { %v6358_v47 = vadd.f32 %v6357_v37, %v6356_v61 }
 0xa76   : > { %v3969_v25 = vpop.f32.mrb[72].mxu1  ;;  %v6359_v45 = vpop.f32.mrb[72].mxu0 }
 0xa77   : > { %v3970_v60 = vadd.f32 %v6355_v14, %v3969_v25  ;;  %v3971_v26 = vpop.f32.mrb[73].mxu1  ;;  %v6360_v30 = vpop.f32.mrb[73].mxu0  ;;  %v7518_v25 = vunpack.i.h.bf16 %v8983_v33 }
 0xa78   : > { %v3972_v48 = vpop.f32.mrb[74].mxu1  ;;  %v6361_v50 = vadd.f32 %v6360_v30, %v6359_v45  ;;  %v6362_v13 = vpop.f32.mrb[74].mxu0  ;;  %v7523_v26 = vunpack.i.h.bf16 %v8981_v53  ;;  %v7522_v30 = vunpack.i.l.bf16 %v8981_v53 }
 0xa79   : > { %v3984_v59 = vmax.f32 %v3807_v55, %v3970_v60  ;;  %v3973_v34 = vadd.f32 %v6358_v47, %v3972_v48  ;;  %v3974_v17 = vpop.f32.mrb[75].mxu1  ;;  %v6363_v8 = vpop.f32.mrb[75].mxu0  ;;  %v10015_v47 = vld [vmem:[#allocation23_spill] sm:$0xff] }
 0xa7a   : > { %v6364_v58 = vadd.f32 %v6363_v8, %v6362_v13  ;;  %v9333_v48 = vpop.permute.xlu0 %7590  ;;  %v9343_v53 = vpop.permute.xlu1 %7595  ;;  %v7528_v13 = vunpack.i.h.bf16 %v8987_v11 }
 0xa7b   : > { %v3985_v21 = vmax.f32 %v3810_v24, %v3973_v34  ;;  %6915 = vmatprep.mubr.msk.f32.mxu0 %vm3988_vm1, %v3984_v59  ;;  %v7502_v24 = vunpack.i.l.bf16 %v8975_v32 }
 0xa7d   : > { %6916 = vmatmul.mubr.msk.f32.vlgmr.msra.gmra.mrb[58].mxu0 %vm3988_vm1, %v3985_v21 }
 0xa7e   : > { %v3977_v19 = vpop.f32.mrb[76].mxu1  ;;  %6922 = vmatpush3.msk.msra.mxu0 %vm7945_vm10, %v10014_v38  ;;  %v9353_v17 = vpop.permute.xlu1 %7605 }
 0xa7f   : > { %v3978_v14 = vadd.f32 %v6361_v50, %v3977_v19  ;;  %v3979_v56 = vpop.f32.mrb[77].mxu1  ;;  %4341 = vmatprep.subr.bf16.mxu0 %v9984_v20  ;;  %v7503_v50 = vunpack.i.h.bf16 %v8975_v32  ;;  %v7517_v32 = vunpack.i.l.bf16 %v8983_v33  ;;  %v9340_v33 = vpop.permute.xlu0 %7600  ;;  %v7537_v19 = vunpack.i.l.bf16 %v8989_v1 }
 0xa80   : > { %v3980_v45 = vpop.f32.mrb[78].mxu1 }
 0xa81   : > { %v3986_v60 = vmax.f32 %v3815_v10, %v3978_v14  ;;  %v3981_v55 = vadd.f32 %v6364_v58, %v3980_v45  ;;  %v3982_v61 = vpop.f32.mrb[79].mxu1  ;;  %v4287_v10 = vpack.c.bf16 %v7503_v50, %v7502_v24  ;;  %v7543_v45 = vunpack.i.h.bf16 %v8991_v63 }
 0xa82   : > { %v7547_v50 = vunpack.i.l.bf16 %v8993_v23 }
 0xa83   : > { %v3987_v37 = vmax.f32 %v3818_v51, %v3981_v55  ;;  %6918 = vmatprep.mubr.msk.f32.mxu0 %vm3988_vm1, %v3986_v60  ;;  %v7507_v51 = vunpack.i.l.bf16 %v8979_v28  ;;  %v9351_v34 = vpop.permute.xlu0 %7610 }
 0xa85   : > { %6919 = vmatmul.mubr.msk.f32.gmra.mrb[76].mxu0 %vm3988_vm1, %v3987_v37 }
 0xa86   : > { %6923 = vmatprep.mubr.msk.f32.mxu0 %vm3988_vm1, %v3984_v59  ;;  %v7527_v59 = vunpack.i.l.bf16 %v8987_v11 }
 0xa87   : > { %v9356_v58 = vpop.permute.xlu0 %7620 }
 0xa88   : > { %v4450_v8 = vpack.c.bf16 %v7528_v13, %v7527_v59 }
 0xa89   : > { %6924 = vmatmul.mubr.msk.f32.vlgmr.msra.gmra.mrb[78].mxu0 %vm3988_vm1, %v3985_v21 }
 0xa8a   : > { %4342 = vmatpush1.bf16.msra.mxu0 %v9994_v27  ;;  %6926 = vmatprep.mubr.msk.f32.mxu0 %vm3988_vm1, %v3986_v60  ;;  %v7542_v60 = vunpack.i.l.bf16 %v8991_v63 }
 0xa8b   : > { %4343 = vmatprep.subr.bf16.mxu0 %v9984_v20 }
 0xa8d   : > { %6927 = vmatmul.mubr.msk.f32.gmra.mrb[80].mxu0 %vm3988_vm1, %v3987_v37  ;;  %v7548_v37 = vunpack.i.h.bf16 %v8993_v23 }
 0xa8e   : > { %4344 = vmatpush1.bf16.msra.mxu0 %v9166_v42  ;;  %6103 = vmatprep.mubr.msk.bf16.mxu0 %vm3716_vm0, %v9031_v29  ;;  %v7508_v42 = vunpack.i.h.bf16 %v8979_v28  ;;  %v4291_v28 = vpack.c.bf16 %v7523_v26, %v7522_v30 }
 0xa8f   : > { %4345 = vmatprep.subr.bf16.mxu0 %v9984_v20  ;;  %v9385_v63 = vpack.c.bf16 %v7548_v37, %v7547_v50 }
 0xa92   : > { %4346 = vmatpush1.bf16.msra.mxu0 %v9173_v31  ;;  %v4289_v31 = vpack.c.bf16 %v7508_v42, %v7507_v51 }
 0xa93   : > { %4347 = vmatprep.subr.bf16.mxu0 %v9984_v20 }
 0xa96   : > { %4348 = vmatpush1.bf16.msra.mxu0 %v9181_v40  ;;  %v4290_v40 = vpack.c.bf16 %v7518_v25, %v7517_v32  ;;  %v6391_v32 = vpop.f32.mrb[80].mxu1 }
 0xa97   : > { %4349 = vmatprep.subr.bf16.mxu0 %v9984_v20 }
 0xa9a   : > { %4350 = vmatpush1.bf16.msra.mxu0 %v4287_v10 }
 0xa9b   : > { %4351 = vmatprep.subr.bf16.mxu0 %v9984_v20 }
 0xa9e   : > { %4352 = vmatpush1.bf16.msra.mxu0 %v10015_v47 }
 0xa9f   : > { %4353 = vmatprep.subr.bf16.mxu0 %v9984_v20 }
 0xaa2   : > { %4354 = vmatpush1.bf16.msra.mxu0 %v4289_v31 }
 0xaa3   : > { %4355 = vmatprep.subr.bf16.mxu0 %v9984_v20 }
 0xaa6   : > { %4356 = vmatpush1.bf16.msra.mxu0 %v4290_v40 }
 0xaa7   : > { %4357 = vmatprep.subr.bf16.mxu0 %v9984_v20 }
 0xaaa   : > { %4358 = vmatpush1.bf16.msra.mxu0 %v4291_v28 }
 0xaab   : > { %4504 = vmatprep.subr.bf16.mxu0 %v9984_v20 }
 0xaad   : > { %4374 = vmatmul.mubr.bf16.vlgmr.msra.gmra.mrb[84].mxu0 %v9111_v9 }
 0xaae   : > { %4505 = vmatpush1.bf16.msra.mxu0 %v10015_v47  ;;  %6104 = vmatprep.mubr.msk.bf16.mxu0 %vm3716_vm0, %v9120_v7 }
 0xaaf   : > { %4506 = vmatprep.subr.bf16.mxu0 %v9984_v20 }
 0xab2   : > { %4507 = vmatpush1.bf16.msra.mxu0 %v4289_v31  ;;  %v7602_v31 = vunpack.i.l.bf16 %v9340_v33 }
 0xab3   : > { %4508 = vmatprep.subr.bf16.mxu0 %v9984_v20 }
 0xab5   : > { %4382 = vmatmul.mubr.bf16.gmra.mrb[88].mxu0 %v9137_v36 }
 0xab6   : > { %4509 = vmatpush1.bf16.msra.mxu0 %v4290_v40  ;;  %6105 = vmatprep.mubr.msk.bf16.mxu0 %vm3716_vm0, %v9031_v29  ;;  %v7538_v29 = vunpack.i.h.bf16 %v8989_v1  ;;  %v9378_v1 = vpack.c.bf16 %v7543_v45, %v7542_v60  ;;  %v6392_v40 = vpop.f32.mrb[81].mxu1 }
 0xab7   : > { %4510 = vmatprep.subr.bf16.mxu0 %v9984_v20  ;;  %v6394_v26 = vpop.f32.mrb[82].mxu1 }
 0xab8   : > { %v9369_v56 = vpack.c.bf16 %v7538_v29, %v7537_v19  ;;  %v6395_v30 = vpop.f32.mrb[83].mxu1 }
 0xaba   : > { %4511 = vmatpush1.bf16.msra.mxu0 %v4291_v28  ;;  %v9358_v21 = vpop.permute.xlu1 %7615  ;;  %v9433_v28 = vadd.f32 %v6395_v30, %v6394_v26 }
 0xabb   : > { %4512 = vmatprep.subr.bf16.mxu0 %v9984_v20 }
 0xabe   : > { %4513 = vmatpush1.bf16.msra.mxu0 %v4450_v8  ;;  %v9364_v11 = vpop.permute.xlu1 %7625  ;;  %v9366_v14 = vpop.permute.xlu0 %7630 }
 0xabf   : > { %4514 = vmatprep.subr.bf16.mxu0 %v9984_v20 }
 0xac2   : > { %4515 = vmatpush1.bf16.msra.mxu0 %v8953_v0  ;;  %v9374_v55 = vpop.permute.xlu1 %7635  ;;  %v3463_v61 = vpop.permute.xlu0 %3462 }
 0xac3   : > { %4516 = vmatprep.subr.bf16.mxu0 %v9984_v20  ;;  %3469 = vst.msk [vmem:[#allocation2 + $0xa0] sm:$0xff] %vm669_vm6, %v3463_v61 }
 0xac6   : > { %4517 = vmatpush1.bf16.msra.mxu0 %v9369_v56  ;;  %v3465_v24 = vpop.permute.xlu1 %3464 }
 0xac7   : > { %4518 = vmatprep.subr.bf16.mxu0 %v9984_v20  ;;  %3470 = vst.msk [vmem:[#allocation2 + $0xa8] sm:$0xff] %vm669_vm6, %v3465_v24 }
 0xaca   : > { %4519 = vmatpush1.bf16.msra.mxu0 %v9378_v1  ;;  %v9391_v10 = vld [vmem:[#allocation2 + $0xa0] sm:$0xff] }
 0xacb   : > { %4520 = vmatprep.subr.bf16.mxu0 %v9984_v20 }
 0xace   : > { %4521 = vmatpush1.bf16.msra.mxu0 %v9385_v63  ;;  %v9393_v23 = vld [vmem:[#allocation2 + $0xa8] sm:$0xff] }
 0xacf   : > { %6441 = vmatprep.subr.bf16.mxu0 %v10006_v18  ;;  %v7644_v42 = vpack.i.bf16 %v9393_v23, %v9391_v10  ;;  %v5506_v51 = vpack.c.bf16 %v9393_v23, %v9391_v10 }
 0xad1   : > { %4537 = vmatmul.mubr.bf16.vlgmr.msra.gmra.mrb[92].mxu0 %v9111_v9  ;;  %7645 = vrot.lane.b32.xlu1 %v7644_v42, %s7767_s28  ;;  %v5447_v9 = vld [vmem:[#allocation2 + $0xb0] sm:$0xff] }
 0xad2   : > { %6442 = vmatpush3.bf16.msra.mxu0 %v9995_v39  ;;  %6106 = vmatprep.mubr.msk.bf16.mxu0 %vm3716_vm0, %v9120_v7  ;;  %v5448_v39 = vld [vmem:[#allocation2 + $0xb8] sm:$0xff] }
 0xad3   : > { %6443 = vmatprep.subr.bf16.mxu0 %v9243_v15  ;;  %7640 = vrot.lane.b32.xlu0 %v7644_v42, %s7774_s13  ;;  %v7664_v7 = vpack.i.bf16 %v5448_v39, %v5447_v9 }
 0xad5   : > { %7655 = vrot.lane.b32.xlu1 %v7644_v42, %s7766_s27 }
 0xad6   : > { %6444 = vmatpush3.bf16.msra.mxu0 %v8615_v16  ;;  %v10016_v16 = vld [vmem:[#allocation26_spill] sm:$0xff] }
 0xad7   : > { %6445 = vmatprep.subr.bf16.mxu0 %v10007_v54  ;;  %7650 = vrot.lane.b32.xlu0 %v7644_v42, %s7770_s30 }
 0xad9   : > { %4545 = vmatmul.mubr.bf16.gmra.mrb[96].mxu0 %v9137_v36  ;;  %7665 = vrot.lane.b32.xlu1 %v7664_v7, %s7767_s28  ;;  %v7603_v36 = vunpack.i.h.bf16 %v9340_v33  ;;  %v7622_v33 = vunpack.i.l.bf16 %v9356_v58 }
 0xada   : > { %6446 = vmatpush3.bf16.msra.mxu0 %v9998_v35  ;;  %4852 = vmatprep.mubr.bf16.mxu0 %v9026_v44  ;;  %v10017_v35 = vld [vmem:[#allocation25_spill] sm:$0xff] }
 0xadb   : > { %6447 = vmatprep.subr.bf16.mxu0 %v10015_v47  ;;  %7660 = vrot.lane.b32.xlu0 %v7664_v7, %s7774_s13  ;;  %v9422_v25 = vpack.c.bf16 %v7603_v36, %v7602_v31 }
 0xadd   : > { %7675 = vrot.lane.b32.xlu1 %v7664_v7, %s7766_s27 }
 0xade   : > { %6448 = vmatpush3.bf16.msra.mxu0 %v9999_v62  ;;  %v10018_v62 = vld [vmem:[#allocation27_spill] sm:$0xff] }
 0xadf   : > { %6449 = vmatprep.subr.bf16.mxu0 %v10016_v16  ;;  %7670 = vrot.lane.b32.xlu0 %v7664_v7, %s7770_s30 }
 0xae2   : > { %6450 = vmatpush3.bf16.msra.mxu0 %v9203_v57  ;;  %v9430_v57 = vadd.f32 %v6392_v40, %v6391_v32 }
 0xae3   : > { %6451 = vmatprep.subr.bf16.mxu0 %v10017_v35 }
 0xae6   : > { %6452 = vmatpush3.bf16.msra.mxu0 %v10000_v3 }
 0xae7   : > { %6453 = vmatprep.subr.bf16.mxu0 %v9422_v25 }
 0xaea   : > { %6454 = vmatpush3.bf16.msra.mxu0 %v9994_v27 }
 0xaeb   : > { %6455 = vmatprep.subr.bf16.mxu0 %v10018_v62 }
 0xaee   : > { %6456 = vmatpush3.bf16.msra.mxu0 %v10002_v52 }
 0xaef   : > { %6469 = vmatprep.subr.bf16.mxu0 %v10017_v35 }
 0xaf1   : > { %4853 = vmatmul.mubr.bf16.vlgmr.msra.gmra.mrb[100].mxu0 %v9098_v46 }
 0xaf2   : > { %6470 = vmatpush3.bf16.msra.mxu0 %v10000_v3  ;;  %4860 = vmatprep.mubr.bf16.mxu0 %v9105_v12  ;;  %v7623_v3 = vunpack.i.h.bf16 %v9356_v58 }
 0xaf3   : > { %6471 = vmatprep.subr.bf16.mxu0 %v9422_v25 }
 0xaf4   : > { %v9450_v59 = vpack.c.bf16 %v7623_v3, %v7622_v33 }
 0xaf6   : > { %6472 = vmatpush3.bf16.msra.mxu0 %v9994_v27  ;;  %v6397_v27 = vpop.f32.mrb[84].mxu1 }
 0xaf7   : > { %6473 = vmatprep.subr.bf16.mxu0 %v10018_v62  ;;  %v6398_v13 = vpop.f32.mrb[85].mxu1 }
 0xaf9   : > { %4861 = vmatmul.mubr.bf16.gmra.mrb[104].mxu0 %v9126_v41 }
 0xafa   : > { %6474 = vmatpush3.bf16.msra.mxu0 %v10002_v52  ;;  %5015 = vmatprep.mubr.bf16.mxu0 %v9026_v44  ;;  %v9452_v52 = vadd.f32 %v6398_v13, %v6397_v27  ;;  %v6400_v44 = vpop.f32.mrb[86].mxu1 }
 0xafb   : > { %6475 = vmatprep.subr.bf16.mxu0 %v8953_v0 }
 0xafe   : > { %6476 = vmatpush3.bf16.msra.mxu0 %v10006_v18  ;;  %v6401_v18 = vpop.f32.mrb[87].mxu1 }
 0xaff   : > { %6477 = vmatprep.subr.bf16.mxu0 %v8964_v22  ;;  %v9456_v8 = vadd.f32 %v6401_v18, %v6400_v44 }
 0xb02   : > { %6478 = vmatpush3.bf16.msra.mxu0 %v9243_v15  ;;  %v6419_v15 = vpop.f32.mrb[88].mxu1 }
 0xb03   : > { %6479 = vmatprep.subr.bf16.mxu0 %v8962_v5  ;;  %v6420_v58 = vpop.f32.mrb[89].mxu1 }
 0xb04   : > { %v9460_v29 = vadd.f32 %v6420_v58, %v6419_v15  ;;  %v6422_v19 = vpop.f32.mrb[90].mxu1 }
 0xb05   : > { %v6423_v45 = vpop.f32.mrb[91].mxu1 }
 0xb06   : > { %6480 = vmatpush3.bf16.msra.mxu0 %v10007_v54  ;;  %v9463_v60 = vadd.f32 %v6423_v45, %v6422_v19  ;;  %v6425_v61 = vpop.f32.mrb[92].mxu1 }
 0xb07   : > { %6481 = vmatprep.subr.bf16.mxu0 %v9450_v59  ;;  %v6426_v37 = vpop.f32.mrb[93].mxu1 }
 0xb08   : > { %v6428_v50 = vpop.f32.mrb[94].mxu1  ;;  %v9477_v24 = vadd.f32 %v6426_v37, %v6425_v61  ;;  %v3480_v61 = vld [vmem:[%s9902_s5 + $0x8] sm:$0xff] }
 0xb09   : > { %v6429_v42 = vpop.f32.mrb[95].mxu1 }
 0xb0a   : > { %6482 = vmatpush3.bf16.msra.mxu0 %v10015_v47  ;;  %v9479_v9 = vadd.f32 %v6429_v42, %v6428_v50 }
 0xb0b   : > { %6483 = vmatprep.subr.bf16.mxu0 %v8997_v2 }
 0xb0e   : > { %6484 = vmatpush3.bf16.msra.mxu0 %v10016_v16 }
 0xb0f   : > { %6945 = vmatprep.subr.msk.mxu0 %vm7890_vm5, %v10014_v38 }
 0xb11   : > { %5016 = vmatmul.mubr.bf16.vlgmr.msra.gmra.mrb[108].mxu0 %v9098_v46 }
 0xb12   : > { %5023 = vmatprep.mubr.bf16.mxu0 %v9105_v12  ;;  %6946 = vmatpush3.msk.msra.mxu0 %vm7890_vm5, %v10014_v38 }
 0xb13   : > { %6953 = vmatprep.subr.msk.mxu0 %vm7945_vm10, %v10014_v38 }
 0xb19   : > { %5024 = vmatmul.mubr.bf16.gmra.mrb[112].mxu0 %v9126_v41 }
 0xb43   : > { %v7646_v46 = vpop.permute.xlu1 %7645 }
 0xb44   : > { %v7648_v39 = vunpack.i.h.bf16 %v7646_v46  ;;  %v7647_v7 = vunpack.i.l.bf16 %v7646_v46  ;;  %7690 = vrot.lane.b32.xlu1 %v7646_v46, %s7767_s28  ;;  %v3481_v46 = vld [vmem:[%s9902_s5 + $0x10] sm:$0xff] }
 0xb45   : > { %v7641_v12 = vpop.permute.xlu0 %7640 }
 0xb46   : > { %v9481_v36 = vpack.c.bf16 %v7648_v39, %v7647_v7  ;;  %7680 = vrot.lane.b32.xlu0 %v7641_v12, %s7767_s28  ;;  %v3482_v39 = vld [vmem:[%s9902_s5 + $0x18] sm:$0xff]  ;;  %v3483_v7 = vld [vmem:[%s266_s23] sm:$0xff] }
 0xb47   : > { %v7656_v31 = vpop.permute.xlu1 %7655 }
 0xb49   : > { %v7651_v32 = vpop.permute.xlu0 %7650 }
 0xb4a   : > { %7685 = vrot.lane.b32.xlu0 %v8999_v43, %s7769_s29  ;;  %7695 = vrot.lane.b32.xlu1 %v7651_v32, %s7767_s28  ;;  %v3485_v32 = vld [vmem:[%s266_s23 + $0x10] sm:$0xff] }
 0xb4b   : > { %v7666_v41 = vpop.permute.xlu1 %7665 }
 0xb4c   : > { %v7668_v30 = vunpack.i.h.bf16 %v7666_v41  ;;  %v7667_v3 = vunpack.i.l.bf16 %v7666_v41 }
 0xb4d   : > { %v7661_v40 = vpop.permute.xlu0 %7660 }
 0xb4e   : > { %v9492_v27 = vpack.c.bf16 %v7668_v30, %v7667_v3  ;;  %7700 = vrot.lane.b32.xlu0 %v7656_v31, %s7767_s28  ;;  %7705 = vrot.lane.b32.xlu1 %v7661_v40, %s7767_s28  ;;  %v3484_v31 = vld [vmem:[%s266_s23 + $0x8] sm:$0xff] }
 0xb4f   : > { %v7676_v13 = vpop.permute.xlu1 %7675 }
 0xb50   : > { %v9487_v26 = vpop.f32.mrb[58].mxu0 }
 0xb51   : > { %v9490_v33 = vpop.f32.mrb[59].mxu0  ;;  %v7671_v44 = vpop.permute.xlu0 %7670 }
 0xb52   : > { %7710 = vrot.lane.b32.xlu0 %v9227_v6, %s7769_s29  ;;  %7715 = vrot.lane.b32.xlu1 %v7666_v41, %s7767_s28  ;;  %v3479_v6 = vld [vmem:[%s9902_s5] sm:$0xff]  ;;  %v3486_v41 = vld [vmem:[%s266_s23 + $0x18] sm:$0xff] }
 0xb56   : > { %7720 = vrot.lane.b32.xlu0 %v7671_v44, %s7767_s28  ;;  %7725 = vrot.lane.b32.xlu1 %v7676_v13, %s7767_s28 }
 0xb58   : > { %v9498_v43 = vpop.f32.mrb[76].mxu0 }
 0xb59   : > { %v9501_v18 = vpop.f32.mrb[77].mxu0 }
 0xb5a   : > { %4177 = vperm.xlu0 %7282, %v3479_v6   ;;  %4182 = vperm.xlu1 %7283, %v3480_v61  }
 0xb5c   : > { %v9504_v15 = vpop.f32.mrb[78].mxu0 }
 0xb5d   : > { %v9509_v19 = vpop.f32.mrb[79].mxu0 }
 0xb5e   : > { %4187 = vperm.xlu0 %7282, %v3481_v46   ;;  %4192 = vperm.xlu1 %7283, %v3482_v39  }
 0xb60   : > { %v9520_v37 = vpop.f32.mrb[80].mxu0 }
 0xb61   : > { %v9524_v42 = vpop.f32.mrb[81].mxu0 }
 0xb62   : > { %4201 = vperm.xlu0 %7282, %v3483_v7   ;;  %4206 = vperm.xlu1 %7283, %v3484_v31  }
 0xb66   : > { %4211 = vperm.xlu0 %7282, %v3485_v32   ;;  %4216 = vperm.xlu1 %7283, %v3486_v41  }
 0xb80   : > { %v4375_v40 = vpop.f32.mrb[84].mxu0 }
 0xb81   : > { %v4376_v30 = vadd.f32 %v9430_v57, %v4375_v40  ;;  %v4377_v3 = vpop.f32.mrb[85].mxu0 }
 0xb82   : > { %v4378_v13 = vpop.f32.mrb[86].mxu0 }
 0xb83   : > { %v4379_v44 = vadd.f32 %v9433_v28, %v4378_v13  ;;  %v4380_v6 = vpop.f32.mrb[87].mxu0  ;;  %v7597_v13 = vunpack.i.l.bf16 %v9343_v53 }
 0xb84   : > { %v7608_v6 = vunpack.i.h.bf16 %v9353_v17 }
 0xb88   : > { %v4383_v61 = vpop.f32.mrb[88].mxu0 }
 0xb89   : > { %v4384_v46 = vadd.f32 %v9452_v52, %v4383_v61  ;;  %v4385_v39 = vpop.f32.mrb[89].mxu0  ;;  %v7613_v61 = vunpack.i.h.bf16 %v9351_v34 }
 0xb8a   : > { %v4386_v12 = vpop.f32.mrb[90].mxu0  ;;  %v9591_v39 = vld [vmem:[%s9901_s4 + $0x8] ss:$16 sps:$4 sm:$0xff]  }
 0xb8b   : > { %v4387_v7 = vadd.f32 %v9456_v8, %v4386_v12  ;;  %v4388_v31 = vpop.f32.mrb[91].mxu0 }
 0xb8c   : > { %v7617_v31 = vunpack.i.l.bf16 %v9358_v21 }
 0xba4   : > { %v4538_v50 = vpop.f32.mrb[92].mxu0 }
 0xba5   : > { %v4539_v32 = vadd.f32 %v9460_v29, %v4538_v50  ;;  %v4540_v41 = vpop.f32.mrb[93].mxu0 }
 0xba6   : > { %v4541_v45 = vpop.f32.mrb[94].mxu0  ;;  %v7628_v41 = vunpack.i.h.bf16 %v9364_v11 }
 0xba7   : > { %v4553_v58 = vmax.f32 %v4376_v30, %v4539_v32  ;;  %v4542_v57 = vadd.f32 %v9463_v60, %v4541_v45  ;;  %v4543_v40 = vpop.f32.mrb[95].mxu0  ;;  %v7598_v30 = vunpack.i.h.bf16 %v9343_v53 }
 0xba8   : > { %v10020_v40 = vld [vmem:[#allocation17_spill] sm:$0xff] }
 0xba9   : > { %v4554_v3 = vmax.f32 %v4379_v44, %v4542_v57  ;;  %6931 = vmatprep.mubr.msk.f32.mxu1 %vm3988_vm1, %v4553_v58  ;;  %v10019_v44 = vld [vmem:[#allocation5_spill] sm:$0xff]  ;;  %v7627_v57 = vunpack.i.l.bf16 %v9364_v11  ;;  %v7637_v11 = vunpack.i.l.bf16 %v9374_v55 }
 0xbab   : > { %6932 = vmatmul.mubr.msk.f32.vlgmr.msra.gmra.mrb[62].mxu1 %vm3988_vm1, %v4554_v3 }
 0xbac   : > { %v4546_v28 = vpop.f32.mrb[96].mxu0  ;;  %6938 = vmatpush3.msk.msra.mxu1 %vm7945_vm10, %v10014_v38 }
 0xbad   : > { %v4547_v52 = vadd.f32 %v9477_v24, %v4546_v28  ;;  %v4548_v8 = vpop.f32.mrb[97].mxu0  ;;  %4869 = vmatprep.subr.bf16.mxu1 %v9984_v20  ;;  %v9565_v24 = vld [vmem:[%s9901_s4 + $0xc] ss:$16 sps:$4 sm:$0xff]   ;;  %v7633_v28 = vunpack.i.h.bf16 %v9366_v14 }
 0xbae   : > { %v4549_v29 = vpop.f32.mrb[98].mxu0  ;;  %v7638_v8 = vunpack.i.h.bf16 %v9374_v55  ;;  %v7753_v55 = vld [vmem:[%s9901_s4 + $0x4] ss:$16 sps:$4 sm:$0xff]  }
 0xbaf   : > { %v4555_v50 = vmax.f32 %v4384_v46, %v4547_v52  ;;  %v4550_v60 = vadd.f32 %v9479_v9, %v4549_v29  ;;  %v4551_v45 = vpop.f32.mrb[99].mxu0  ;;  %v7593_v9 = vunpack.i.h.bf16 %v9333_v48  ;;  %v7612_v46 = vunpack.i.l.bf16 %v9351_v34  ;;  %v9598_v34 = vld [vmem:[%s9901_s4 + $0x2c] ss:$16 sps:$4 sm:$0xff]  }
 0xbb0   : > { %v9633_v29 = vpack.c.bf16 %v7638_v8, %v7637_v11  ;;  %v10022_v45 = vld [vmem:[#allocation6_spill] sm:$0xff] }
 0xbb1   : > { %v4556_v12 = vmax.f32 %v4387_v7, %v4550_v60  ;;  %6934 = vmatprep.mubr.msk.f32.mxu1 %vm3988_vm1, %v4555_v50  ;;  %v4819_v53 = vpack.c.bf16 %v7613_v61, %v7612_v46  ;;  %v7618_v7 = vunpack.i.h.bf16 %v9358_v21  ;;  %v7632_v21 = vunpack.i.l.bf16 %v9366_v14  ;;  %v10025_v46 = vld [vmem:[#allocation18_spill] sm:$0xff] }
 0xbb3   : > { %6935 = vmatmul.mubr.msk.f32.gmra.mrb[96].mxu1 %vm3988_vm1, %v4556_v12  ;;  %v4978_v32 = vpack.c.bf16 %v7618_v7, %v7617_v31  ;;  %v9627_v52 = vpack.c.bf16 %v7633_v28, %v7632_v21 }
 0xbb4   : > { %6939 = vmatprep.mubr.msk.f32.mxu1 %vm3988_vm1, %v4553_v58  ;;  %v7592_v58 = vunpack.i.l.bf16 %v9333_v48  ;;  %v7607_v48 = vunpack.i.l.bf16 %v9353_v17  ;;  %v9607_v17 = vld [vmem:[%s9901_s4 + $0x28] ss:$16 sps:$4 sm:$0xff]  }
 0xbb7   : > { %6940 = vmatmul.mubr.msk.f32.vlgmr.msra.gmra.mrb[98].mxu1 %vm3988_vm1, %v4554_v3  ;;  %v9621_v3 = vpack.c.bf16 %v7628_v41, %v7627_v57 }
 0xbb8   : > { %4870 = vmatpush1.bf16.msra.mxu1 %v8953_v0  ;;  %6942 = vmatprep.mubr.msk.f32.mxu1 %vm3988_vm1, %v4555_v50  ;;  %v9644_v14 = vpop.permute.xlu0 %7680  ;;  %v10021_v50 = vld [vmem:[#allocation16_spill] sm:$0xff] }
 0xbb9   : > { %4871 = vmatprep.subr.bf16.mxu1 %v9984_v20 }
 0xbbb   : > { %6943 = vmatmul.mubr.msk.f32.gmra.mrb[100].mxu1 %vm3988_vm1, %v4556_v12 }
 0xbbc   : > { %4872 = vmatpush1.bf16.msra.mxu1 %v9369_v56  ;;  %6117 = vmatprep.mubr.msk.bf16.mxu1 %vm3716_vm0, %v9565_v24  ;;  %v4815_v56 = vpack.c.bf16 %v7593_v9, %v7592_v58  ;;  %v10023_v9 = vld [vmem:[#allocation9_spill] sm:$0xff] }
 0xbbd   : > { %4873 = vmatprep.subr.bf16.mxu1 %v9984_v20 }
 0xbc0   : > { %4874 = vmatpush1.bf16.msra.mxu1 %v9378_v1  ;;  %v4817_v1 = vpack.c.bf16 %v7598_v30, %v7597_v13 }
 0xbc1   : > { %4875 = vmatprep.subr.bf16.mxu1 %v9984_v20 }
 0xbc4   : > { %4876 = vmatpush1.bf16.msra.mxu1 %v9385_v63  ;;  %v4818_v63 = vpack.c.bf16 %v7608_v6, %v7607_v48  ;;  %v7756_v48 = vld [vmem:[%s9901_s4 + $0x20] ss:$16 sps:$4 sm:$0xff]  }
 0xbc5   : > { %4877 = vmatprep.subr.bf16.mxu1 %v9984_v20 }
 0xbc8   : > { %4878 = vmatpush1.bf16.msra.mxu1 %v4815_v56 }
 0xbc9   : > { %4879 = vmatprep.subr.bf16.mxu1 %v9984_v20 }
 0xbcc   : > { %4880 = vmatpush1.bf16.msra.mxu1 %v10019_v44 }
 0xbcd   : > { %4881 = vmatprep.subr.bf16.mxu1 %v9984_v20 }
 0xbd0   : > { %4882 = vmatpush1.bf16.msra.mxu1 %v4817_v1 }
 0xbd1   : > { %4883 = vmatprep.subr.bf16.mxu1 %v9984_v20 }
 0xbd4   : > { %4884 = vmatpush1.bf16.msra.mxu1 %v4818_v63 }
 0xbd5   : > { %4885 = vmatprep.subr.bf16.mxu1 %v9984_v20 }
 0xbd8   : > { %4886 = vmatpush1.bf16.msra.mxu1 %v4819_v53 }
 0xbd9   : > { %5032 = vmatprep.subr.bf16.mxu1 %v9984_v20 }
 0xbdb   : > { %4902 = vmatmul.mubr.bf16.vlgmr.msra.gmra.mrb[104].mxu1 %v9591_v39 }
 0xbdc   : > { %5033 = vmatpush1.bf16.msra.mxu1 %v10019_v44  ;;  %6118 = vmatprep.mubr.msk.bf16.mxu1 %vm3716_vm0, %v9598_v34 }
 0xbdd   : > { %5034 = vmatprep.subr.bf16.mxu1 %v9984_v20 }
 0xbe0   : > { %5035 = vmatpush1.bf16.msra.mxu1 %v4817_v1  ;;  %v7755_v1 = vld [vmem:[%s9901_s4 + $0x24] ss:$16 sps:$4 sm:$0xff]  }
 0xbe1   : > { %5036 = vmatprep.subr.bf16.mxu1 %v9984_v20 }
 0xbe3   : > { %4910 = vmatmul.mubr.bf16.gmra.mrb[108].mxu1 %v9607_v17 }
 0xbe4   : > { %5037 = vmatpush1.bf16.msra.mxu1 %v4818_v63  ;;  %6119 = vmatprep.mubr.msk.bf16.mxu1 %vm3716_vm0, %v9565_v24  ;;  %v10024_v63 = vld [vmem:[#allocation10_spill] sm:$0xff] }
 0xbe5   : > { %5038 = vmatprep.subr.bf16.mxu1 %v9984_v20 }
 0xbe8   : > { %5039 = vmatpush1.bf16.msra.mxu1 %v4819_v53 }
 0xbe9   : > { %5040 = vmatprep.subr.bf16.mxu1 %v9984_v20 }
 0xbec   : > { %5041 = vmatpush1.bf16.msra.mxu1 %v4978_v32 }
 0xbed   : > { %5042 = vmatprep.subr.bf16.mxu1 %v9984_v20 }
 0xbf0   : > { %5043 = vmatpush1.bf16.msra.mxu1 %v10020_v40 }
 0xbf1   : > { %5044 = vmatprep.subr.bf16.mxu1 %v9984_v20 }
 0xbf4   : > { %5045 = vmatpush1.bf16.msra.mxu1 %v9621_v3 }
 0xbf5   : > { %5046 = vmatprep.subr.bf16.mxu1 %v9984_v20 }
 0xbf8   : > { %5047 = vmatpush1.bf16.msra.mxu1 %v9627_v52 }
 0xbf9   : > { %5048 = vmatprep.subr.bf16.mxu1 %v9984_v20 }
 0xbfc   : > { %5049 = vmatpush1.bf16.msra.mxu1 %v9633_v29 }
 0xbfd   : > { %6507 = vmatprep.subr.bf16.mxu1 %v8962_v5 }
 0xbff   : > { %5065 = vmatmul.mubr.bf16.vlgmr.msra.gmra.mrb[112].mxu1 %v9591_v39 }
 0xc00   : > { %6508 = vmatpush3.bf16.msra.mxu1 %v10007_v54  ;;  %6120 = vmatprep.mubr.msk.bf16.mxu1 %vm3716_vm0, %v9598_v34  ;;  %v7686_v54 = vpop.permute.xlu0 %7685 }
 0xc01   : > { %6509 = vmatprep.subr.bf16.mxu1 %v9450_v59  ;;  %v7687_v60 = vunpack.i.l.bf16 %v7686_v54 }
 0xc04   : > { %6510 = vmatpush3.bf16.msra.mxu1 %v10015_v47  ;;  %v7688_v47 = vunpack.i.h.bf16 %v7686_v54  ;;  %v9674_v6 = vpop.permute.xlu0 %7700  ;;  %v9712_v54 = vpop.permute.xlu1 %7690 }
 0xc05   : > { %6511 = vmatprep.subr.bf16.mxu1 %v8997_v2 }
 0xc06   : > { %v5341_v12 = vpack.c.bf16 %v7688_v47, %v7687_v60 }
 0xc07   : > { %5073 = vmatmul.mubr.bf16.gmra.mrb[116].mxu1 %v9607_v17 }
 0xc08   : > { %6512 = vmatpush3.bf16.msra.mxu1 %v10016_v16  ;;  %5380 = vmatprep.mubr.bf16.mxu1 %v7753_v55  ;;  %v6457_v16 = vpop.f32.mrb[100].mxu0 }
 0xc09   : > { %6513 = vmatprep.subr.bf16.mxu1 %v10019_v44  ;;  %v6458_v58 = vpop.f32.mrb[101].mxu0 }
 0xc0a   : > { %v9659_v56 = vadd.f32 %v6458_v58, %v6457_v16 }
 0xc0c   : > { %6514 = vmatpush3.bf16.msra.mxu1 %v10017_v35  ;;  %v6460_v35 = vpop.f32.mrb[102].mxu0 }
 0xc0d   : > { %6515 = vmatprep.subr.bf16.mxu1 %v10021_v50  ;;  %v6461_v30 = vpop.f32.mrb[103].mxu0 }
 0xc0e   : > { %v9662_v13 = vadd.f32 %v6461_v30, %v6460_v35  ;;  %v6463_v53 = vpop.f32.mrb[104].mxu0 }
 0xc0f   : > { %v6464_v7 = vpop.f32.mrb[105].mxu0 }
 0xc10   : > { %6516 = vmatpush3.bf16.msra.mxu1 %v9422_v25  ;;  %v7754_v25 = vld [vmem:[%s9901_s4] ss:$16 sps:$4 sm:$0xff]   ;;  %v9685_v32 = vadd.f32 %v6464_v7, %v6463_v53 }
 0xc11   : > { %6517 = vmatprep.subr.bf16.mxu1 %v10022_v45 }
 0xc14   : > { %6518 = vmatpush3.bf16.msra.mxu1 %v10018_v62 }
 0xc15   : > { %6519 = vmatprep.subr.bf16.mxu1 %v5341_v12 }
 0xc18   : > { %6520 = vmatpush3.bf16.msra.mxu1 %v8953_v0 }
 0xc19   : > { %6521 = vmatprep.subr.bf16.mxu1 %v10023_v9 }
 0xc1c   : > { %6522 = vmatpush3.bf16.msra.mxu1 %v8964_v22 }
 0xc1d   : > { %6535 = vmatprep.subr.bf16.mxu1 %v10022_v45 }
 0xc1f   : > { %5381 = vmatmul.mubr.bf16.vlgmr.msra.gmra.mrb[120].mxu1 %v7754_v25 }
 0xc20   : > { %6536 = vmatpush3.bf16.msra.mxu1 %v10018_v62  ;;  %5388 = vmatprep.mubr.bf16.mxu1 %v7755_v1  ;;  %v7711_v62 = vpop.permute.xlu0 %7710 }
 0xc21   : > { %6537 = vmatprep.subr.bf16.mxu1 %v5341_v12  ;;  %v7712_v61 = vunpack.i.l.bf16 %v7711_v62 }
 0xc24   : > { %6538 = vmatpush3.bf16.msra.mxu1 %v8953_v0  ;;  %v7713_v0 = vunpack.i.h.bf16 %v7711_v62  ;;  %v9722_v12 = vpop.permute.xlu0 %7720 }
 0xc25   : > { %6539 = vmatprep.subr.bf16.mxu1 %v10023_v9 }
 0xc26   : > { %v5505_v31 = vpack.c.bf16 %v7713_v0, %v7712_v61 }
 0xc27   : > { %5389 = vmatmul.mubr.bf16.gmra.mrb[124].mxu1 %v7756_v48 }
 0xc28   : > { %6540 = vmatpush3.bf16.msra.mxu1 %v8964_v22  ;;  %5544 = vmatprep.mubr.bf16.mxu1 %v7753_v55  ;;  %v6466_v22 = vpop.f32.mrb[106].mxu0  ;;  %v9726_v35 = vpop.permute.xlu0 %4177 }
 0xc29   : > { %6541 = vmatprep.subr.bf16.mxu1 %v10020_v40  ;;  %v6467_v41 = vpop.f32.mrb[107].mxu0 }
 0xc2a   : > { %v9688_v57 = vadd.f32 %v6467_v41, %v6466_v22 }
 0xc2c   : > { %6542 = vmatpush3.bf16.msra.mxu1 %v8962_v5  ;;  %v6485_v5 = vpop.f32.mrb[108].mxu0 }
 0xc2d   : > { %6543 = vmatprep.subr.bf16.mxu1 %v10024_v63 }
 0xc30   : > { %6544 = vmatpush3.bf16.msra.mxu1 %v9450_v59  ;;  %v6486_v59 = vpop.f32.mrb[109].mxu0 }
 0xc31   : > { %6545 = vmatprep.subr.bf16.mxu1 %v10025_v46  ;;  %v9694_v28 = vadd.f32 %v6486_v59, %v6485_v5  ;;  %v6488_v21 = vpop.f32.mrb[110].mxu0 }
 0xc32   : > { %v6489_v8 = vpop.f32.mrb[111].mxu0 }
 0xc33   : > { %v9697_v11 = vadd.f32 %v6489_v8, %v6488_v21 }
 0xc34   : > { %6546 = vmatpush3.bf16.msra.mxu1 %v8997_v2  ;;  %v6491_v2 = vpop.f32.mrb[112].mxu0 }
 0xc35   : > { %6547 = vmatprep.subr.bf16.mxu1 %v5505_v31  ;;  %v6492_v10 = vpop.f32.mrb[113].mxu0 }
 0xc36   : > { %v6494_v23 = vpop.f32.mrb[114].mxu0 }
 0xc38   : > { %6548 = vmatpush3.bf16.msra.mxu1 %v10019_v44  ;;  %v6495_v44 = vpop.f32.mrb[115].mxu0 }
 0xc39   : > { %6549 = vmatprep.subr.bf16.mxu1 %v5506_v51  ;;  %v9708_v51 = vadd.f32 %v6492_v10, %v6491_v2  ;;  %v9710_v55 = vadd.f32 %v6495_v44, %v6494_v23 }
 0xc3c   : > { %6550 = vmatpush3.bf16.msra.mxu1 %v10021_v50  ;;  %v9714_v50 = vpop.permute.xlu1 %7695 }
 0xc3d   : > { %7057 = vmatprep.subr.msk.mxu1 %vm7890_vm5, %v10014_v38 }
 0xc3f   : > { %5545 = vmatmul.mubr.bf16.vlgmr.msra.gmra.mrb[128].mxu1 %v7754_v25 }
 0xc40   : > { %5552 = vmatprep.mubr.bf16.mxu1 %v7755_v1  ;;  %7058 = vmatpush3.msk.msra.mxu1 %vm7890_vm5, %v10014_v38  ;;  %v9716_v47 = vpop.permute.xlu1 %7705  ;;  %v9730_v1 = vpop.permute.xlu0 %4187 }
 0xc41   : > { %6969 = vmatprep.subr.msk.mxu1 %vm7945_vm10, %v10014_v38 }
 0xc44   : > { %v9718_v60 = vpop.permute.xlu1 %7715  ;;  %v9734_v53 = vpop.permute.xlu0 %4201 }
 0xc47   : > { %5553 = vmatmul.mubr.bf16.gmra.mrb[132].mxu1 %v7756_v48 }
 0xc48   : > { %v9720_v45 = vpop.permute.xlu1 %7725 }
 0xc4c   : > { %v9724_v58 = vpop.permute.xlu1 %4182 }
 0xc50   : > { %v9728_v30 = vpop.permute.xlu1 %4192 }
 0xc54   : > { %v9732_v61 = vpop.permute.xlu1 %4206 }
 0xc58   : > { %v9741_v23 = vpop.permute.xlu1 %4216 }
 0xc7e   : > { %v6933_v16 = vpop.f32.mrb[62].mxu1 }
 0xc7f   : > { %v4635_v9 = vpop.f32.mrb[63].mxu1 }
 0xc86   : > { %v6936_v25 = vpop.f32.mrb[96].mxu1 }
 0xc87   : > { %v4645_v48 = vpop.f32.mrb[97].mxu1 }
 0xc8a   : > { %v6941_v62 = vpop.f32.mrb[98].mxu1 }
 0xc8b   : > { %v4740_v63 = vmax.f32 %v6933_v16, %v6941_v62  ;;  %v4720_v0 = vpop.f32.mrb[99].mxu1 }
 0xc8c   : > { %v4739_v46 = vmax.f32 %v4635_v9, %v4720_v0  ;;  %v9744_v9 = vpop.permute.xlu0 %4211 }
 0xc8d   : > { %v4744_v7 = vadd.f32 %v4740_v63, %v9724_v58 }
 0xc8e   : > { %v4743_v31 = vadd.f32 %v4739_v46, %v9726_v35  ;;  %v6944_v22 = vpop.f32.mrb[100].mxu1 }
 0xc8f   : > { %v4748_v41 = vmul.f32 %v4744_v7, %v9732_v61  ;;  %v4742_v5 = vmax.f32 %v6936_v25, %v6944_v22  ;;  %v4730_v59 = vpop.f32.mrb[101].mxu1 }
 0xc90   : > { %v4747_v21 = vmul.f32 %v4743_v31, %v9734_v53  ;;  %v4741_v8 = vmax.f32 %v4645_v48, %v4730_v59 }
 0xc91   : > { %v4752_v2 = vmax.f32 %v4748_v41, 0.0  ;;  %v4746_v10 = vadd.f32 %v4742_v5, %v9728_v30 }
 0xc92   : > { %v4751_v44 = vmax.f32 %v4747_v21, 0.0  ;;  %v4745_v16 = vadd.f32 %v4741_v8, %v9730_v1 }
 0xc93   : > { %v4750_v62 = vmul.f32 %v4746_v10, %v9741_v23  ;;  %5818 = vrot.lane.b32.xlu1 %v4752_v2, %s7776_s17 }
 0xc94   : > { %v4749_v25 = vmul.f32 %v4745_v16, %v9744_v9  ;;  %5816 = vrot.lane.b32.xlu0 %v4751_v44, %s7776_s17 }
 0xc95   : > { %v4754_v63 = vmax.f32 %v4750_v62, 0.0 }
 0xc96   : > { %v4753_v0 = vmax.f32 %v4749_v25, 0.0 }
 0xc97   : > { %5822 = vrot.lane.b32.xlu1 %v4754_v63, %s7776_s17 }
 0xc98   : > { %5820 = vrot.lane.b32.xlu0 %v4753_v0, %s7776_s17 }
 0xcae   : > { %v4903_v48 = vpop.f32.mrb[104].mxu1 }
 0xcaf   : > { %v4904_v46 = vadd.f32 %v9659_v56, %v4903_v48  ;;  %v4905_v7 = vpop.f32.mrb[105].mxu1 }
 0xcb0   : > { %v4906_v31 = vpop.f32.mrb[106].mxu1 }
 0xcb1   : > { %v4907_v22 = vadd.f32 %v9662_v13, %v4906_v31  ;;  %v4908_v41 = vpop.f32.mrb[107].mxu1 }
 0xcb2   : > { %v7698_v41 = vunpack.i.h.bf16 %v9714_v50 }
 0xcb6   : > { %v4911_v5 = vpop.f32.mrb[108].mxu1 }
 0xcb7   : > { %v4912_v59 = vadd.f32 %v9685_v32, %v4911_v5  ;;  %v4913_v21 = vpop.f32.mrb[109].mxu1  ;;  %v7703_v5 = vunpack.i.h.bf16 %v9674_v6 }
 0xcb8   : > { %v4914_v8 = vpop.f32.mrb[110].mxu1  ;;  %v7718_v21 = vunpack.i.h.bf16 %v9718_v60 }
 0xcb9   : > { %v4915_v2 = vadd.f32 %v9688_v57, %v4914_v8  ;;  %v4916_v10 = vpop.f32.mrb[111].mxu1  ;;  %v7717_v8 = vunpack.i.l.bf16 %v9718_v60 }
 0xcba   : > { %v7722_v10 = vunpack.i.l.bf16 %v9722_v12 }
 0xcd2   : > { %v5066_v44 = vpop.f32.mrb[112].mxu1 }
 0xcd3   : > { %v5067_v16 = vadd.f32 %v9694_v28, %v5066_v44  ;;  %v5068_v62 = vpop.f32.mrb[113].mxu1  ;;  %v7727_v44 = vunpack.i.l.bf16 %v9720_v45 }
 0xcd4   : > { %v5069_v25 = vpop.f32.mrb[114].mxu1 }
 0xcd5   : > { %v5081_v63 = vmax.f32 %v4904_v46, %v5067_v16  ;;  %v5070_v56 = vadd.f32 %v9697_v11, %v5069_v25  ;;  %v5071_v0 = vpop.f32.mrb[115].mxu1 }
 0xcd7   : > { %v5082_v48 = vmax.f32 %v4907_v22, %v5070_v56  ;;  %6947 = vmatprep.mubr.msk.f32.mxu0 %vm3988_vm1, %v5081_v63  ;;  %v7692_v22 = vunpack.i.l.bf16 %v9712_v54 }
 0xcd9   : > { %6948 = vmatmul.mubr.msk.f32.vlgmr.msra.gmra.mrb[82].mxu0 %vm3988_vm1, %v5082_v48 }
 0xcda   : > { %v5074_v13 = vpop.f32.mrb[116].mxu1  ;;  %6954 = vmatpush3.msk.msra.mxu0 %vm7945_vm10, %v10014_v38 }
 0xcdb   : > { %v5075_v32 = vadd.f32 %v9708_v51, %v5074_v13  ;;  %v5076_v57 = vpop.f32.mrb[117].mxu1  ;;  %5397 = vmatprep.subr.bf16.mxu0 %v9984_v20  ;;  %v7683_v51 = vunpack.i.h.bf16 %v9644_v14 }
 0xcdc   : > { %v5077_v28 = vpop.f32.mrb[118].mxu1 }
 0xcdd   : > { %v5083_v46 = vmax.f32 %v4912_v59, %v5075_v32  ;;  %v5078_v11 = vadd.f32 %v9710_v55, %v5077_v28  ;;  %v5079_v7 = vpop.f32.mrb[119].mxu1  ;;  %v7702_v59 = vunpack.i.l.bf16 %v9674_v6  ;;  %v7708_v6 = vunpack.i.h.bf16 %v9716_v47 }
 0xcdf   : > { %v5084_v31 = vmax.f32 %v4915_v2, %v5078_v11  ;;  %6950 = vmatprep.mubr.msk.f32.mxu0 %vm3988_vm1, %v5083_v46  ;;  %v5509_v2 = vpack.c.bf16 %v7718_v21, %v7717_v8 }
 0xce1   : > { %6951 = vmatmul.mubr.msk.f32.gmra.mrb[116].mxu0 %vm3988_vm1, %v5084_v31 }
 0xce2   : > { %6955 = vmatprep.mubr.msk.f32.mxu0 %vm3988_vm1, %v5081_v63 }
 0xce5   : > { %6956 = vmatmul.mubr.msk.f32.vlgmr.msra.gmra.mrb[118].mxu0 %vm3988_vm1, %v5082_v48 }
 0xce6   : > { %5398 = vmatpush1.bf16.msra.mxu0 %v10020_v40  ;;  %6958 = vmatprep.mubr.msk.f32.mxu0 %vm3988_vm1, %v5083_v46  ;;  %v7682_v40 = vunpack.i.l.bf16 %v9644_v14  ;;  %v7697_v14 = vunpack.i.l.bf16 %v9714_v50  ;;  %v7707_v50 = vunpack.i.l.bf16 %v9716_v47  ;;  %v7723_v47 = vunpack.i.h.bf16 %v9722_v12 }
 0xce7   : > { %5399 = vmatprep.subr.bf16.mxu0 %v9984_v20 }
 0xce8   : > { %v5343_v55 = vpack.c.bf16 %v7683_v51, %v7682_v40  ;;  %v5510_v16 = vpack.c.bf16 %v7723_v47, %v7722_v10 }
 0xce9   : > { %6959 = vmatmul.mubr.msk.f32.gmra.mrb[120].mxu0 %vm3988_vm1, %v5084_v31 }
 0xcea   : > { %5400 = vmatpush1.bf16.msra.mxu0 %v9621_v3  ;;  %6131 = vmatprep.mubr.msk.bf16.mxu0 %vm3716_vm0, %v9565_v24  ;;  %v7693_v3 = vunpack.i.h.bf16 %v9712_v54  ;;  %v5347_v54 = vpack.c.bf16 %v7703_v5, %v7702_v59 }
 0xceb   : > { %5401 = vmatprep.subr.bf16.mxu0 %v9984_v20 }
 0xcee   : > { %5402 = vmatpush1.bf16.msra.mxu0 %v9627_v52  ;;  %v5345_v52 = vpack.c.bf16 %v7693_v3, %v7692_v22 }
 0xcef   : > { %5403 = vmatprep.subr.bf16.mxu0 %v9984_v20 }
 0xcf2   : > { %5404 = vmatpush1.bf16.msra.mxu0 %v9633_v29  ;;  %v5346_v29 = vpack.c.bf16 %v7698_v41, %v7697_v14 }
 0xcf3   : > { %5405 = vmatprep.subr.bf16.mxu0 %v9984_v20 }
 0xcf6   : > { %5406 = vmatpush1.bf16.msra.mxu0 %v5343_v55 }
 0xcf7   : > { %5407 = vmatprep.subr.bf16.mxu0 %v9984_v20 }
 0xcfa   : > { %5408 = vmatpush1.bf16.msra.mxu0 %v9481_v36 }
 0xcfb   : > { %5409 = vmatprep.subr.bf16.mxu0 %v9984_v20 }
 0xcfe   : > { %5410 = vmatpush1.bf16.msra.mxu0 %v5345_v52 }
 0xcff   : > { %5411 = vmatprep.subr.bf16.mxu0 %v9984_v20 }
 0xd02   : > { %5412 = vmatpush1.bf16.msra.mxu0 %v5346_v29 }
 0xd03   : > { %5413 = vmatprep.subr.bf16.mxu0 %v9984_v20 }
 0xd06   : > { %5414 = vmatpush1.bf16.msra.mxu0 %v5347_v54 }
 0xd07   : > { %5561 = vmatprep.subr.bf16.mxu0 %v9984_v20 }
 0xd09   : > { %5430 = vmatmul.mubr.bf16.vlgmr.msra.gmra.mrb[124].mxu0 %v9591_v39 }
 0xd0a   : > { %5562 = vmatpush1.bf16.msra.mxu0 %v9481_v36  ;;  %6132 = vmatprep.mubr.msk.bf16.mxu0 %vm3716_vm0, %v9598_v34  ;;  %v5507_v36 = vpack.c.bf16 %v7708_v6, %v7707_v50 }
 0xd0b   : > { %5563 = vmatprep.subr.bf16.mxu0 %v9984_v20 }
 0xd0e   : > { %5564 = vmatpush1.bf16.msra.mxu0 %v5345_v52 }
 0xd0f   : > { %5565 = vmatprep.subr.bf16.mxu0 %v9984_v20 }
 0xd11   : > { %5438 = vmatmul.mubr.bf16.gmra.mrb[128].mxu0 %v9607_v17 }
 0xd12   : > { %5566 = vmatpush1.bf16.msra.mxu0 %v5346_v29  ;;  %6133 = vmatprep.mubr.msk.bf16.mxu0 %vm3716_vm0, %v9565_v24  ;;  %v7728_v24 = vunpack.i.h.bf16 %v9720_v45 }
 0xd13   : > { %5567 = vmatprep.subr.bf16.mxu0 %v9984_v20 }
 0xd14   : > { %v5511_v60 = vpack.c.bf16 %v7728_v24, %v7727_v44 }
 0xd16   : > { %5568 = vmatpush1.bf16.msra.mxu0 %v5347_v54 }
 0xd17   : > { %5569 = vmatprep.subr.bf16.mxu0 %v9984_v20 }
 0xd1a   : > { %5570 = vmatpush1.bf16.msra.mxu0 %v5507_v36 }
 0xd1b   : > { %5571 = vmatprep.subr.bf16.mxu0 %v9984_v20 }
 0xd1e   : > { %5572 = vmatpush1.bf16.msra.mxu0 %v9492_v27  ;;  %v6523_v27 = vpop.f32.mrb[120].mxu1 }
 0xd1f   : > { %5573 = vmatprep.subr.bf16.mxu0 %v9984_v20  ;;  %v6524_v45 = vpop.f32.mrb[121].mxu1 }
 0xd20   : > { %v6525_v12 = vadd.f32 %v6524_v45, %v6523_v27 }
 0xd22   : > { %5574 = vmatpush1.bf16.msra.mxu0 %v5509_v2 }
 0xd23   : > { %5575 = vmatprep.subr.bf16.mxu0 %v9984_v20 }
 0xd26   : > { %5576 = vmatpush1.bf16.msra.mxu0 %v5510_v16 }
 0xd27   : > { %5577 = vmatprep.subr.bf16.mxu0 %v9984_v20  ;;  %v6526_v20 = vpop.f32.mrb[122].mxu1 }
 0xd28   : > { %v6527_v62 = vpop.f32.mrb[123].mxu1 }
 0xd29   : > { %v6528_v25 = vadd.f32 %v6527_v62, %v6526_v20  ;;  %v6529_v63 = vpop.f32.mrb[124].mxu1 }
 0xd2a   : > { %5578 = vmatpush1.bf16.msra.mxu0 %v5511_v60  ;;  %v6530_v56 = vpop.f32.mrb[125].mxu1 }
 0xd2b   : > { %6961 = vmatprep.subr.msk.mxu0 %vm7890_vm5, %v10014_v38  ;;  %v6531_v0 = vadd.f32 %v6530_v56, %v6529_v63  ;;  %v6532_v48 = vpop.f32.mrb[126].mxu1 }
 0xd2d   : > { %5594 = vmatmul.mubr.bf16.vlgmr.msra.gmra.mrb[132].mxu0 %v9591_v39  ;;  %v6533_v39 = vpop.f32.mrb[127].mxu1 }
 0xd2e   : > { %6134 = vmatprep.mubr.msk.bf16.mxu0 %vm3716_vm0, %v9598_v34  ;;  %6962 = vmatpush3.msk.msra.mxu0 %vm7890_vm5, %v10014_v38  ;;  %v6534_v13 = vadd.f32 %v6533_v39, %v6532_v48  ;;  %v6551_v32 = vpop.f32.mrb[128].mxu1 }
 0xd2f   : > { %v6552_v34 = vpop.f32.mrb[129].mxu1 }
 0xd30   : > { %v6553_v57 = vadd.f32 %v6552_v34, %v6551_v32  ;;  %v6554_v28 = vpop.f32.mrb[130].mxu1 }
 0xd31   : > { %v6555_v4 = vpop.f32.mrb[131].mxu1 }
 0xd32   : > { %v6556_v46 = vadd.f32 %v6555_v4, %v6554_v28  ;;  %v6557_v11 = vpop.f32.mrb[132].mxu1 }
 0xd35   : > { %5602 = vmatmul.mubr.bf16.gmra.mrb[136].mxu0 %v9607_v17  ;;  %v6558_v17 = vpop.f32.mrb[133].mxu1 }
 0xd36   : > { %v6560_v7 = vpop.f32.mrb[134].mxu1  ;;  %v6559_v31 = vadd.f32 %v6558_v17, %v6557_v11 }
 0xd37   : > { %v6561_v51 = vpop.f32.mrb[135].mxu1 }
 0xd38   : > { %v6562_v40 = vadd.f32 %v6561_v51, %v6560_v7 }
 0xdac   : > { %v6949_v55 = vpop.f32.mrb[82].mxu0 }
 0xdad   : > { %v5163_v3 = vpop.f32.mrb[83].mxu0 }
 0xdb4   : > { %v6952_v22 = vpop.f32.mrb[116].mxu0 }
 0xdb5   : > { %v5173_v52 = vpop.f32.mrb[117].mxu0 }
 0xdb8   : > { %v6957_v41 = vpop.f32.mrb[118].mxu0 }
 0xdb9   : > { %v5268_v14 = vmax.f32 %v6949_v55, %v6957_v41  ;;  %v5248_v29 = vpop.f32.mrb[119].mxu0 }
 0xdba   : > { %v5267_v5 = vmax.f32 %v5163_v3, %v5248_v29 }
 0xdbb   : > { %v5272_v59 = vadd.f32 %v5268_v14, %v9724_v58 }
 0xdbc   : > { %v5271_v54 = vadd.f32 %v5267_v5, %v9726_v35  ;;  %v6960_v6 = vpop.f32.mrb[120].mxu0 }
 0xdbd   : > { %v5276_v50 = vmul.f32 %v5272_v59, %v9732_v61  ;;  %v5270_v36 = vmax.f32 %v6952_v22, %v6960_v6  ;;  %v5258_v21 = vpop.f32.mrb[121].mxu0 }
 0xdbe   : > { %v5275_v8 = vmul.f32 %v5271_v54, %v9734_v53  ;;  %v5269_v2 = vmax.f32 %v5173_v52, %v5258_v21 }
 0xdbf   : > { %v5280_v47 = vmax.f32 %v5276_v50, 0.0  ;;  %v5274_v10 = vadd.f32 %v5270_v36, %v9728_v30 }
 0xdc0   : > { %v5279_v24 = vmax.f32 %v5275_v8, 0.0  ;;  %v5273_v44 = vadd.f32 %v5269_v2, %v9730_v1 }
 0xdc1   : > { %v5278_v16 = vmul.f32 %v5274_v10, %v9741_v23  ;;  %5834 = vrot.lane.b32.xlu1 %v5280_v47, %s7777_s18 }
 0xdc2   : > { %v5277_v60 = vmul.f32 %v5273_v44, %v9744_v9  ;;  %5832 = vrot.lane.b32.xlu0 %v5279_v24, %s7777_s18 }
 0xdc3   : > { %v5282_v27 = vmax.f32 %v5278_v16, 0.0 }
 0xdc4   : > { %v5281_v45 = vmax.f32 %v5277_v60, 0.0 }
 0xdc5   : > { %5838 = vrot.lane.b32.xlu1 %v5282_v27, %s7777_s18 }
 0xdc6   : > { %5836 = vrot.lane.b32.xlu0 %v5281_v45, %s7777_s18 }
 0xddc   : > { %v5431_v20 = vpop.f32.mrb[124].mxu0 }
 0xddd   : > { %v5432_v62 = vadd.f32 %v6525_v12, %v5431_v20  ;;  %v5433_v63 = vpop.f32.mrb[125].mxu0 }
 0xdde   : > { %v5434_v56 = vpop.f32.mrb[126].mxu0 }
 0xddf   : > { %v5435_v48 = vadd.f32 %v6528_v25, %v5434_v56  ;;  %v5436_v39 = vpop.f32.mrb[127].mxu0 }
 0xde0   : > { %v5817_v39 = vpop.permute.xlu0 %5816 }
 0xde4   : > { %v5439_v32 = vpop.f32.mrb[128].mxu0 }
 0xde5   : > { %v5440_v34 = vadd.f32 %v6531_v0, %v5439_v32  ;;  %v5441_v28 = vpop.f32.mrb[129].mxu0 }
 0xde6   : > { %v5442_v4 = vpop.f32.mrb[130].mxu0 }
 0xde7   : > { %v5443_v11 = vadd.f32 %v6534_v13, %v5442_v4  ;;  %v5444_v17 = vpop.f32.mrb[131].mxu0  ;;  %v10026_v4 = vmax.f32 %v9487_v26, %v9504_v15  ;;  %v10029_v26 = vmax.f32 %v9501_v18, %v9524_v42 }
 0xde9   : > { %v4197_v15 = vadd.f32 %v9730_v1, %v10029_v26 }
 0xe00   : > { %v5595_v7 = vpop.f32.mrb[132].mxu0 }
 0xe01   : > { %v5596_v51 = vadd.f32 %v6553_v57, %v5595_v7  ;;  %v5597_v55 = vpop.f32.mrb[133].mxu0  ;;  %v10027_v7 = vmax.f32 %v9490_v33, %v9509_v19 }
 0xe02   : > { %v5598_v3 = vpop.f32.mrb[134].mxu0 }
 0xe03   : > { %v5610_v22 = vmax.f32 %v5432_v62, %v5596_v51  ;;  %v5599_v52 = vadd.f32 %v6556_v46, %v5598_v3  ;;  %v5600_v41 = vpop.f32.mrb[135].mxu0  ;;  %v4195_v51 = vadd.f32 %v9726_v35, %v10027_v7 }
 0xe05   : > { %v5611_v14 = vmax.f32 %v5435_v48, %v5599_v52  ;;  %6963 = vmatprep.mubr.msk.f32.mxu0 %vm3988_vm1, %v5610_v22  ;;  %v5819_v48 = vpop.permute.xlu1 %5818  ;;  %v4219_v3 = vmul.f32 %v9734_v53, %v4195_v51 }
 0xe07   : > { %6964 = vmatmul.mubr.msk.f32.vlgmr.msra.gmra.mrb[122].mxu0 %vm3988_vm1, %v5611_v14  ;;  %v4223_v41 = vmax.f32 %v4219_v3, 0.0 }
 0xe08   : > { %v5603_v12 = vpop.f32.mrb[136].mxu0 }
 0xe09   : > { %v5604_v25 = vadd.f32 %v6559_v31, %v5603_v12  ;;  %v5605_v29 = vpop.f32.mrb[137].mxu0  ;;  %v5823_v32 = vpop.permute.xlu1 %5822 }
 0xe0a   : > { %v5606_v0 = vpop.f32.mrb[138].mxu0 }
 0xe0b   : > { %v5612_v5 = vmax.f32 %v5440_v34, %v5604_v25  ;;  %v5607_v59 = vadd.f32 %v6562_v40, %v5606_v0  ;;  %v5608_v13 = vpop.f32.mrb[139].mxu0  ;;  %v5821_v34 = vpop.permute.xlu0 %5820 }
 0xe0d   : > { %v5613_v54 = vmax.f32 %v5443_v11, %v5607_v59  ;;  %6966 = vmatprep.mubr.msk.f32.mxu1 %vm3988_vm1, %v5612_v5  ;;  %v4196_v11 = vadd.f32 %v9724_v58, %v10026_v4 }
 0xe0f   : > { %6967 = vmatmul.mubr.msk.f32.vlgmr.msra.gmra.mrb[102].mxu1 %vm3988_vm1, %v5613_v54  ;;  %v4220_v55 = vmul.f32 %v9732_v61, %v4196_v11 }
 0xe10   : > { %6970 = vmatpush3.msk.msra.mxu1 %vm7945_vm10, %v10014_v38  ;;  %6971 = vmatprep.mubr.msk.f32.mxu1 %vm3988_vm1, %v5610_v22  ;;  %v10028_v22 = vmax.f32 %v9498_v43, %v9520_v37  ;;  %v5861_v43 = vsel %vm5860_vm2, %v4223_v41, %v5817_v39 }
 0xe11   : > { %v4224_v19 = vmax.f32 %v4220_v55, 0.0 }
 0xe12   : > { %v4198_v52 = vadd.f32 %v9728_v30, %v10028_v22 }
 0xe13   : > { %6972 = vmatmul.mubr.msk.f32.vlgmr.msra.gmra.mrb[136].mxu1 %vm3988_vm1, %v5611_v14 }
 0xe14   : > { %6974 = vmatprep.mubr.msk.f32.mxu1 %vm3988_vm1, %v5612_v5  ;;  %v4222_v33 = vmul.f32 %v9741_v23, %v4198_v52 }
 0xe16   : > { %v4226_v42 = vmax.f32 %v4222_v33, 0.0 }
 0xe17   : > { %6975 = vmatmul.mubr.msk.f32.gmra.mrb[138].mxu1 %vm3988_vm1, %v5613_v54 }
 0xe18   : > { %v5864_v12 = vsel %vm5860_vm2, %v4226_v42, %v5823_v32 }
 0xe33   : > { %v5835_v28 = vpop.permute.xlu1 %5834 }
 0xe34   : > { %v5833_v17 = vpop.permute.xlu0 %5832 }
 0xeda   : > { %v6965_v57 = vpop.f32.mrb[122].mxu0 }
 0xedb   : > { %v5692_v46 = vpop.f32.mrb[123].mxu0 }
 0xee2   : > { %v6968_v31 = vpop.f32.mrb[102].mxu1 }
 0xee3   : > { %v5702_v40 = vpop.f32.mrb[103].mxu1 }
 0xee6   : > { %v6973_v6 = vpop.f32.mrb[136].mxu1 }
 0xee7   : > { %v5797_v50 = vmax.f32 %v6965_v57, %v6973_v6  ;;  %v5777_v36 = vpop.f32.mrb[137].mxu1 }
 0xee8   : > { %v5796_v21 = vmax.f32 %v5692_v46, %v5777_v36 }
 0xee9   : > { %v5801_v8 = vadd.f32 %v5797_v50, %v9724_v58  ;;  %v5839_v58 = vpop.permute.xlu1 %5838 }
 0xeea   : > { %v5800_v49 = vadd.f32 %v5796_v21, %v9726_v35  ;;  %v6976_v38 = vpop.f32.mrb[138].mxu1  ;;  %v5837_v35 = vpop.permute.xlu0 %5836  ;;  %v5868_v29 = vsel %vm3988_vm1, %v5864_v12, %v5839_v58 }
 0xeeb   : > { %v5805_v2 = vmul.f32 %v5801_v8, %v9732_v61  ;;  %v5799_v47 = vmax.f32 %v6968_v31, %v6976_v38  ;;  %v5787_v10 = vpop.f32.mrb[139].mxu1  ;;  %v4221_v61 = vmul.f32 %v9744_v9, %v4197_v15 }
 0xeec   : > { %v5804_v24 = vmul.f32 %v5800_v49, %v9734_v53  ;;  %v5798_v44 = vmax.f32 %v5702_v40, %v5787_v10  ;;  %v5862_v53 = vsel %vm5860_vm2, %v4224_v19, %v5819_v48 }
 0xeed   : > { %v5809_v16 = vmax.f32 %v5805_v2, 0.0  ;;  %v5803_v60 = vadd.f32 %v5799_v47, %v9728_v30  ;;  %v5866_v18 = vsel %vm3988_vm1, %v5862_v53, %v5835_v28  ;;  %v5865_v30 = vsel %vm3988_vm1, %v5861_v43, %v5833_v17 }
 0xeee   : > { %v5808_v27 = vmax.f32 %v5804_v24, 0.0  ;;  %v5802_v45 = vadd.f32 %v5798_v44, %v9730_v1 }
 0xeef   : > { %v5807_v20 = vmul.f32 %v5803_v60, %v9741_v23  ;;  %5850 = vrot.lane.b32.xlu1 %v5809_v16, %s7778_s19 }
 0xef0   : > { %v5806_v62 = vmul.f32 %v5802_v45, %v9744_v9  ;;  %5848 = vrot.lane.b32.xlu0 %v5808_v27, %s7778_s19  ;;  %v4225_v9 = vmax.f32 %v4221_v61, 0.0 }
 0xef1   : > { %v5811_v63 = vmax.f32 %v5807_v20, 0.0 }
 0xef2   : > { %v5810_v56 = vmax.f32 %v5806_v62, 0.0  ;;  %v5863_v25 = vsel %vm5860_vm2, %v4225_v9, %v5821_v34 }
 0xef3   : > { %5854 = vrot.lane.b32.xlu1 %v5811_v63, %s7778_s19  ;;  %v5867_v5 = vsel %vm3988_vm1, %v5863_v25, %v5837_v35 }
 0xef4   : > { %5852 = vrot.lane.b32.xlu0 %v5810_v56, %s7778_s19 }
 0xf61   : > { %v5851_v37 = vpop.permute.xlu1 %5850 }
 0xf62   : > { %v5870_v1 = vsel %vm299_vm15, %v5866_v18, %v5851_v37  ;;  %v5849_v23 = vpop.permute.xlu0 %5848 }
 0xf63   : > { %5874 = vst.msk [vmem:[%s271_s24 + $0x8] sm:$0xff] %vm3716_vm0, %v5870_v1  ;;  %v5869_v14 = vsel %vm299_vm15, %v5865_v30, %v5849_v23 }
 0xf64   : > { %5873 = vst.msk [vmem:[%s271_s24] sm:$0xff] %vm3716_vm0, %v5869_v14 }
 0xf65   : > { %v5855_v0 = vpop.permute.xlu1 %5854 }
 0xf66   : > { %v5872_v59 = vsel %vm299_vm15, %v5868_v29, %v5855_v0  ;;  %v5853_v13 = vpop.permute.xlu0 %5852 }
 0xf67   : > { %5876 = vst.msk [vmem:[%s271_s24 + $0x18] sm:$0xff] %vm3716_vm0, %v5872_v59  ;;  %v5871_v54 = vsel %vm299_vm15, %v5867_v5, %v5853_v13 }
 0xf68   : > { %5875 = vst.msk [vmem:[%s271_s24 + $0x10] sm:$0xff] %vm3716_vm0, %v5871_v54 }
 0xf69 PF: > { %s16_s21 = sadd.s32 1, %s7763_s21  }
 0xf6a   : > { %p13_p4 = scmp.ge.s32.totalorder %s16_s21, 4  }
 0xf6c   :  { %15 = sbr.rel (!%p13_p4) target bundleno = 1 (0x1), region = 88 }

</bundles_post_ra>
